<compile_context>
chip_gen: v5e
topology: v5e:2x2
jax: 0.10.0
libtpu: 0.0.40
codegen_flags: <defaults>
</compile_context>

<pallas_src>
import functools

import jax
import jax.numpy as jnp
from jax.experimental import pallas as pl
from jax.experimental.pallas import tpu as pltpu


# ----------------------------------------------------------------------------
# Kernel 1: single-layer bidirectional LSTM (PyTorch gate order i, f, g, o).
# Grid: (num_batch_tiles,) marked "parallel".
#   Fused parameters per layer (bf16 for the MXU, f32 accumulation):
#     w_ih   : (D, 8H)  = [W_ih_fwd | W_ih_bwd]   (hoisted input projection)
#     w_hh_f : (H, 4H)  forward recurrent weights
#     w_hh_b : (H, 4H)  backward recurrent weights
#     b      : (1, 8H)  = [b_ih_f + b_hh_f | b_ih_b + b_hh_b]   (f32)
# ----------------------------------------------------------------------------
def _bilstm_kernel(x_ref, wih_ref, whhf_ref, whhb_ref, b_ref, y_ref,
                   hf_sc, cf_sc, hb_sc, cb_sc, gx_sc, *, hidden, unroll):
    T, B, D = x_ref.shape          # B is the per-program batch tile
    H = hidden
    G = 4 * H

    # Hoisted input projection for ALL timesteps and BOTH directions:
    # a single (T*B, D) x (D, 8H) bf16 matmul (f32 accumulate), bias folded in.
    gx = jnp.dot(x_ref[...].reshape(T * B, D).astype(wih_ref.dtype),
                 wih_ref[...], preferred_element_type=jnp.float32)
    gx = gx + b_ref[...]
    gx_sc[...] = gx.reshape(T, B, 2 * G)

    # zero initial states (PyTorch default); re-init every grid step.
    hf_sc[...] = jnp.zeros_like(hf_sc)
    cf_sc[...] = jnp.zeros_like(cf_sc)
    hb_sc[...] = jnp.zeros_like(hb_sc)
    cb_sc[...] = jnp.zeros_like(cb_sc)

    # Recurrent weights are loop-invariant: load once outside the time loop.
    whh_f = whhf_ref[...]
    whh_b = whhb_ref[...]

    # TODO(synk): for production H (multiple of 128) reorder fused columns so
    # every gate slice below lands on a 128-lane boundary; H=32 cannot.
    def gates(pre):
        i = jax.nn.sigmoid(pre[:, 0 * H:1 * H])
        f = jax.nn.sigmoid(pre[:, 1 * H:2 * H])
        g = jnp.tanh(pre[:, 2 * H:3 * H])
        o = jax.nn.sigmoid(pre[:, 3 * H:4 * H])
        return i, f, g, o

    def step(t, carry):
        tb = T - 1 - t

        # ---- forward direction, timestep t (no sublane concat) ------------
        pre_f = gx_sc[t][:, :G] + jnp.dot(
            hf_sc[...].astype(whh_f.dtype), whh_f,
            preferred_element_type=jnp.float32)
        i, f, g, o = gates(pre_f)
        c_f = f * cf_sc[...] + i * g
        h_f = o * jnp.tanh(c_f)
        cf_sc[...] = c_f
        hf_sc[...] = h_f
        y_ref[t, :, :H] = h_f            # store output directly (no scratch)

        # ---- backward direction, timestep T-1-t ----------------------------
        pre_b = gx_sc[tb][:, G:] + jnp.dot(
            hb_sc[...].astype(whh_b.dtype), whh_b,
            preferred_element_type=jnp.float32)
        i, f, g, o = gates(pre_b)
        c_b = f * cb_sc[...] + i * g
        h_b = o * jnp.tanh(c_b)
        cb_sc[...] = c_b
        hb_sc[...] = h_b
        y_ref[tb, :, H:] = h_b
        return carry

    # Short fixed trip count -> full unroll; capped unroll for long sequences.
    jax.lax.fori_loop(0, T, step, 0, unroll=unroll)


def bilstm_tm(x_tm, p):
    """x_tm: (T, B, D) time-major f32.  Returns (T, B, 2H) time-major f32."""
    T, B, D = x_tm.shape
    H = p["w_hh_f"].shape[0]
    G8 = 8 * H

    # Batch tile: full batch when tiny, otherwise a multiple of 8 (sublane).
    tb = B if B <= 8 else 8
    assert B % tb == 0, "batch tile must divide B"
    nb = B // tb

    # bf16 weights for the MXU (f32 accumulation); bias stays f32.
    w_ih = p["w_ih"].astype(jnp.bfloat16)
    w_hh_f = p["w_hh_f"].astype(jnp.bfloat16)
    w_hh_b = p["w_hh_b"].astype(jnp.bfloat16)

    # Scoped-VMEM budget: double-buffered x/y blocks + gate scratch + weights
    # (+ generous headroom for (8,128) padding and internal scratch).
    resident = 4 * (2 * T * tb * D + T * tb * G8 + 2 * T * tb * 2 * H
                    + 4 * tb * H + G8) + 2 * (D * G8 + 2 * H * 4 * H)
    vmem_limit = min(4 * resident + (16 << 20), 100 << 20)

    cost = pl.CostEstimate(
        flops=2 * T * B * D * G8 + 2 * T * B * H * G8 + 12 * T * B * 2 * H,
        transcendentals=5 * T * B * 2 * H,
        bytes_accessed=4 * (T * B * D + T * B * 2 * H + G8)
        + 2 * (D * G8 + 2 * H * 4 * H),
    )

    unroll = True if T <= 16 else 8

    return pl.pallas_call(
        functools.partial(_bilstm_kernel, hidden=H, unroll=unroll),
        out_shape=jax.ShapeDtypeStruct((T, B, 2 * H), jnp.float32),
        grid=(nb,),
        in_specs=[
            pl.BlockSpec((T, tb, D), lambda b: (0, b, 0)),      # x (batch tile)
            pl.BlockSpec((D, G8), lambda b: (0, 0)),            # w_ih (resident)
            pl.BlockSpec((H, 4 * H), lambda b: (0, 0)),         # w_hh forward
            pl.BlockSpec((H, 4 * H), lambda b: (0, 0)),         # w_hh backward
            pl.BlockSpec((1, G8), lambda b: (0, 0)),            # fused bias
        ],
        out_specs=pl.BlockSpec((T, tb, 2 * H), lambda b: (0, b, 0)),
        scratch_shapes=[
            pltpu.VMEM((tb, H), jnp.float32),       # h forward
            pltpu.VMEM((tb, H), jnp.float32),       # c forward
            pltpu.VMEM((tb, H), jnp.float32),       # h backward
            pltpu.VMEM((tb, H), jnp.float32),       # c backward
            pltpu.VMEM((T, tb, G8), jnp.float32),   # hoisted input gates
        ],
        compiler_params=pltpu.CompilerParams(
            dimension_semantics=("parallel",),
            vmem_limit_bytes=vmem_limit),
        cost_estimate=cost,
    )(x_tm, w_ih, w_hh_f, w_hh_b, p["b"])


# ----------------------------------------------------------------------------
# Kernel 2: ELMo weighted sum (gamma pre-folded), linear, softmax over batch,
# writing batch-major outputs.  Grid: (time tiles, vocab tiles).  Softmax
# reduces over axis=1 (batch) which is inside every block, so tiling T and V
# is legal (every (t, v) column is independent).
# ----------------------------------------------------------------------------
def _combine_kernel(sw_ref, l1_ref, l2_ref, e_ref, wlin_ref, blin_ref,
                    out_ref, ws_ref):
    # Mixing weights (softmax(s) * gamma, folded on host) read from SMEM.
    w1, w2, w3 = sw_ref[0], sw_ref[1], sw_ref[2]
    ws = w1 * l1_ref[...] + w2 * l2_ref[...] + w3 * e_ref[...]   # (tT, B, 2H)
    # weighted_sum output is batch-major: small in-VMEM block transpose.
    ws_ref[...] = jnp.transpose(ws, (1, 0, 2))

    tT, B, D2 = ws.shape
    z = jnp.dot(ws.reshape(tT * B, D2).astype(wlin_ref.dtype), wlin_ref[...],
                preferred_element_type=jnp.float32) + blin_ref[...]
    z = z.reshape(tT, B, -1)

    # F.softmax with no dim on a 3-D tensor -> PyTorch picks dim=0 (batch);
    # batch is axis=1 in the time-major block.  Exact division.
    zmax = jnp.max(z, axis=1, keepdims=True)
    ez = jnp.exp(z - zmax)
    out = ez / jnp.sum(ez, axis=1, keepdims=True)
    out_ref[...] = jnp.transpose(out, (1, 0, 2))


def elmo_combine(l1_tm, l2_tm, x_tm, s, gamma, w_lin, b_lin):
    T, B, D2 = x_tm.shape
    V = w_lin.shape[1]

    # Fold gamma into the 3 mixing weights on the host (3 scalar muls).
    sw = (gamma[0] * jax.nn.softmax(s)).astype(jnp.float32)      # (3,)
    w_lin_bf = w_lin.astype(jnp.bfloat16)

    tT = T if T <= 64 else 64          # time tile
    tV = V if V <= 512 else 512        # vocab tile (bounds w_lin/out blocks)
    assert T % tT == 0 and V % tV == 0  # TODO(synk): masked tail for ragged T/V
    nT, nV = T // tT, V // tV

    cost = pl.CostEstimate(
        flops=2 * T * B * D2 * V + 6 * T * B * D2 + 5 * T * B * V,
        transcendentals=T * B * V,
        bytes_accessed=4 * (4 * T * B * D2 + T * B * V + V) + 2 * D2 * V,
    )

    # TODO(synk): when nV > 1 the (cheap) weighted-sum mix is recomputed per
    # vocab tile; hoist it into a persistent VMEM scratch if D2 is large.
    out, ws = pl.pallas_call(
        _combine_kernel,
        out_shape=(jax.ShapeDtypeStruct((B, T, V), jnp.float32),
                   jax.ShapeDtypeStruct((B, T, D2), jnp.float32)),
        grid=(nT, nV),
        in_specs=[
            pl.BlockSpec(memory_space=pltpu.MemorySpace.SMEM),     # sw (3,)
            pl.BlockSpec((tT, B, D2), lambda i, v: (i, 0, 0)),     # lstm_1
            pl.BlockSpec((tT, B, D2), lambda i, v: (i, 0, 0)),     # lstm_2
            pl.BlockSpec((tT, B, D2), lambda i, v: (i, 0, 0)),     # embeds
            pl.BlockSpec((D2, tV), lambda i, v: (0, v)),           # w_lin tile
            pl.BlockSpec((1, tV), lambda i, v: (0, v)),            # b_lin tile
        ],
        out_specs=(pl.BlockSpec((B, tT, tV), lambda i, v: (0, i, v)),
                   pl.BlockSpec((B, tT, D2), lambda i, v: (0, i, 0))),
        compiler_params=pltpu.CompilerParams(
            dimension_semantics=("parallel", "arbitrary")),
        cost_estimate=cost,
    )(sw, l1_tm, l2_tm, x_tm, w_lin_bf, b_lin)
    return out, ws


# ----------------------------------------------------------------------------
# Full ELMo forward (batch-first in/out, time-major inside)
# ----------------------------------------------------------------------------
@jax.jit
def elmo_forward(embeds, params):
    x_tm = jnp.transpose(embeds, (1, 0, 2))          # single layout change in
    l1_tm = bilstm_tm(x_tm, params["lstm1"])         # (T, B, 2H)
    l2_tm = bilstm_tm(l1_tm, params["lstm2"])        # (T, B, 2H)
    out, ws = elmo_combine(l1_tm, l2_tm, x_tm, params["s"], params["gamma"],
                           params["w_lin"], params["b_lin"])
    return out, ws                                   # already (B, T, ·)


# ----------------------------------------------------------------------------
# Pure-JAX reference (XLA ops, f32, HIGHEST precision) for correctness check.
# ----------------------------------------------------------------------------
def _lstm_dir_ref(x_tm, w_ih, w_hh, b, reverse):
    H = w_hh.shape[0]
    hi = lambda a, m: jnp.dot(a, m, precision=jax.lax.Precision.HIGHEST)
    xs = jnp.flip(x_tm, axis=0) if reverse else x_tm

    def step(carry, xt):
        h, c = carry
        gg = hi(xt, w_ih) + hi(h, w_hh) + b
        i = jax.nn.sigmoid(gg[:, :H])
        f = jax.nn.sigmoid(gg[:, H:2 * H])
        g = jnp.tanh(gg[:, 2 * H:3 * H])
        o = jax.nn.sigmoid(gg[:, 3 * H:])
        c = f * c + i * g
        h = o * jnp.tanh(c)
        return (h, c), h

    B = x_tm.shape[1]
    init = (jnp.zeros((B, H), jnp.float32), jnp.zeros((B, H), jnp.float32))
    _, ys = jax.lax.scan(step, init, xs)
    return jnp.flip(ys, axis=0) if reverse else ys


def elmo_reference(embeds, params):
    x_tm = jnp.transpose(embeds, (1, 0, 2))

    def bilstm_ref(x, p):
        H = p["w_hh_f"].shape[0]
        G = 4 * H
        yf = _lstm_dir_ref(x, p["w_ih"][:, :G], p["w_hh_f"], p["b"][:, :G], False)
        yb = _lstm_dir_ref(x, p["w_ih"][:, G:], p["w_hh_b"], p["b"][:, G:], True)
        return jnp.concatenate([yf, yb], axis=-1)

    l1 = bilstm_ref(x_tm, params["lstm1"])
    l2 = bilstm_ref(l1, params["lstm2"])
    w = jax.nn.softmax(params["s"])
    ws = params["gamma"][0] * (w[0] * l1 + w[1] * l2 + w[2] * x_tm)
    z = jnp.dot(ws, params["w_lin"],
                precision=jax.lax.Precision.HIGHEST) + params["b_lin"]
    out = jax.nn.softmax(z, axis=1)   # batch axis (== torch implicit dim=0)
    return jnp.transpose(out, (1, 0, 2)), jnp.transpose(ws, (1, 0, 2))


# ----------------------------------------------------------------------------
# Deterministic parameter construction (shapes follow the nn.Module __init__)
# ----------------------------------------------------------------------------
def _lstm_layer_params(key, input_dim, hidden):
    ks = jax.random.split(key, 8)
    stdv = 1.0 / (hidden ** 0.5)
    u = lambda k, shape: jax.random.uniform(k, shape, jnp.float32, -stdv, stdv)
    wih_f = u(ks[0], (input_dim, 4 * hidden))
    whh_f = u(ks[1], (hidden, 4 * hidden))
    b_f = u(ks[2], (1, 4 * hidden)) + u(ks[3], (1, 4 * hidden))  # b_ih + b_hh
    wih_b = u(ks[4], (input_dim, 4 * hidden))
    whh_b = u(ks[5], (hidden, 4 * hidden))
    b_b = u(ks[6], (1, 4 * hidden)) + u(ks[7], (1, 4 * hidden))
    return {
        "w_ih": jnp.concatenate([wih_f, wih_b], axis=1),   # (D, 8H)
        "w_hh_f": whh_f,                                   # (H, 4H)
        "w_hh_b": whh_b,                                   # (H, 4H)
        "b": jnp.concatenate([b_f, b_b], axis=1),          # (1, 8H)
    }


def init_params(key, vocab_size, embedding_dim, hidden_dim):
    k1, k2, k3, k4 = jax.random.split(key, 4)
    stdv = 1.0 / ((2 * hidden_dim) ** 0.5)
    return {
        "lstm1": _lstm_layer_params(k1, embedding_dim, hidden_dim),
        "lstm2": _lstm_layer_params(k2, 2 * hidden_dim, hidden_dim),
        "w_lin": jax.random.uniform(k3, (2 * hidden_dim, vocab_size),
                                    jnp.float32, -stdv, stdv),
        "b_lin": jax.random.uniform(k4, (1, vocab_size),
                                    jnp.float32, -stdv, stdv),
        "gamma": jnp.ones((1,), jnp.float32),   # nn.Parameter(torch.ones(1))
        "s":     jnp.zeros((3,), jnp.float32),  # nn.Parameter(torch.zeros(3))
    }


if __name__ == "__main__":
    # Small shapes consistent with the module: embedding_dim must equal
    # 2*hidden_dim for the cat(dim=2) in forward() to be valid.
    vocab_size = 128
    hidden_dim = 32
    embedding_dim = 2 * hidden_dim  # 64
    B, T = 2, 8

    key = jax.random.PRNGKey(0)
    kp, kx = jax.random.split(key)
    params = init_params(kp, vocab_size, embedding_dim, hidden_dim)
    embeds = jax.random.normal(kx, (B, T, embedding_dim), jnp.float32)

    out, weighted_sum = elmo_forward(embeds, params)
    jax.block_until_ready((out, weighted_sum))

    assert out.shape == (B, T, vocab_size)
    assert weighted_sum.shape == (B, T, 2 * hidden_dim)

    # Pure-JAX f32 reference check.  Kernel matmuls run on the bf16 MXU path
    # (f32 accumulation), so allow a small absolute/relative slack.
    ref_out, ref_ws = elmo_reference(embeds, params)
    assert jnp.allclose(out, ref_out, atol=2e-2, rtol=2e-2), "out mismatch"
    assert jnp.allclose(weighted_sum, ref_ws, atol=2e-2, rtol=2e-2), "ws mismatch"

    print("KERNEL_OK")
</pallas_src>

<mosaic_0001>
module attributes {stable_mosaic.version = 11 : i64} {
  func.func @_bilstm_kernel(%arg0: i32, %arg1: memref<8x2x64xf32, #tpu.memory_space<vmem>>, %arg2: memref<64x256xbf16, #tpu.memory_space<vmem>>, %arg3: memref<32x128xbf16, #tpu.memory_space<vmem>>, %arg4: memref<32x128xbf16, #tpu.memory_space<vmem>>, %arg5: memref<1x256xf32, #tpu.memory_space<vmem>>, %arg6: memref<8x2x64xf32, #tpu.memory_space<vmem>>, %arg7: memref<2x32xf32, #tpu.memory_space<vmem>>, %arg8: memref<2x32xf32, #tpu.memory_space<vmem>>, %arg9: memref<2x32xf32, #tpu.memory_space<vmem>>, %arg10: memref<2x32xf32, #tpu.memory_space<vmem>>, %arg11: memref<8x2x256xf32, #tpu.memory_space<vmem>>) attributes {dimension_semantics = [#tpu.dimension_semantics<parallel>], iteration_bounds = array<i64: 1>, scalar_prefetch = 0 : i64, scratch_operands = 5 : i64, tpu.core_type = #tpu.core_type<tc>, window_params = [{transform_indices = @transform_0, window_bounds = array<i64: 8, 2, 64>}, {pipeline_mode = #tpu.pipeline_mode<synchronous>, transform_indices = @transform_1, window_bounds = array<i64: 64, 256>}, {pipeline_mode = #tpu.pipeline_mode<synchronous>, transform_indices = @transform_2, window_bounds = array<i64: 32, 128>}, {pipeline_mode = #tpu.pipeline_mode<synchronous>, transform_indices = @transform_3, window_bounds = array<i64: 32, 128>}, {pipeline_mode = #tpu.pipeline_mode<synchronous>, transform_indices = @transform_4, window_bounds = array<i64: 1, 256>}, {transform_indices = @transform_5, window_bounds = array<i64: 8, 2, 64>}]} {
    %c0 = arith.constant 0 : index
    %c0_0 = arith.constant 0 : index
    %c0_1 = arith.constant 0 : index
    %0 = vector.load %arg1[%c0, %c0_0, %c0_1] : memref<8x2x64xf32, #tpu.memory_space<vmem>>, vector<8x2x64xf32>
    %1 = vector.shape_cast %0 : vector<8x2x64xf32> to vector<16x64xf32>
    %2 = arith.truncf %1 : vector<16x64xf32> to vector<16x64xbf16>
    %c0_2 = arith.constant 0 : index
    %c0_3 = arith.constant 0 : index
    %3 = vector.load %arg2[%c0_2, %c0_3] : memref<64x256xbf16, #tpu.memory_space<vmem>>, vector<64x256xbf16>
    %cst = arith.constant dense<0.000000e+00> : vector<16x256xf32>
    %4 = tpu.matmul %2, %3, %cst {dimension_numbers = #tpu.dot_dimension_numbers<[1], [0], [0], [1], [0, 0, 1, 1], [], []>} : vector<16x64xbf16>, vector<64x256xbf16>, vector<16x256xf32> -> vector<16x256xf32>
    %c0_4 = arith.constant 0 : index
    %c0_5 = arith.constant 0 : index
    %5 = vector.load %arg5[%c0_4, %c0_5] : memref<1x256xf32, #tpu.memory_space<vmem>>, vector<1x256xf32>
    %6 = vector.broadcast %5 : vector<1x256xf32> to vector<16x256xf32>
    %7 = arith.addf %4, %6 : vector<16x256xf32>
    %8 = vector.shape_cast %7 : vector<16x256xf32> to vector<8x2x256xf32>
    %c0_6 = arith.constant 0 : index
    %c0_7 = arith.constant 0 : index
    %c0_8 = arith.constant 0 : index
    %9 = vector.load %arg11[%c0_6, %c0_7, %c0_8] : memref<8x2x256xf32, #tpu.memory_space<vmem>>, vector<8x2x256xf32>
    tpu.vector_store %arg11[%c0_6, %c0_7, %c0_8], %8 {strides = array<i32>} : memref<8x2x256xf32, #tpu.memory_space<vmem>>, vector<8x2x256xf32>,
    %cst_9 = arith.constant 0.000000e+00 : f32
    %10 = vector.broadcast %cst_9 : f32 to vector<2x32xf32>
    %c0_10 = arith.constant 0 : index
    %c0_11 = arith.constant 0 : index
    %11 = vector.load %arg7[%c0_10, %c0_11] : memref<2x32xf32, #tpu.memory_space<vmem>>, vector<2x32xf32>
    tpu.vector_store %arg7[%c0_10, %c0_11], %10 {strides = array<i32>} : memref<2x32xf32, #tpu.memory_space<vmem>>, vector<2x32xf32>,
    %cst_12 = arith.constant 0.000000e+00 : f32
    %12 = vector.broadcast %cst_12 : f32 to vector<2x32xf32>
    %c0_13 = arith.constant 0 : index
    %c0_14 = arith.constant 0 : index
    %13 = vector.load %arg8[%c0_13, %c0_14] : memref<2x32xf32, #tpu.memory_space<vmem>>, vector<2x32xf32>
    tpu.vector_store %arg8[%c0_13, %c0_14], %12 {strides = array<i32>} : memref<2x32xf32, #tpu.memory_space<vmem>>, vector<2x32xf32>,
    %cst_15 = arith.constant 0.000000e+00 : f32
    %14 = vector.broadcast %cst_15 : f32 to vector<2x32xf32>
    %c0_16 = arith.constant 0 : index
    %c0_17 = arith.constant 0 : index
    %15 = vector.load %arg9[%c0_16, %c0_17] : memref<2x32xf32, #tpu.memory_space<vmem>>, vector<2x32xf32>
    tpu.vector_store %arg9[%c0_16, %c0_17], %14 {strides = array<i32>} : memref<2x32xf32, #tpu.memory_space<vmem>>, vector<2x32xf32>,
    %cst_18 = arith.constant 0.000000e+00 : f32
    %16 = vector.broadcast %cst_18 : f32 to vector<2x32xf32>
    %c0_19 = arith.constant 0 : index
    %c0_20 = arith.constant 0 : index
    %17 = vector.load %arg10[%c0_19, %c0_20] : memref<2x32xf32, #tpu.memory_space<vmem>>, vector<2x32xf32>
    tpu.vector_store %arg10[%c0_19, %c0_20], %16 {strides = array<i32>} : memref<2x32xf32, #tpu.memory_space<vmem>>, vector<2x32xf32>,
    %c0_21 = arith.constant 0 : index
    %c0_22 = arith.constant 0 : index
    %18 = vector.load %arg3[%c0_21, %c0_22] : memref<32x128xbf16, #tpu.memory_space<vmem>>, vector<32x128xbf16>
    %c0_23 = arith.constant 0 : index
    %c0_24 = arith.constant 0 : index
    %19 = vector.load %arg4[%c0_23, %c0_24] : memref<32x128xbf16, #tpu.memory_space<vmem>>, vector<32x128xbf16>
    %c0_i32 = arith.constant 0 : i32
    %c7_i32 = arith.constant 7 : i32
    %20 = arith.subi %c7_i32, %c0_i32 : i32
    %21 = arith.index_cast %c0_i32 : i32 to index
    %c0_25 = arith.constant 0 : index
    %c0_26 = arith.constant 0 : index
    %22 = vector.load %arg11[%21, %c0_25, %c0_26] : memref<8x2x256xf32, #tpu.memory_space<vmem>>, vector<1x2x256xf32>
    %23 = vector.shape_cast %22 : vector<1x2x256xf32> to vector<2x256xf32>
    %24 = vector.extract_strided_slice %23 {offsets = [0, 0], sizes = [2, 128], strides = [1, 1]} : vector<2x256xf32> to vector<2x128xf32>
    %c0_27 = arith.constant 0 : index
    %c0_28 = arith.constant 0 : index
    %25 = vector.load %arg7[%c0_27, %c0_28] : memref<2x32xf32, #tpu.memory_space<vmem>>, vector<2x32xf32>
    %26 = arith.truncf %25 : vector<2x32xf32> to vector<2x32xbf16>
    %cst_29 = arith.constant dense<0.000000e+00> : vector<2x128xf32>
    %27 = tpu.matmul %26, %18, %cst_29 {dimension_numbers = #tpu.dot_dimension_numbers<[1], [0], [0], [1], [0, 0, 1, 1], [], []>} : vector<2x32xbf16>, vector<32x128xbf16>, vector<2x128xf32> -> vector<2x128xf32>
    %28 = arith.addf %24, %27 : vector<2x128xf32>
    %29 = vector.extract_strided_slice %28 {offsets = [0, 0], sizes = [2, 32], strides = [1, 1]} : vector<2x128xf32> to vector<2x32xf32>
    %30 = arith.negf %29 : vector<2x32xf32>
    %31 = math.exp %30 : vector<2x32xf32>
    %cst_30 = arith.constant 1.000000e+00 : f32
    %32 = vector.broadcast %cst_30 : f32 to vector<2x32xf32>
    %33 = arith.addf %32, %31 : vector<2x32xf32>
    %34 = arith.divf %32, %33 : vector<2x32xf32>
    %35 = vector.extract_strided_slice %28 {offsets = [0, 32], sizes = [2, 32], strides = [1, 1]} : vector<2x128xf32> to vector<2x32xf32>
    %36 = arith.negf %35 : vector<2x32xf32>
    %37 = math.exp %36 : vector<2x32xf32>
    %cst_31 = arith.constant 1.000000e+00 : f32
    %38 = vector.broadcast %cst_31 : f32 to vector<2x32xf32>
    %39 = arith.addf %38, %37 : vector<2x32xf32>
    %40 = arith.divf %38, %39 : vector<2x32xf32>
    %41 = vector.extract_strided_slice %28 {offsets = [0, 64], sizes = [2, 32], strides = [1, 1]} : vector<2x128xf32> to vector<2x32xf32>
    %42 = math.tanh %41 : vector<2x32xf32>
    %43 = vector.extract_strided_slice %28 {offsets = [0, 96], sizes = [2, 32], strides = [1, 1]} : vector<2x128xf32> to vector<2x32xf32>
    %44 = arith.negf %43 : vector<2x32xf32>
    %45 = math.exp %44 : vector<2x32xf32>
    %cst_32 = arith.constant 1.000000e+00 : f32
    %46 = vector.broadcast %cst_32 : f32 to vector<2x32xf32>
    %47 = arith.addf %46, %45 : vector<2x32xf32>
    %48 = arith.divf %46, %47 : vector<2x32xf32>
    %c0_33 = arith.constant 0 : index
    %c0_34 = arith.constant 0 : index
    %49 = vector.load %arg8[%c0_33, %c0_34] : memref<2x32xf32, #tpu.memory_space<vmem>>, vector<2x32xf32>
    %50 = arith.mulf %40, %49 : vector<2x32xf32>
    %51 = arith.mulf %34, %42 : vector<2x32xf32>
    %52 = arith.addf %50, %51 : vector<2x32xf32>
    %53 = math.tanh %52 : vector<2x32xf32>
    %54 = arith.mulf %48, %53 : vector<2x32xf32>
    %c0_35 = arith.constant 0 : index
    %c0_36 = arith.constant 0 : index
    %55 = vector.load %arg8[%c0_35, %c0_36] : memref<2x32xf32, #tpu.memory_space<vmem>>, vector<2x32xf32>
    tpu.vector_store %arg8[%c0_35, %c0_36], %52 {strides = array<i32>} : memref<2x32xf32, #tpu.memory_space<vmem>>, vector<2x32xf32>,
    %c0_37 = arith.constant 0 : index
    %c0_38 = arith.constant 0 : index
    %56 = vector.load %arg7[%c0_37, %c0_38] : memref<2x32xf32, #tpu.memory_space<vmem>>, vector<2x32xf32>
    tpu.vector_store %arg7[%c0_37, %c0_38], %54 {strides = array<i32>} : memref<2x32xf32, #tpu.memory_space<vmem>>, vector<2x32xf32>,
    %57 = arith.index_cast %c0_i32 : i32 to index
    %c0_39 = arith.constant 0 : index
    %c0_40 = arith.constant 0 : index
    %58 = vector.load %arg6[%57, %c0_39, %c0_40] : memref<8x2x64xf32, #tpu.memory_space<vmem>>, vector<1x2x32xf32>
    %59 = vector.shape_cast %58 : vector<1x2x32xf32> to vector<2x32xf32>
    %60 = vector.shape_cast %54 : vector<2x32xf32> to vector<1x2x32xf32>
    tpu.vector_store %arg6[%57, %c0_39, %c0_40], %60 {strides = array<i32>} : memref<8x2x64xf32, #tpu.memory_space<vmem>>, vector<1x2x32xf32>,
    %61 = arith.index_cast %20 : i32 to index
    %c0_41 = arith.constant 0 : index
    %c0_42 = arith.constant 0 : index
    %62 = vector.load %arg11[%61, %c0_41, %c0_42] : memref<8x2x256xf32, #tpu.memory_space<vmem>>, vector<1x2x256xf32>
    %63 = vector.shape_cast %62 : vector<1x2x256xf32> to vector<2x256xf32>
    %64 = vector.extract_strided_slice %63 {offsets = [0, 128], sizes = [2, 128], strides = [1, 1]} : vector<2x256xf32> to vector<2x128xf32>
    %c0_43 = arith.constant 0 : index
    %c0_44 = arith.constant 0 : index
    %65 = vector.load %arg9[%c0_43, %c0_44] : memref<2x32xf32, #tpu.memory_space<vmem>>, vector<2x32xf32>
    %66 = arith.truncf %65 : vector<2x32xf32> to vector<2x32xbf16>
    %cst_45 = arith.constant dense<0.000000e+00> : vector<2x128xf32>
    %67 = tpu.matmul %66, %19, %cst_45 {dimension_numbers = #tpu.dot_dimension_numbers<[1], [0], [0], [1], [0, 0, 1, 1], [], []>} : vector<2x32xbf16>, vector<32x128xbf16>, vector<2x128xf32> -> vector<2x128xf32>
    %68 = arith.addf %64, %67 : vector<2x128xf32>
    %69 = vector.extract_strided_slice %68 {offsets = [0, 0], sizes = [2, 32], strides = [1, 1]} : vector<2x128xf32> to vector<2x32xf32>
    %70 = arith.negf %69 : vector<2x32xf32>
    %71 = math.exp %70 : vector<2x32xf32>
    %cst_46 = arith.constant 1.000000e+00 : f32
    %72 = vector.broadcast %cst_46 : f32 to vector<2x32xf32>
    %73 = arith.addf %72, %71 : vector<2x32xf32>
    %74 = arith.divf %72, %73 : vector<2x32xf32>
    %75 = vector.extract_strided_slice %68 {offsets = [0, 32], sizes = [2, 32], strides = [1, 1]} : vector<2x128xf32> to vector<2x32xf32>
    %76 = arith.negf %75 : vector<2x32xf32>
    %77 = math.exp %76 : vector<2x32xf32>
    %cst_47 = arith.constant 1.000000e+00 : f32
    %78 = vector.broadcast %cst_47 : f32 to vector<2x32xf32>
    %79 = arith.addf %78, %77 : vector<2x32xf32>
    %80 = arith.divf %78, %79 : vector<2x32xf32>
    %81 = vector.extract_strided_slice %68 {offsets = [0, 64], sizes = [2, 32], strides = [1, 1]} : vector<2x128xf32> to vector<2x32xf32>
    %82 = math.tanh %81 : vector<2x32xf32>
    %83 = vector.extract_strided_slice %68 {offsets = [0, 96], sizes = [2, 32], strides = [1, 1]} : vector<2x128xf32> to vector<2x32xf32>
    %84 = arith.negf %83 : vector<2x32xf32>
    %85 = math.exp %84 : vector<2x32xf32>
    %cst_48 = arith.constant 1.000000e+00 : f32
    %86 = vector.broadcast %cst_48 : f32 to vector<2x32xf32>
    %87 = arith.addf %86, %85 : vector<2x32xf32>
    %88 = arith.divf %86, %87 : vector<2x32xf32>
    %c0_49 = arith.constant 0 : index
    %c0_50 = arith.constant 0 : index
    %89 = vector.load %arg10[%c0_49, %c0_50] : memref<2x32xf32, #tpu.memory_space<vmem>>, vector<2x32xf32>
    %90 = arith.mulf %80, %89 : vector<2x32xf32>
    %91 = arith.mulf %74, %82 : vector<2x32xf32>
    %92 = arith.addf %90, %91 : vector<2x32xf32>
    %93 = math.tanh %92 : vector<2x32xf32>
    %94 = arith.mulf %88, %93 : vector<2x32xf32>
    %c0_51 = arith.constant 0 : index
    %c0_52 = arith.constant 0 : index
    %95 = vector.load %arg10[%c0_51, %c0_52] : memref<2x32xf32, #tpu.memory_space<vmem>>, vector<2x32xf32>
    tpu.vector_store %arg10[%c0_51, %c0_52], %92 {strides = array<i32>} : memref<2x32xf32, #tpu.memory_space<vmem>>, vector<2x32xf32>,
    %c0_53 = arith.constant 0 : index
    %c0_54 = arith.constant 0 : index
    %96 = vector.load %arg9[%c0_53, %c0_54] : memref<2x32xf32, #tpu.memory_space<vmem>>, vector<2x32xf32>
    tpu.vector_store %arg9[%c0_53, %c0_54], %94 {strides = array<i32>} : memref<2x32xf32, #tpu.memory_space<vmem>>, vector<2x32xf32>,
    %97 = arith.index_cast %20 : i32 to index
    %c0_55 = arith.constant 0 : index
    %c32 = arith.constant 32 : index
    %98 = vector.load %arg6[%97, %c0_55, %c32] : memref<8x2x64xf32, #tpu.memory_space<vmem>>, vector<1x2x32xf32>
    %99 = vector.shape_cast %98 : vector<1x2x32xf32> to vector<2x32xf32>
    %100 = vector.shape_cast %94 : vector<2x32xf32> to vector<1x2x32xf32>
    tpu.vector_store %arg6[%97, %c0_55, %c32], %100 {strides = array<i32>} : memref<8x2x64xf32, #tpu.memory_space<vmem>>, vector<1x2x32xf32>,
    %c1_i32 = arith.constant 1 : i32
    %c7_i32_56 = arith.constant 7 : i32
    %101 = arith.subi %c7_i32_56, %c1_i32 : i32
    %102 = arith.index_cast %c1_i32 : i32 to index
    %c0_57 = arith.constant 0 : index
    %c0_58 = arith.constant 0 : index
    %103 = vector.load %arg11[%102, %c0_57, %c0_58] : memref<8x2x256xf32, #tpu.memory_space<vmem>>, vector<1x2x256xf32>
    %104 = vector.shape_cast %103 : vector<1x2x256xf32> to vector<2x256xf32>
    %105 = vector.extract_strided_slice %104 {offsets = [0, 0], sizes = [2, 128], strides = [1, 1]} : vector<2x256xf32> to vector<2x128xf32>
    %c0_59 = arith.constant 0 : index
    %c0_60 = arith.constant 0 : index
    %106 = vector.load %arg7[%c0_59, %c0_60] : memref<2x32xf32, #tpu.memory_space<vmem>>, vector<2x32xf32>
    %107 = arith.truncf %106 : vector<2x32xf32> to vector<2x32xbf16>
    %cst_61 = arith.constant dense<0.000000e+00> : vector<2x128xf32>
    %108 = tpu.matmul %107, %18, %cst_61 {dimension_numbers = #tpu.dot_dimension_numbers<[1], [0], [0], [1], [0, 0, 1, 1], [], []>} : vector<2x32xbf16>, vector<32x128xbf16>, vector<2x128xf32> -> vector<2x128xf32>
    %109 = arith.addf %105, %108 : vector<2x128xf32>
    %110 = vector.extract_strided_slice %109 {offsets = [0, 0], sizes = [2, 32], strides = [1, 1]} : vector<2x128xf32> to vector<2x32xf32>
    %111 = arith.negf %110 : vector<2x32xf32>
    %112 = math.exp %111 : vector<2x32xf32>
    %cst_62 = arith.constant 1.000000e+00 : f32
    %113 = vector.broadcast %cst_62 : f32 to vector<2x32xf32>
    %114 = arith.addf %113, %112 : vector<2x32xf32>
    %115 = arith.divf %113, %114 : vector<2x32xf32>
    %116 = vector.extract_strided_slice %109 {offsets = [0, 32], sizes = [2, 32], strides = [1, 1]} : vector<2x128xf32> to vector<2x32xf32>
    %117 = arith.negf %116 : vector<2x32xf32>
    %118 = math.exp %117 : vector<2x32xf32>
    %cst_63 = arith.constant 1.000000e+00 : f32
    %119 = vector.broadcast %cst_63 : f32 to vector<2x32xf32>
    %120 = arith.addf %119, %118 : vector<2x32xf32>
    %121 = arith.divf %119, %120 : vector<2x32xf32>
    %122 = vector.extract_strided_slice %109 {offsets = [0, 64], sizes = [2, 32], strides = [1, 1]} : vector<2x128xf32> to vector<2x32xf32>
    %123 = math.tanh %122 : vector<2x32xf32>
    %124 = vector.extract_strided_slice %109 {offsets = [0, 96], sizes = [2, 32], strides = [1, 1]} : vector<2x128xf32> to vector<2x32xf32>
    %125 = arith.negf %124 : vector<2x32xf32>
    %126 = math.exp %125 : vector<2x32xf32>
    %cst_64 = arith.constant 1.000000e+00 : f32
    %127 = vector.broadcast %cst_64 : f32 to vector<2x32xf32>
    %128 = arith.addf %127, %126 : vector<2x32xf32>
    %129 = arith.divf %127, %128 : vector<2x32xf32>
    %c0_65 = arith.constant 0 : index
    %c0_66 = arith.constant 0 : index
    %130 = vector.load %arg8[%c0_65, %c0_66] : memref<2x32xf32, #tpu.memory_space<vmem>>, vector<2x32xf32>
    %131 = arith.mulf %121, %130 : vector<2x32xf32>
    %132 = arith.mulf %115, %123 : vector<2x32xf32>
    %133 = arith.addf %131, %132 : vector<2x32xf32>
    %134 = math.tanh %133 : vector<2x32xf32>
    %135 = arith.mulf %129, %134 : vector<2x32xf32>
    %c0_67 = arith.constant 0 : index
    %c0_68 = arith.constant 0 : index
    %136 = vector.load %arg8[%c0_67, %c0_68] : memref<2x32xf32, #tpu.memory_space<vmem>>, vector<2x32xf32>
    tpu.vector_store %arg8[%c0_67, %c0_68], %133 {strides = array<i32>} : memref<2x32xf32, #tpu.memory_space<vmem>>, vector<2x32xf32>,
    %c0_69 = arith.constant 0 : index
    %c0_70 = arith.constant 0 : index
    %137 = vector.load %arg7[%c0_69, %c0_70] : memref<2x32xf32, #tpu.memory_space<vmem>>, vector<2x32xf32>
    tpu.vector_store %arg7[%c0_69, %c0_70], %135 {strides = array<i32>} : memref<2x32xf32, #tpu.memory_space<vmem>>, vector<2x32xf32>,
    %138 = arith.index_cast %c1_i32 : i32 to index
    %c0_71 = arith.constant 0 : index
    %c0_72 = arith.constant 0 : index
    %139 = vector.load %arg6[%138, %c0_71, %c0_72] : memref<8x2x64xf32, #tpu.memory_space<vmem>>, vector<1x2x32xf32>
    %140 = vector.shape_cast %139 : vector<1x2x32xf32> to vector<2x32xf32>
    %141 = vector.shape_cast %135 : vector<2x32xf32> to vector<1x2x32xf32>
    tpu.vector_store %arg6[%138, %c0_71, %c0_72], %141 {strides = array<i32>} : memref<8x2x64xf32, #tpu.memory_space<vmem>>, vector<1x2x32xf32>,
    %142 = arith.index_cast %101 : i32 to index
    %c0_73 = arith.constant 0 : index
    %c0_74 = arith.constant 0 : index
    %143 = vector.load %arg11[%142, %c0_73, %c0_74] : memref<8x2x256xf32, #tpu.memory_space<vmem>>, vector<1x2x256xf32>
    %144 = vector.shape_cast %143 : vector<1x2x256xf32> to vector<2x256xf32>
    %145 = vector.extract_strided_slice %144 {offsets = [0, 128], sizes = [2, 128], strides = [1, 1]} : vector<2x256xf32> to vector<2x128xf32>
    %c0_75 = arith.constant 0 : index
    %c0_76 = arith.constant 0 : index
    %146 = vector.load %arg9[%c0_75, %c0_76] : memref<2x32xf32, #tpu.memory_space<vmem>>, vector<2x32xf32>
    %147 = arith.truncf %146 : vector<2x32xf32> to vector<2x32xbf16>
    %cst_77 = arith.constant dense<0.000000e+00> : vector<2x128xf32>
    %148 = tpu.matmul %147, %19, %cst_77 {dimension_numbers = #tpu.dot_dimension_numbers<[1], [0], [0], [1], [0, 0, 1, 1], [], []>} : vector<2x32xbf16>, vector<32x128xbf16>, vector<2x128xf32> -> vector<2x128xf32>
    %149 = arith.addf %145, %148 : vector<2x128xf32>
    %150 = vector.extract_strided_slice %149 {offsets = [0, 0], sizes = [2, 32], strides = [1, 1]} : vector<2x128xf32> to vector<2x32xf32>
    %151 = arith.negf %150 : vector<2x32xf32>
    %152 = math.exp %151 : vector<2x32xf32>
    %cst_78 = arith.constant 1.000000e+00 : f32
    %153 = vector.broadcast %cst_78 : f32 to vector<2x32xf32>
    %154 = arith.addf %153, %152 : vector<2x32xf32>
    %155 = arith.divf %153, %154 : vector<2x32xf32>
    %156 = vector.extract_strided_slice %149 {offsets = [0, 32], sizes = [2, 32], strides = [1, 1]} : vector<2x128xf32> to vector<2x32xf32>
    %157 = arith.negf %156 : vector<2x32xf32>
    %158 = math.exp %157 : vector<2x32xf32>
    %cst_79 = arith.constant 1.000000e+00 : f32
    %159 = vector.broadcast %cst_79 : f32 to vector<2x32xf32>
    %160 = arith.addf %159, %158 : vector<2x32xf32>
    %161 = arith.divf %159, %160 : vector<2x32xf32>
    %162 = vector.extract_strided_slice %149 {offsets = [0, 64], sizes = [2, 32], strides = [1, 1]} : vector<2x128xf32> to vector<2x32xf32>
    %163 = math.tanh %162 : vector<2x32xf32>
    %164 = vector.extract_strided_slice %149 {offsets = [0, 96], sizes = [2, 32], strides = [1, 1]} : vector<2x128xf32> to vector<2x32xf32>
    %165 = arith.negf %164 : vector<2x32xf32>
    %166 = math.exp %165 : vector<2x32xf32>
    %cst_80 = arith.constant 1.000000e+00 : f32
    %167 = vector.broadcast %cst_80 : f32 to vector<2x32xf32>
    %168 = arith.addf %167, %166 : vector<2x32xf32>
    %169 = arith.divf %167, %168 : vector<2x32xf32>
    %c0_81 = arith.constant 0 : index
    %c0_82 = arith.constant 0 : index
    %170 = vector.load %arg10[%c0_81, %c0_82] : memref<2x32xf32, #tpu.memory_space<vmem>>, vector<2x32xf32>
    %171 = arith.mulf %161, %170 : vector<2x32xf32>
    %172 = arith.mulf %155, %163 : vector<2x32xf32>
    %173 = arith.addf %171, %172 : vector<2x32xf32>
    %174 = math.tanh %173 : vector<2x32xf32>
    %175 = arith.mulf %169, %174 : vector<2x32xf32>
    %c0_83 = arith.constant 0 : index
    %c0_84 = arith.constant 0 : index
    %176 = vector.load %arg10[%c0_83, %c0_84] : memref<2x32xf32, #tpu.memory_space<vmem>>, vector<2x32xf32>
    tpu.vector_store %arg10[%c0_83, %c0_84], %173 {strides = array<i32>} : memref<2x32xf32, #tpu.memory_space<vmem>>, vector<2x32xf32>,
    %c0_85 = arith.constant 0 : index
    %c0_86 = arith.constant 0 : index
    %177 = vector.load %arg9[%c0_85, %c0_86] : memref<2x32xf32, #tpu.memory_space<vmem>>, vector<2x32xf32>
    tpu.vector_store %arg9[%c0_85, %c0_86], %175 {strides = array<i32>} : memref<2x32xf32, #tpu.memory_space<vmem>>, vector<2x32xf32>,
    %178 = arith.index_cast %101 : i32 to index
    %c0_87 = arith.constant 0 : index
    %c32_88 = arith.constant 32 : index
    %179 = vector.load %arg6[%178, %c0_87, %c32_88] : memref<8x2x64xf32, #tpu.memory_space<vmem>>, vector<1x2x32xf32>
    %180 = vector.shape_cast %179 : vector<1x2x32xf32> to vector<2x32xf32>
    %181 = vector.shape_cast %175 : vector<2x32xf32> to vector<1x2x32xf32>
    tpu.vector_store %arg6[%178, %c0_87, %c32_88], %181 {strides = array<i32>} : memref<8x2x64xf32, #tpu.memory_space<vmem>>, vector<1x2x32xf32>,
    %c2_i32 = arith.constant 2 : i32
    %c7_i32_89 = arith.constant 7 : i32
    %182 = arith.subi %c7_i32_89, %c2_i32 : i32
    %183 = arith.index_cast %c2_i32 : i32 to index
    %c0_90 = arith.constant 0 : index
    %c0_91 = arith.constant 0 : index
    %184 = vector.load %arg11[%183, %c0_90, %c0_91] : memref<8x2x256xf32, #tpu.memory_space<vmem>>, vector<1x2x256xf32>
    %185 = vector.shape_cast %184 : vector<1x2x256xf32> to vector<2x256xf32>
    %186 = vector.extract_strided_slice %185 {offsets = [0, 0], sizes = [2, 128], strides = [1, 1]} : vector<2x256xf32> to vector<2x128xf32>
    %c0_92 = arith.constant 0 : index
    %c0_93 = arith.constant 0 : index
    %187 = vector.load %arg7[%c0_92, %c0_93] : memref<2x32xf32, #tpu.memory_space<vmem>>, vector<2x32xf32>
    %188 = arith.truncf %187 : vector<2x32xf32> to vector<2x32xbf16>
    %cst_94 = arith.constant dense<0.000000e+00> : vector<2x128xf32>
    %189 = tpu.matmul %188, %18, %cst_94 {dimension_numbers = #tpu.dot_dimension_numbers<[1], [0], [0], [1], [0, 0, 1, 1], [], []>} : vector<2x32xbf16>, vector<32x128xbf16>, vector<2x128xf32> -> vector<2x128xf32>
    %190 = arith.addf %186, %189 : vector<2x128xf32>
    %191 = vector.extract_strided_slice %190 {offsets = [0, 0], sizes = [2, 32], strides = [1, 1]} : vector<2x128xf32> to vector<2x32xf32>
    %192 = arith.negf %191 : vector<2x32xf32>
    %193 = math.exp %192 : vector<2x32xf32>
    %cst_95 = arith.constant 1.000000e+00 : f32
    %194 = vector.broadcast %cst_95 : f32 to vector<2x32xf32>
    %195 = arith.addf %194, %193 : vector<2x32xf32>
    %196 = arith.divf %194, %195 : vector<2x32xf32>
    %197 = vector.extract_strided_slice %190 {offsets = [0, 32], sizes = [2, 32], strides = [1, 1]} : vector<2x128xf32> to vector<2x32xf32>
    %198 = arith.negf %197 : vector<2x32xf32>
    %199 = math.exp %198 : vector<2x32xf32>
    %cst_96 = arith.constant 1.000000e+00 : f32
    %200 = vector.broadcast %cst_96 : f32 to vector<2x32xf32>
    %201 = arith.addf %200, %199 : vector<2x32xf32>
    %202 = arith.divf %200, %201 : vector<2x32xf32>
    %203 = vector.extract_strided_slice %190 {offsets = [0, 64], sizes = [2, 32], strides = [1, 1]} : vector<2x128xf32> to vector<2x32xf32>
    %204 = math.tanh %203 : vector<2x32xf32>
    %205 = vector.extract_strided_slice %190 {offsets = [0, 96], sizes = [2, 32], strides = [1, 1]} : vector<2x128xf32> to vector<2x32xf32>
    %206 = arith.negf %205 : vector<2x32xf32>
    %207 = math.exp %206 : vector<2x32xf32>
    %cst_97 = arith.constant 1.000000e+00 : f32
    %208 = vector.broadcast %cst_97 : f32 to vector<2x32xf32>
    %209 = arith.addf %208, %207 : vector<2x32xf32>
    %210 = arith.divf %208, %209 : vector<2x32xf32>
    %c0_98 = arith.constant 0 : index
    %c0_99 = arith.constant 0 : index
    %211 = vector.load %arg8[%c0_98, %c0_99] : memref<2x32xf32, #tpu.memory_space<vmem>>, vector<2x32xf32>
    %212 = arith.mulf %202, %211 : vector<2x32xf32>
    %213 = arith.mulf %196, %204 : vector<2x32xf32>
    %214 = arith.addf %212, %213 : vector<2x32xf32>
    %215 = math.tanh %214 : vector<2x32xf32>
    %216 = arith.mulf %210, %215 : vector<2x32xf32>
    %c0_100 = arith.constant 0 : index
    %c0_101 = arith.constant 0 : index
    %217 = vector.load %arg8[%c0_100, %c0_101] : memref<2x32xf32, #tpu.memory_space<vmem>>, vector<2x32xf32>
    tpu.vector_store %arg8[%c0_100, %c0_101], %214 {strides = array<i32>} : memref<2x32xf32, #tpu.memory_space<vmem>>, vector<2x32xf32>,
    %c0_102 = arith.constant 0 : index
    %c0_103 = arith.constant 0 : index
    %218 = vector.load %arg7[%c0_102, %c0_103] : memref<2x32xf32, #tpu.memory_space<vmem>>, vector<2x32xf32>
    tpu.vector_store %arg7[%c0_102, %c0_103], %216 {strides = array<i32>} : memref<2x32xf32, #tpu.memory_space<vmem>>, vector<2x32xf32>,
    %219 = arith.index_cast %c2_i32 : i32 to index
    %c0_104 = arith.constant 0 : index
    %c0_105 = arith.constant 0 : index
    %220 = vector.load %arg6[%219, %c0_104, %c0_105] : memref<8x2x64xf32, #tpu.memory_space<vmem>>, vector<1x2x32xf32>
    %221 = vector.shape_cast %220 : vector<1x2x32xf32> to vector<2x32xf32>
    %222 = vector.shape_cast %216 : vector<2x32xf32> to vector<1x2x32xf32>
    tpu.vector_store %arg6[%219, %c0_104, %c0_105], %222 {strides = array<i32>} : memref<8x2x64xf32, #tpu.memory_space<vmem>>, vector<1x2x32xf32>,
    %223 = arith.index_cast %182 : i32 to index
    %c0_106 = arith.constant 0 : index
    %c0_107 = arith.constant 0 : index
    %224 = vector.load %arg11[%223, %c0_106, %c0_107] : memref<8x2x256xf32, #tpu.memory_space<vmem>>, vector<1x2x256xf32>
    %225 = vector.shape_cast %224 : vector<1x2x256xf32> to vector<2x256xf32>
    %226 = vector.extract_strided_slice %225 {offsets = [0, 128], sizes = [2, 128], strides = [1, 1]} : vector<2x256xf32> to vector<2x128xf32>
    %c0_108 = arith.constant 0 : index
    %c0_109 = arith.constant 0 : index
    %227 = vector.load %arg9[%c0_108, %c0_109] : memref<2x32xf32, #tpu.memory_space<vmem>>, vector<2x32xf32>
    %228 = arith.truncf %227 : vector<2x32xf32> to vector<2x32xbf16>
    %cst_110 = arith.constant dense<0.000000e+00> : vector<2x128xf32>
    %229 = tpu.matmul %228, %19, %cst_110 {dimension_numbers = #tpu.dot_dimension_numbers<[1], [0], [0], [1], [0, 0, 1, 1], [], []>} : vector<2x32xbf16>, vector<32x128xbf16>, vector<2x128xf32> -> vector<2x128xf32>
    %230 = arith.addf %226, %229 : vector<2x128xf32>
    %231 = vector.extract_strided_slice %230 {offsets = [0, 0], sizes = [2, 32], strides = [1, 1]} : vector<2x128xf32> to vector<2x32xf32>
    %232 = arith.negf %231 : vector<2x32xf32>
    %233 = math.exp %232 : vector<2x32xf32>
    %cst_111 = arith.constant 1.000000e+00 : f32
    %234 = vector.broadcast %cst_111 : f32 to vector<2x32xf32>
    %235 = arith.addf %234, %233 : vector<2x32xf32>
    %236 = arith.divf %234, %235 : vector<2x32xf32>
    %237 = vector.extract_strided_slice %230 {offsets = [0, 32], sizes = [2, 32], strides = [1, 1]} : vector<2x128xf32> to vector<2x32xf32>
    %238 = arith.negf %237 : vector<2x32xf32>
    %239 = math.exp %238 : vector<2x32xf32>
    %cst_112 = arith.constant 1.000000e+00 : f32
    %240 = vector.broadcast %cst_112 : f32 to vector<2x32xf32>
    %241 = arith.addf %240, %239 : vector<2x32xf32>
    %242 = arith.divf %240, %241 : vector<2x32xf32>
    %243 = vector.extract_strided_slice %230 {offsets = [0, 64], sizes = [2, 32], strides = [1, 1]} : vector<2x128xf32> to vector<2x32xf32>
    %244 = math.tanh %243 : vector<2x32xf32>
    %245 = vector.extract_strided_slice %230 {offsets = [0, 96], sizes = [2, 32], strides = [1, 1]} : vector<2x128xf32> to vector<2x32xf32>
    %246 = arith.negf %245 : vector<2x32xf32>
    %247 = math.exp %246 : vector<2x32xf32>
    %cst_113 = arith.constant 1.000000e+00 : f32
    %248 = vector.broadcast %cst_113 : f32 to vector<2x32xf32>
    %249 = arith.addf %248, %247 : vector<2x32xf32>
    %250 = arith.divf %248, %249 : vector<2x32xf32>
    %c0_114 = arith.constant 0 : index
    %c0_115 = arith.constant 0 : index
    %251 = vector.load %arg10[%c0_114, %c0_115] : memref<2x32xf32, #tpu.memory_space<vmem>>, vector<2x32xf32>
    %252 = arith.mulf %242, %251 : vector<2x32xf32>
    %253 = arith.mulf %236, %244 : vector<2x32xf32>
    %254 = arith.addf %252, %253 : vector<2x32xf32>
    %255 = math.tanh %254 : vector<2x32xf32>
    %256 = arith.mulf %250, %255 : vector<2x32xf32>
    %c0_116 = arith.constant 0 : index
    %c0_117 = arith.constant 0 : index
    %257 = vector.load %arg10[%c0_116, %c0_117] : memref<2x32xf32, #tpu.memory_space<vmem>>, vector<2x32xf32>
    tpu.vector_store %arg10[%c0_116, %c0_117], %254 {strides = array<i32>} : memref<2x32xf32, #tpu.memory_space<vmem>>, vector<2x32xf32>,
    %c0_118 = arith.constant 0 : index
    %c0_119 = arith.constant 0 : index
    %258 = vector.load %arg9[%c0_118, %c0_119] : memref<2x32xf32, #tpu.memory_space<vmem>>, vector<2x32xf32>
    tpu.vector_store %arg9[%c0_118, %c0_119], %256 {strides = array<i32>} : memref<2x32xf32, #tpu.memory_space<vmem>>, vector<2x32xf32>,
    %259 = arith.index_cast %182 : i32 to index
    %c0_120 = arith.constant 0 : index
    %c32_121 = arith.constant 32 : index
    %260 = vector.load %arg6[%259, %c0_120, %c32_121] : memref<8x2x64xf32, #tpu.memory_space<vmem>>, vector<1x2x32xf32>
    %261 = vector.shape_cast %260 : vector<1x2x32xf32> to vector<2x32xf32>
    %262 = vector.shape_cast %256 : vector<2x32xf32> to vector<1x2x32xf32>
    tpu.vector_store %arg6[%259, %c0_120, %c32_121], %262 {strides = array<i32>} : memref<8x2x64xf32, #tpu.memory_space<vmem>>, vector<1x2x32xf32>,
    %c3_i32 = arith.constant 3 : i32
    %c7_i32_122 = arith.constant 7 : i32
    %263 = arith.subi %c7_i32_122, %c3_i32 : i32
    %264 = arith.index_cast %c3_i32 : i32 to index
    %c0_123 = arith.constant 0 : index
    %c0_124 = arith.constant 0 : index
    %265 = vector.load %arg11[%264, %c0_123, %c0_124] : memref<8x2x256xf32, #tpu.memory_space<vmem>>, vector<1x2x256xf32>
    %266 = vector.shape_cast %265 : vector<1x2x256xf32> to vector<2x256xf32>
    %267 = vector.extract_strided_slice %266 {offsets = [0, 0], sizes = [2, 128], strides = [1, 1]} : vector<2x256xf32> to vector<2x128xf32>
    %c0_125 = arith.constant 0 : index
    %c0_126 = arith.constant 0 : index
    %268 = vector.load %arg7[%c0_125, %c0_126] : memref<2x32xf32, #tpu.memory_space<vmem>>, vector<2x32xf32>
    %269 = arith.truncf %268 : vector<2x32xf32> to vector<2x32xbf16>
    %cst_127 = arith.constant dense<0.000000e+00> : vector<2x128xf32>
    %270 = tpu.matmul %269, %18, %cst_127 {dimension_numbers = #tpu.dot_dimension_numbers<[1], [0], [0], [1], [0, 0, 1, 1], [], []>} : vector<2x32xbf16>, vector<32x128xbf16>, vector<2x128xf32> -> vector<2x128xf32>
    %271 = arith.addf %267, %270 : vector<2x128xf32>
    %272 = vector.extract_strided_slice %271 {offsets = [0, 0], sizes = [2, 32], strides = [1, 1]} : vector<2x128xf32> to vector<2x32xf32>
    %273 = arith.negf %272 : vector<2x32xf32>
    %274 = math.exp %273 : vector<2x32xf32>
    %cst_128 = arith.constant 1.000000e+00 : f32
    %275 = vector.broadcast %cst_128 : f32 to vector<2x32xf32>
    %276 = arith.addf %275, %274 : vector<2x32xf32>
    %277 = arith.divf %275, %276 : vector<2x32xf32>
    %278 = vector.extract_strided_slice %271 {offsets = [0, 32], sizes = [2, 32], strides = [1, 1]} : vector<2x128xf32> to vector<2x32xf32>
    %279 = arith.negf %278 : vector<2x32xf32>
    %280 = math.exp %279 : vector<2x32xf32>
    %cst_129 = arith.constant 1.000000e+00 : f32
    %281 = vector.broadcast %cst_129 : f32 to vector<2x32xf32>
    %282 = arith.addf %281, %280 : vector<2x32xf32>
    %283 = arith.divf %281, %282 : vector<2x32xf32>
    %284 = vector.extract_strided_slice %271 {offsets = [0, 64], sizes = [2, 32], strides = [1, 1]} : vector<2x128xf32> to vector<2x32xf32>
    %285 = math.tanh %284 : vector<2x32xf32>
    %286 = vector.extract_strided_slice %271 {offsets = [0, 96], sizes = [2, 32], strides = [1, 1]} : vector<2x128xf32> to vector<2x32xf32>
    %287 = arith.negf %286 : vector<2x32xf32>
    %288 = math.exp %287 : vector<2x32xf32>
    %cst_130 = arith.constant 1.000000e+00 : f32
    %289 = vector.broadcast %cst_130 : f32 to vector<2x32xf32>
    %290 = arith.addf %289, %288 : vector<2x32xf32>
    %291 = arith.divf %289, %290 : vector<2x32xf32>
    %c0_131 = arith.constant 0 : index
    %c0_132 = arith.constant 0 : index
    %292 = vector.load %arg8[%c0_131, %c0_132] : memref<2x32xf32, #tpu.memory_space<vmem>>, vector<2x32xf32>
    %293 = arith.mulf %283, %292 : vector<2x32xf32>
    %294 = arith.mulf %277, %285 : vector<2x32xf32>
    %295 = arith.addf %293, %294 : vector<2x32xf32>
    %296 = math.tanh %295 : vector<2x32xf32>
    %297 = arith.mulf %291, %296 : vector<2x32xf32>
    %c0_133 = arith.constant 0 : index
    %c0_134 = arith.constant 0 : index
    %298 = vector.load %arg8[%c0_133, %c0_134] : memref<2x32xf32, #tpu.memory_space<vmem>>, vector<2x32xf32>
    tpu.vector_store %arg8[%c0_133, %c0_134], %295 {strides = array<i32>} : memref<2x32xf32, #tpu.memory_space<vmem>>, vector<2x32xf32>,
    %c0_135 = arith.constant 0 : index
    %c0_136 = arith.constant 0 : index
    %299 = vector.load %arg7[%c0_135, %c0_136] : memref<2x32xf32, #tpu.memory_space<vmem>>, vector<2x32xf32>
    tpu.vector_store %arg7[%c0_135, %c0_136], %297 {strides = array<i32>} : memref<2x32xf32, #tpu.memory_space<vmem>>, vector<2x32xf32>,
    %300 = arith.index_cast %c3_i32 : i32 to index
    %c0_137 = arith.constant 0 : index
    %c0_138 = arith.constant 0 : index
    %301 = vector.load %arg6[%300, %c0_137, %c0_138] : memref<8x2x64xf32, #tpu.memory_space<vmem>>, vector<1x2x32xf32>
    %302 = vector.shape_cast %301 : vector<1x2x32xf32> to vector<2x32xf32>
    %303 = vector.shape_cast %297 : vector<2x32xf32> to vector<1x2x32xf32>
    tpu.vector_store %arg6[%300, %c0_137, %c0_138], %303 {strides = array<i32>} : memref<8x2x64xf32, #tpu.memory_space<vmem>>, vector<1x2x32xf32>,
    %304 = arith.index_cast %263 : i32 to index
    %c0_139 = arith.constant 0 : index
    %c0_140 = arith.constant 0 : index
    %305 = vector.load %arg11[%304, %c0_139, %c0_140] : memref<8x2x256xf32, #tpu.memory_space<vmem>>, vector<1x2x256xf32>
    %306 = vector.shape_cast %305 : vector<1x2x256xf32> to vector<2x256xf32>
    %307 = vector.extract_strided_slice %306 {offsets = [0, 128], sizes = [2, 128], strides = [1, 1]} : vector<2x256xf32> to vector<2x128xf32>
    %c0_141 = arith.constant 0 : index
    %c0_142 = arith.constant 0 : index
    %308 = vector.load %arg9[%c0_141, %c0_142] : memref<2x32xf32, #tpu.memory_space<vmem>>, vector<2x32xf32>
    %309 = arith.truncf %308 : vector<2x32xf32> to vector<2x32xbf16>
    %cst_143 = arith.constant dense<0.000000e+00> : vector<2x128xf32>
    %310 = tpu.matmul %309, %19, %cst_143 {dimension_numbers = #tpu.dot_dimension_numbers<[1], [0], [0], [1], [0, 0, 1, 1], [], []>} : vector<2x32xbf16>, vector<32x128xbf16>, vector<2x128xf32> -> vector<2x128xf32>
    %311 = arith.addf %307, %310 : vector<2x128xf32>
    %312 = vector.extract_strided_slice %311 {offsets = [0, 0], sizes = [2, 32], strides = [1, 1]} : vector<2x128xf32> to vector<2x32xf32>
    %313 = arith.negf %312 : vector<2x32xf32>
    %314 = math.exp %313 : vector<2x32xf32>
    %cst_144 = arith.constant 1.000000e+00 : f32
    %315 = vector.broadcast %cst_144 : f32 to vector<2x32xf32>
    %316 = arith.addf %315, %314 : vector<2x32xf32>
    %317 = arith.divf %315, %316 : vector<2x32xf32>
    %318 = vector.extract_strided_slice %311 {offsets = [0, 32], sizes = [2, 32], strides = [1, 1]} : vector<2x128xf32> to vector<2x32xf32>
    %319 = arith.negf %318 : vector<2x32xf32>
    %320 = math.exp %319 : vector<2x32xf32>
    %cst_145 = arith.constant 1.000000e+00 : f32
    %321 = vector.broadcast %cst_145 : f32 to vector<2x32xf32>
    %322 = arith.addf %321, %320 : vector<2x32xf32>
    %323 = arith.divf %321, %322 : vector<2x32xf32>
    %324 = vector.extract_strided_slice %311 {offsets = [0, 64], sizes = [2, 32], strides = [1, 1]} : vector<2x128xf32> to vector<2x32xf32>
    %325 = math.tanh %324 : vector<2x32xf32>
    %326 = vector.extract_strided_slice %311 {offsets = [0, 96], sizes = [2, 32], strides = [1, 1]} : vector<2x128xf32> to vector<2x32xf32>
    %327 = arith.negf %326 : vector<2x32xf32>
    %328 = math.exp %327 : vector<2x32xf32>
    %cst_146 = arith.constant 1.000000e+00 : f32
    %329 = vector.broadcast %cst_146 : f32 to vector<2x32xf32>
    %330 = arith.addf %329, %328 : vector<2x32xf32>
    %331 = arith.divf %329, %330 : vector<2x32xf32>
    %c0_147 = arith.constant 0 : index
    %c0_148 = arith.constant 0 : index
    %332 = vector.load %arg10[%c0_147, %c0_148] : memref<2x32xf32, #tpu.memory_space<vmem>>, vector<2x32xf32>
    %333 = arith.mulf %323, %332 : vector<2x32xf32>
    %334 = arith.mulf %317, %325 : vector<2x32xf32>
    %335 = arith.addf %333, %334 : vector<2x32xf32>
    %336 = math.tanh %335 : vector<2x32xf32>
    %337 = arith.mulf %331, %336 : vector<2x32xf32>
    %c0_149 = arith.constant 0 : index
    %c0_150 = arith.constant 0 : index
    %338 = vector.load %arg10[%c0_149, %c0_150] : memref<2x32xf32, #tpu.memory_space<vmem>>, vector<2x32xf32>
    tpu.vector_store %arg10[%c0_149, %c0_150], %335 {strides = array<i32>} : memref<2x32xf32, #tpu.memory_space<vmem>>, vector<2x32xf32>,
    %c0_151 = arith.constant 0 : index
    %c0_152 = arith.constant 0 : index
    %339 = vector.load %arg9[%c0_151, %c0_152] : memref<2x32xf32, #tpu.memory_space<vmem>>, vector<2x32xf32>
    tpu.vector_store %arg9[%c0_151, %c0_152], %337 {strides = array<i32>} : memref<2x32xf32, #tpu.memory_space<vmem>>, vector<2x32xf32>,
    %340 = arith.index_cast %263 : i32 to index
    %c0_153 = arith.constant 0 : index
    %c32_154 = arith.constant 32 : index
    %341 = vector.load %arg6[%340, %c0_153, %c32_154] : memref<8x2x64xf32, #tpu.memory_space<vmem>>, vector<1x2x32xf32>
    %342 = vector.shape_cast %341 : vector<1x2x32xf32> to vector<2x32xf32>
    %343 = vector.shape_cast %337 : vector<2x32xf32> to vector<1x2x32xf32>
    tpu.vector_store %arg6[%340, %c0_153, %c32_154], %343 {strides = array<i32>} : memref<8x2x64xf32, #tpu.memory_space<vmem>>, vector<1x2x32xf32>,
    %c4_i32 = arith.constant 4 : i32
    %c7_i32_155 = arith.constant 7 : i32
    %344 = arith.subi %c7_i32_155, %c4_i32 : i32
    %345 = arith.index_cast %c4_i32 : i32 to index
    %c0_156 = arith.constant 0 : index
    %c0_157 = arith.constant 0 : index
    %346 = vector.load %arg11[%345, %c0_156, %c0_157] : memref<8x2x256xf32, #tpu.memory_space<vmem>>, vector<1x2x256xf32>
    %347 = vector.shape_cast %346 : vector<1x2x256xf32> to vector<2x256xf32>
    %348 = vector.extract_strided_slice %347 {offsets = [0, 0], sizes = [2, 128], strides = [1, 1]} : vector<2x256xf32> to vector<2x128xf32>
    %c0_158 = arith.constant 0 : index
    %c0_159 = arith.constant 0 : index
    %349 = vector.load %arg7[%c0_158, %c0_159] : memref<2x32xf32, #tpu.memory_space<vmem>>, vector<2x32xf32>
    %350 = arith.truncf %349 : vector<2x32xf32> to vector<2x32xbf16>
    %cst_160 = arith.constant dense<0.000000e+00> : vector<2x128xf32>
    %351 = tpu.matmul %350, %18, %cst_160 {dimension_numbers = #tpu.dot_dimension_numbers<[1], [0], [0], [1], [0, 0, 1, 1], [], []>} : vector<2x32xbf16>, vector<32x128xbf16>, vector<2x128xf32> -> vector<2x128xf32>
    %352 = arith.addf %348, %351 : vector<2x128xf32>
    %353 = vector.extract_strided_slice %352 {offsets = [0, 0], sizes = [2, 32], strides = [1, 1]} : vector<2x128xf32> to vector<2x32xf32>
    %354 = arith.negf %353 : vector<2x32xf32>
    %355 = math.exp %354 : vector<2x32xf32>
    %cst_161 = arith.constant 1.000000e+00 : f32
    %356 = vector.broadcast %cst_161 : f32 to vector<2x32xf32>
    %357 = arith.addf %356, %355 : vector<2x32xf32>
    %358 = arith.divf %356, %357 : vector<2x32xf32>
    %359 = vector.extract_strided_slice %352 {offsets = [0, 32], sizes = [2, 32], strides = [1, 1]} : vector<2x128xf32> to vector<2x32xf32>
    %360 = arith.negf %359 : vector<2x32xf32>
    %361 = math.exp %360 : vector<2x32xf32>
    %cst_162 = arith.constant 1.000000e+00 : f32
    %362 = vector.broadcast %cst_162 : f32 to vector<2x32xf32>
    %363 = arith.addf %362, %361 : vector<2x32xf32>
    %364 = arith.divf %362, %363 : vector<2x32xf32>
    %365 = vector.extract_strided_slice %352 {offsets = [0, 64], sizes = [2, 32], strides = [1, 1]} : vector<2x128xf32> to vector<2x32xf32>
    %366 = math.tanh %365 : vector<2x32xf32>
    %367 = vector.extract_strided_slice %352 {offsets = [0, 96], sizes = [2, 32], strides = [1, 1]} : vector<2x128xf32> to vector<2x32xf32>
    %368 = arith.negf %367 : vector<2x32xf32>
    %369 = math.exp %368 : vector<2x32xf32>
    %cst_163 = arith.constant 1.000000e+00 : f32
    %370 = vector.broadcast %cst_163 : f32 to vector<2x32xf32>
    %371 = arith.addf %370, %369 : vector<2x32xf32>
    %372 = arith.divf %370, %371 : vector<2x32xf32>
    %c0_164 = arith.constant 0 : index
    %c0_165 = arith.constant 0 : index
    %373 = vector.load %arg8[%c0_164, %c0_165] : memref<2x32xf32, #tpu.memory_space<vmem>>, vector<2x32xf32>
    %374 = arith.mulf %364, %373 : vector<2x32xf32>
    %375 = arith.mulf %358, %366 : vector<2x32xf32>
    %376 = arith.addf %374, %375 : vector<2x32xf32>
    %377 = math.tanh %376 : vector<2x32xf32>
    %378 = arith.mulf %372, %377 : vector<2x32xf32>
    %c0_166 = arith.constant 0 : index
    %c0_167 = arith.constant 0 : index
    %379 = vector.load %arg8[%c0_166, %c0_167] : memref<2x32xf32, #tpu.memory_space<vmem>>, vector<2x32xf32>
    tpu.vector_store %arg8[%c0_166, %c0_167], %376 {strides = array<i32>} : memref<2x32xf32, #tpu.memory_space<vmem>>, vector<2x32xf32>,
    %c0_168 = arith.constant 0 : index
    %c0_169 = arith.constant 0 : index
    %380 = vector.load %arg7[%c0_168, %c0_169] : memref<2x32xf32, #tpu.memory_space<vmem>>, vector<2x32xf32>
    tpu.vector_store %arg7[%c0_168, %c0_169], %378 {strides = array<i32>} : memref<2x32xf32, #tpu.memory_space<vmem>>, vector<2x32xf32>,
    %381 = arith.index_cast %c4_i32 : i32 to index
    %c0_170 = arith.constant 0 : index
    %c0_171 = arith.constant 0 : index
    %382 = vector.load %arg6[%381, %c0_170, %c0_171] : memref<8x2x64xf32, #tpu.memory_space<vmem>>, vector<1x2x32xf32>
    %383 = vector.shape_cast %382 : vector<1x2x32xf32> to vector<2x32xf32>
    %384 = vector.shape_cast %378 : vector<2x32xf32> to vector<1x2x32xf32>
    tpu.vector_store %arg6[%381, %c0_170, %c0_171], %384 {strides = array<i32>} : memref<8x2x64xf32, #tpu.memory_space<vmem>>, vector<1x2x32xf32>,
    %385 = arith.index_cast %344 : i32 to index
    %c0_172 = arith.constant 0 : index
    %c0_173 = arith.constant 0 : index
    %386 = vector.load %arg11[%385, %c0_172, %c0_173] : memref<8x2x256xf32, #tpu.memory_space<vmem>>, vector<1x2x256xf32>
    %387 = vector.shape_cast %386 : vector<1x2x256xf32> to vector<2x256xf32>
    %388 = vector.extract_strided_slice %387 {offsets = [0, 128], sizes = [2, 128], strides = [1, 1]} : vector<2x256xf32> to vector<2x128xf32>
    %c0_174 = arith.constant 0 : index
    %c0_175 = arith.constant 0 : index
    %389 = vector.load %arg9[%c0_174, %c0_175] : memref<2x32xf32, #tpu.memory_space<vmem>>, vector<2x32xf32>
    %390 = arith.truncf %389 : vector<2x32xf32> to vector<2x32xbf16>
    %cst_176 = arith.constant dense<0.000000e+00> : vector<2x128xf32>
    %391 = tpu.matmul %390, %19, %cst_176 {dimension_numbers = #tpu.dot_dimension_numbers<[1], [0], [0], [1], [0, 0, 1, 1], [], []>} : vector<2x32xbf16>, vector<32x128xbf16>, vector<2x128xf32> -> vector<2x128xf32>
    %392 = arith.addf %388, %391 : vector<2x128xf32>
    %393 = vector.extract_strided_slice %392 {offsets = [0, 0], sizes = [2, 32], strides = [1, 1]} : vector<2x128xf32> to vector<2x32xf32>
    %394 = arith.negf %393 : vector<2x32xf32>
    %395 = math.exp %394 : vector<2x32xf32>
    %cst_177 = arith.constant 1.000000e+00 : f32
    %396 = vector.broadcast %cst_177 : f32 to vector<2x32xf32>
    %397 = arith.addf %396, %395 : vector<2x32xf32>
    %398 = arith.divf %396, %397 : vector<2x32xf32>
    %399 = vector.extract_strided_slice %392 {offsets = [0, 32], sizes = [2, 32], strides = [1, 1]} : vector<2x128xf32> to vector<2x32xf32>
    %400 = arith.negf %399 : vector<2x32xf32>
    %401 = math.exp %400 : vector<2x32xf32>
    %cst_178 = arith.constant 1.000000e+00 : f32
    %402 = vector.broadcast %cst_178 : f32 to vector<2x32xf32>
    %403 = arith.addf %402, %401 : vector<2x32xf32>
    %404 = arith.divf %402, %403 : vector<2x32xf32>
    %405 = vector.extract_strided_slice %392 {offsets = [0, 64], sizes = [2, 32], strides = [1, 1]} : vector<2x128xf32> to vector<2x32xf32>
    %406 = math.tanh %405 : vector<2x32xf32>
    %407 = vector.extract_strided_slice %392 {offsets = [0, 96], sizes = [2, 32], strides = [1, 1]} : vector<2x128xf32> to vector<2x32xf32>
    %408 = arith.negf %407 : vector<2x32xf32>
    %409 = math.exp %408 : vector<2x32xf32>
    %cst_179 = arith.constant 1.000000e+00 : f32
    %410 = vector.broadcast %cst_179 : f32 to vector<2x32xf32>
    %411 = arith.addf %410, %409 : vector<2x32xf32>
    %412 = arith.divf %410, %411 : vector<2x32xf32>
    %c0_180 = arith.constant 0 : index
    %c0_181 = arith.constant 0 : index
    %413 = vector.load %arg10[%c0_180, %c0_181] : memref<2x32xf32, #tpu.memory_space<vmem>>, vector<2x32xf32>
    %414 = arith.mulf %404, %413 : vector<2x32xf32>
    %415 = arith.mulf %398, %406 : vector<2x32xf32>
    %416 = arith.addf %414, %415 : vector<2x32xf32>
    %417 = math.tanh %416 : vector<2x32xf32>
    %418 = arith.mulf %412, %417 : vector<2x32xf32>
    %c0_182 = arith.constant 0 : index
    %c0_183 = arith.constant 0 : index
    %419 = vector.load %arg10[%c0_182, %c0_183] : memref<2x32xf32, #tpu.memory_space<vmem>>, vector<2x32xf32>
    tpu.vector_store %arg10[%c0_182, %c0_183], %416 {strides = array<i32>} : memref<2x32xf32, #tpu.memory_space<vmem>>, vector<2x32xf32>,
    %c0_184 = arith.constant 0 : index
    %c0_185 = arith.constant 0 : index
    %420 = vector.load %arg9[%c0_184, %c0_185] : memref<2x32xf32, #tpu.memory_space<vmem>>, vector<2x32xf32>
    tpu.vector_store %arg9[%c0_184, %c0_185], %418 {strides = array<i32>} : memref<2x32xf32, #tpu.memory_space<vmem>>, vector<2x32xf32>,
    %421 = arith.index_cast %344 : i32 to index
    %c0_186 = arith.constant 0 : index
    %c32_187 = arith.constant 32 : index
    %422 = vector.load %arg6[%421, %c0_186, %c32_187] : memref<8x2x64xf32, #tpu.memory_space<vmem>>, vector<1x2x32xf32>
    %423 = vector.shape_cast %422 : vector<1x2x32xf32> to vector<2x32xf32>
    %424 = vector.shape_cast %418 : vector<2x32xf32> to vector<1x2x32xf32>
    tpu.vector_store %arg6[%421, %c0_186, %c32_187], %424 {strides = array<i32>} : memref<8x2x64xf32, #tpu.memory_space<vmem>>, vector<1x2x32xf32>,
    %c5_i32 = arith.constant 5 : i32
    %c7_i32_188 = arith.constant 7 : i32
    %425 = arith.subi %c7_i32_188, %c5_i32 : i32
    %426 = arith.index_cast %c5_i32 : i32 to index
    %c0_189 = arith.constant 0 : index
    %c0_190 = arith.constant 0 : index
    %427 = vector.load %arg11[%426, %c0_189, %c0_190] : memref<8x2x256xf32, #tpu.memory_space<vmem>>, vector<1x2x256xf32>
    %428 = vector.shape_cast %427 : vector<1x2x256xf32> to vector<2x256xf32>
    %429 = vector.extract_strided_slice %428 {offsets = [0, 0], sizes = [2, 128], strides = [1, 1]} : vector<2x256xf32> to vector<2x128xf32>
    %c0_191 = arith.constant 0 : index
    %c0_192 = arith.constant 0 : index
    %430 = vector.load %arg7[%c0_191, %c0_192] : memref<2x32xf32, #tpu.memory_space<vmem>>, vector<2x32xf32>
    %431 = arith.truncf %430 : vector<2x32xf32> to vector<2x32xbf16>
    %cst_193 = arith.constant dense<0.000000e+00> : vector<2x128xf32>
    %432 = tpu.matmul %431, %18, %cst_193 {dimension_numbers = #tpu.dot_dimension_numbers<[1], [0], [0], [1], [0, 0, 1, 1], [], []>} : vector<2x32xbf16>, vector<32x128xbf16>, vector<2x128xf32> -> vector<2x128xf32>
    %433 = arith.addf %429, %432 : vector<2x128xf32>
    %434 = vector.extract_strided_slice %433 {offsets = [0, 0], sizes = [2, 32], strides = [1, 1]} : vector<2x128xf32> to vector<2x32xf32>
    %435 = arith.negf %434 : vector<2x32xf32>
    %436 = math.exp %435 : vector<2x32xf32>
    %cst_194 = arith.constant 1.000000e+00 : f32
    %437 = vector.broadcast %cst_194 : f32 to vector<2x32xf32>
    %438 = arith.addf %437, %436 : vector<2x32xf32>
    %439 = arith.divf %437, %438 : vector<2x32xf32>
    %440 = vector.extract_strided_slice %433 {offsets = [0, 32], sizes = [2, 32], strides = [1, 1]} : vector<2x128xf32> to vector<2x32xf32>
    %441 = arith.negf %440 : vector<2x32xf32>
    %442 = math.exp %441 : vector<2x32xf32>
    %cst_195 = arith.constant 1.000000e+00 : f32
    %443 = vector.broadcast %cst_195 : f32 to vector<2x32xf32>
    %444 = arith.addf %443, %442 : vector<2x32xf32>
    %445 = arith.divf %443, %444 : vector<2x32xf32>
    %446 = vector.extract_strided_slice %433 {offsets = [0, 64], sizes = [2, 32], strides = [1, 1]} : vector<2x128xf32> to vector<2x32xf32>
    %447 = math.tanh %446 : vector<2x32xf32>
    %448 = vector.extract_strided_slice %433 {offsets = [0, 96], sizes = [2, 32], strides = [1, 1]} : vector<2x128xf32> to vector<2x32xf32>
    %449 = arith.negf %448 : vector<2x32xf32>
    %450 = math.exp %449 : vector<2x32xf32>
    %cst_196 = arith.constant 1.000000e+00 : f32
    %451 = vector.broadcast %cst_196 : f32 to vector<2x32xf32>
    %452 = arith.addf %451, %450 : vector<2x32xf32>
    %453 = arith.divf %451, %452 : vector<2x32xf32>
    %c0_197 = arith.constant 0 : index
    %c0_198 = arith.constant 0 : index
    %454 = vector.load %arg8[%c0_197, %c0_198] : memref<2x32xf32, #tpu.memory_space<vmem>>, vector<2x32xf32>
    %455 = arith.mulf %445, %454 : vector<2x32xf32>
    %456 = arith.mulf %439, %447 : vector<2x32xf32>
    %457 = arith.addf %455, %456 : vector<2x32xf32>
    %458 = math.tanh %457 : vector<2x32xf32>
    %459 = arith.mulf %453, %458 : vector<2x32xf32>
    %c0_199 = arith.constant 0 : index
    %c0_200 = arith.constant 0 : index
    %460 = vector.load %arg8[%c0_199, %c0_200] : memref<2x32xf32, #tpu.memory_space<vmem>>, vector<2x32xf32>
    tpu.vector_store %arg8[%c0_199, %c0_200], %457 {strides = array<i32>} : memref<2x32xf32, #tpu.memory_space<vmem>>, vector<2x32xf32>,
    %c0_201 = arith.constant 0 : index
    %c0_202 = arith.constant 0 : index
    %461 = vector.load %arg7[%c0_201, %c0_202] : memref<2x32xf32, #tpu.memory_space<vmem>>, vector<2x32xf32>
    tpu.vector_store %arg7[%c0_201, %c0_202], %459 {strides = array<i32>} : memref<2x32xf32, #tpu.memory_space<vmem>>, vector<2x32xf32>,
    %462 = arith.index_cast %c5_i32 : i32 to index
    %c0_203 = arith.constant 0 : index
    %c0_204 = arith.constant 0 : index
    %463 = vector.load %arg6[%462, %c0_203, %c0_204] : memref<8x2x64xf32, #tpu.memory_space<vmem>>, vector<1x2x32xf32>
    %464 = vector.shape_cast %463 : vector<1x2x32xf32> to vector<2x32xf32>
    %465 = vector.shape_cast %459 : vector<2x32xf32> to vector<1x2x32xf32>
    tpu.vector_store %arg6[%462, %c0_203, %c0_204], %465 {strides = array<i32>} : memref<8x2x64xf32, #tpu.memory_space<vmem>>, vector<1x2x32xf32>,
    %466 = arith.index_cast %425 : i32 to index
    %c0_205 = arith.constant 0 : index
    %c0_206 = arith.constant 0 : index
    %467 = vector.load %arg11[%466, %c0_205, %c0_206] : memref<8x2x256xf32, #tpu.memory_space<vmem>>, vector<1x2x256xf32>
    %468 = vector.shape_cast %467 : vector<1x2x256xf32> to vector<2x256xf32>
    %469 = vector.extract_strided_slice %468 {offsets = [0, 128], sizes = [2, 128], strides = [1, 1]} : vector<2x256xf32> to vector<2x128xf32>
    %c0_207 = arith.constant 0 : index
    %c0_208 = arith.constant 0 : index
    %470 = vector.load %arg9[%c0_207, %c0_208] : memref<2x32xf32, #tpu.memory_space<vmem>>, vector<2x32xf32>
    %471 = arith.truncf %470 : vector<2x32xf32> to vector<2x32xbf16>
    %cst_209 = arith.constant dense<0.000000e+00> : vector<2x128xf32>
    %472 = tpu.matmul %471, %19, %cst_209 {dimension_numbers = #tpu.dot_dimension_numbers<[1], [0], [0], [1], [0, 0, 1, 1], [], []>} : vector<2x32xbf16>, vector<32x128xbf16>, vector<2x128xf32> -> vector<2x128xf32>
    %473 = arith.addf %469, %472 : vector<2x128xf32>
    %474 = vector.extract_strided_slice %473 {offsets = [0, 0], sizes = [2, 32], strides = [1, 1]} : vector<2x128xf32> to vector<2x32xf32>
    %475 = arith.negf %474 : vector<2x32xf32>
    %476 = math.exp %475 : vector<2x32xf32>
    %cst_210 = arith.constant 1.000000e+00 : f32
    %477 = vector.broadcast %cst_210 : f32 to vector<2x32xf32>
    %478 = arith.addf %477, %476 : vector<2x32xf32>
    %479 = arith.divf %477, %478 : vector<2x32xf32>
    %480 = vector.extract_strided_slice %473 {offsets = [0, 32], sizes = [2, 32], strides = [1, 1]} : vector<2x128xf32> to vector<2x32xf32>
    %481 = arith.negf %480 : vector<2x32xf32>
    %482 = math.exp %481 : vector<2x32xf32>
    %cst_211 = arith.constant 1.000000e+00 : f32
    %483 = vector.broadcast %cst_211 : f32 to vector<2x32xf32>
    %484 = arith.addf %483, %482 : vector<2x32xf32>
    %485 = arith.divf %483, %484 : vector<2x32xf32>
    %486 = vector.extract_strided_slice %473 {offsets = [0, 64], sizes = [2, 32], strides = [1, 1]} : vector<2x128xf32> to vector<2x32xf32>
    %487 = math.tanh %486 : vector<2x32xf32>
    %488 = vector.extract_strided_slice %473 {offsets = [0, 96], sizes = [2, 32], strides = [1, 1]} : vector<2x128xf32> to vector<2x32xf32>
    %489 = arith.negf %488 : vector<2x32xf32>
    %490 = math.exp %489 : vector<2x32xf32>
    %cst_212 = arith.constant 1.000000e+00 : f32
    %491 = vector.broadcast %cst_212 : f32 to vector<2x32xf32>
    %492 = arith.addf %491, %490 : vector<2x32xf32>
    %493 = arith.divf %491, %492 : vector<2x32xf32>
    %c0_213 = arith.constant 0 : index
    %c0_214 = arith.constant 0 : index
    %494 = vector.load %arg10[%c0_213, %c0_214] : memref<2x32xf32, #tpu.memory_space<vmem>>, vector<2x32xf32>
    %495 = arith.mulf %485, %494 : vector<2x32xf32>
    %496 = arith.mulf %479, %487 : vector<2x32xf32>
    %497 = arith.addf %495, %496 : vector<2x32xf32>
    %498 = math.tanh %497 : vector<2x32xf32>
    %499 = arith.mulf %493, %498 : vector<2x32xf32>
    %c0_215 = arith.constant 0 : index
    %c0_216 = arith.constant 0 : index
    %500 = vector.load %arg10[%c0_215, %c0_216] : memref<2x32xf32, #tpu.memory_space<vmem>>, vector<2x32xf32>
    tpu.vector_store %arg10[%c0_215, %c0_216], %497 {strides = array<i32>} : memref<2x32xf32, #tpu.memory_space<vmem>>, vector<2x32xf32>,
    %c0_217 = arith.constant 0 : index
    %c0_218 = arith.constant 0 : index
    %501 = vector.load %arg9[%c0_217, %c0_218] : memref<2x32xf32, #tpu.memory_space<vmem>>, vector<2x32xf32>
    tpu.vector_store %arg9[%c0_217, %c0_218], %499 {strides = array<i32>} : memref<2x32xf32, #tpu.memory_space<vmem>>, vector<2x32xf32>,
    %502 = arith.index_cast %425 : i32 to index
    %c0_219 = arith.constant 0 : index
    %c32_220 = arith.constant 32 : index
    %503 = vector.load %arg6[%502, %c0_219, %c32_220] : memref<8x2x64xf32, #tpu.memory_space<vmem>>, vector<1x2x32xf32>
    %504 = vector.shape_cast %503 : vector<1x2x32xf32> to vector<2x32xf32>
    %505 = vector.shape_cast %499 : vector<2x32xf32> to vector<1x2x32xf32>
    tpu.vector_store %arg6[%502, %c0_219, %c32_220], %505 {strides = array<i32>} : memref<8x2x64xf32, #tpu.memory_space<vmem>>, vector<1x2x32xf32>,
    %c6_i32 = arith.constant 6 : i32
    %c7_i32_221 = arith.constant 7 : i32
    %506 = arith.subi %c7_i32_221, %c6_i32 : i32
    %507 = arith.index_cast %c6_i32 : i32 to index
    %c0_222 = arith.constant 0 : index
    %c0_223 = arith.constant 0 : index
    %508 = vector.load %arg11[%507, %c0_222, %c0_223] : memref<8x2x256xf32, #tpu.memory_space<vmem>>, vector<1x2x256xf32>
    %509 = vector.shape_cast %508 : vector<1x2x256xf32> to vector<2x256xf32>
    %510 = vector.extract_strided_slice %509 {offsets = [0, 0], sizes = [2, 128], strides = [1, 1]} : vector<2x256xf32> to vector<2x128xf32>
    %c0_224 = arith.constant 0 : index
    %c0_225 = arith.constant 0 : index
    %511 = vector.load %arg7[%c0_224, %c0_225] : memref<2x32xf32, #tpu.memory_space<vmem>>, vector<2x32xf32>
    %512 = arith.truncf %511 : vector<2x32xf32> to vector<2x32xbf16>
    %cst_226 = arith.constant dense<0.000000e+00> : vector<2x128xf32>
    %513 = tpu.matmul %512, %18, %cst_226 {dimension_numbers = #tpu.dot_dimension_numbers<[1], [0], [0], [1], [0, 0, 1, 1], [], []>} : vector<2x32xbf16>, vector<32x128xbf16>, vector<2x128xf32> -> vector<2x128xf32>
    %514 = arith.addf %510, %513 : vector<2x128xf32>
    %515 = vector.extract_strided_slice %514 {offsets = [0, 0], sizes = [2, 32], strides = [1, 1]} : vector<2x128xf32> to vector<2x32xf32>
    %516 = arith.negf %515 : vector<2x32xf32>
    %517 = math.exp %516 : vector<2x32xf32>
    %cst_227 = arith.constant 1.000000e+00 : f32
    %518 = vector.broadcast %cst_227 : f32 to vector<2x32xf32>
    %519 = arith.addf %518, %517 : vector<2x32xf32>
    %520 = arith.divf %518, %519 : vector<2x32xf32>
    %521 = vector.extract_strided_slice %514 {offsets = [0, 32], sizes = [2, 32], strides = [1, 1]} : vector<2x128xf32> to vector<2x32xf32>
    %522 = arith.negf %521 : vector<2x32xf32>
    %523 = math.exp %522 : vector<2x32xf32>
    %cst_228 = arith.constant 1.000000e+00 : f32
    %524 = vector.broadcast %cst_228 : f32 to vector<2x32xf32>
    %525 = arith.addf %524, %523 : vector<2x32xf32>
    %526 = arith.divf %524, %525 : vector<2x32xf32>
    %527 = vector.extract_strided_slice %514 {offsets = [0, 64], sizes = [2, 32], strides = [1, 1]} : vector<2x128xf32> to vector<2x32xf32>
    %528 = math.tanh %527 : vector<2x32xf32>
    %529 = vector.extract_strided_slice %514 {offsets = [0, 96], sizes = [2, 32], strides = [1, 1]} : vector<2x128xf32> to vector<2x32xf32>
    %530 = arith.negf %529 : vector<2x32xf32>
    %531 = math.exp %530 : vector<2x32xf32>
    %cst_229 = arith.constant 1.000000e+00 : f32
    %532 = vector.broadcast %cst_229 : f32 to vector<2x32xf32>
    %533 = arith.addf %532, %531 : vector<2x32xf32>
    %534 = arith.divf %532, %533 : vector<2x32xf32>
    %c0_230 = arith.constant 0 : index
    %c0_231 = arith.constant 0 : index
    %535 = vector.load %arg8[%c0_230, %c0_231] : memref<2x32xf32, #tpu.memory_space<vmem>>, vector<2x32xf32>
    %536 = arith.mulf %526, %535 : vector<2x32xf32>
    %537 = arith.mulf %520, %528 : vector<2x32xf32>
    %538 = arith.addf %536, %537 : vector<2x32xf32>
    %539 = math.tanh %538 : vector<2x32xf32>
    %540 = arith.mulf %534, %539 : vector<2x32xf32>
    %c0_232 = arith.constant 0 : index
    %c0_233 = arith.constant 0 : index
    %541 = vector.load %arg8[%c0_232, %c0_233] : memref<2x32xf32, #tpu.memory_space<vmem>>, vector<2x32xf32>
    tpu.vector_store %arg8[%c0_232, %c0_233], %538 {strides = array<i32>} : memref<2x32xf32, #tpu.memory_space<vmem>>, vector<2x32xf32>,
    %c0_234 = arith.constant 0 : index
    %c0_235 = arith.constant 0 : index
    %542 = vector.load %arg7[%c0_234, %c0_235] : memref<2x32xf32, #tpu.memory_space<vmem>>, vector<2x32xf32>
    tpu.vector_store %arg7[%c0_234, %c0_235], %540 {strides = array<i32>} : memref<2x32xf32, #tpu.memory_space<vmem>>, vector<2x32xf32>,
    %543 = arith.index_cast %c6_i32 : i32 to index
    %c0_236 = arith.constant 0 : index
    %c0_237 = arith.constant 0 : index
    %544 = vector.load %arg6[%543, %c0_236, %c0_237] : memref<8x2x64xf32, #tpu.memory_space<vmem>>, vector<1x2x32xf32>
    %545 = vector.shape_cast %544 : vector<1x2x32xf32> to vector<2x32xf32>
    %546 = vector.shape_cast %540 : vector<2x32xf32> to vector<1x2x32xf32>
    tpu.vector_store %arg6[%543, %c0_236, %c0_237], %546 {strides = array<i32>} : memref<8x2x64xf32, #tpu.memory_space<vmem>>, vector<1x2x32xf32>,
    %547 = arith.index_cast %506 : i32 to index
    %c0_238 = arith.constant 0 : index
    %c0_239 = arith.constant 0 : index
    %548 = vector.load %arg11[%547, %c0_238, %c0_239] : memref<8x2x256xf32, #tpu.memory_space<vmem>>, vector<1x2x256xf32>
    %549 = vector.shape_cast %548 : vector<1x2x256xf32> to vector<2x256xf32>
    %550 = vector.extract_strided_slice %549 {offsets = [0, 128], sizes = [2, 128], strides = [1, 1]} : vector<2x256xf32> to vector<2x128xf32>
    %c0_240 = arith.constant 0 : index
    %c0_241 = arith.constant 0 : index
    %551 = vector.load %arg9[%c0_240, %c0_241] : memref<2x32xf32, #tpu.memory_space<vmem>>, vector<2x32xf32>
    %552 = arith.truncf %551 : vector<2x32xf32> to vector<2x32xbf16>
    %cst_242 = arith.constant dense<0.000000e+00> : vector<2x128xf32>
    %553 = tpu.matmul %552, %19, %cst_242 {dimension_numbers = #tpu.dot_dimension_numbers<[1], [0], [0], [1], [0, 0, 1, 1], [], []>} : vector<2x32xbf16>, vector<32x128xbf16>, vector<2x128xf32> -> vector<2x128xf32>
    %554 = arith.addf %550, %553 : vector<2x128xf32>
    %555 = vector.extract_strided_slice %554 {offsets = [0, 0], sizes = [2, 32], strides = [1, 1]} : vector<2x128xf32> to vector<2x32xf32>
    %556 = arith.negf %555 : vector<2x32xf32>
    %557 = math.exp %556 : vector<2x32xf32>
    %cst_243 = arith.constant 1.000000e+00 : f32
    %558 = vector.broadcast %cst_243 : f32 to vector<2x32xf32>
    %559 = arith.addf %558, %557 : vector<2x32xf32>
    %560 = arith.divf %558, %559 : vector<2x32xf32>
    %561 = vector.extract_strided_slice %554 {offsets = [0, 32], sizes = [2, 32], strides = [1, 1]} : vector<2x128xf32> to vector<2x32xf32>
    %562 = arith.negf %561 : vector<2x32xf32>
    %563 = math.exp %562 : vector<2x32xf32>
    %cst_244 = arith.constant 1.000000e+00 : f32
    %564 = vector.broadcast %cst_244 : f32 to vector<2x32xf32>
    %565 = arith.addf %564, %563 : vector<2x32xf32>
    %566 = arith.divf %564, %565 : vector<2x32xf32>
    %567 = vector.extract_strided_slice %554 {offsets = [0, 64], sizes = [2, 32], strides = [1, 1]} : vector<2x128xf32> to vector<2x32xf32>
    %568 = math.tanh %567 : vector<2x32xf32>
    %569 = vector.extract_strided_slice %554 {offsets = [0, 96], sizes = [2, 32], strides = [1, 1]} : vector<2x128xf32> to vector<2x32xf32>
    %570 = arith.negf %569 : vector<2x32xf32>
    %571 = math.exp %570 : vector<2x32xf32>
    %cst_245 = arith.constant 1.000000e+00 : f32
    %572 = vector.broadcast %cst_245 : f32 to vector<2x32xf32>
    %573 = arith.addf %572, %571 : vector<2x32xf32>
    %574 = arith.divf %572, %573 : vector<2x32xf32>
    %c0_246 = arith.constant 0 : index
    %c0_247 = arith.constant 0 : index
    %575 = vector.load %arg10[%c0_246, %c0_247] : memref<2x32xf32, #tpu.memory_space<vmem>>, vector<2x32xf32>
    %576 = arith.mulf %566, %575 : vector<2x32xf32>
    %577 = arith.mulf %560, %568 : vector<2x32xf32>
    %578 = arith.addf %576, %577 : vector<2x32xf32>
    %579 = math.tanh %578 : vector<2x32xf32>
    %580 = arith.mulf %574, %579 : vector<2x32xf32>
    %c0_248 = arith.constant 0 : index
    %c0_249 = arith.constant 0 : index
    %581 = vector.load %arg10[%c0_248, %c0_249] : memref<2x32xf32, #tpu.memory_space<vmem>>, vector<2x32xf32>
    tpu.vector_store %arg10[%c0_248, %c0_249], %578 {strides = array<i32>} : memref<2x32xf32, #tpu.memory_space<vmem>>, vector<2x32xf32>,
    %c0_250 = arith.constant 0 : index
    %c0_251 = arith.constant 0 : index
    %582 = vector.load %arg9[%c0_250, %c0_251] : memref<2x32xf32, #tpu.memory_space<vmem>>, vector<2x32xf32>
    tpu.vector_store %arg9[%c0_250, %c0_251], %580 {strides = array<i32>} : memref<2x32xf32, #tpu.memory_space<vmem>>, vector<2x32xf32>,
    %583 = arith.index_cast %506 : i32 to index
    %c0_252 = arith.constant 0 : index
    %c32_253 = arith.constant 32 : index
    %584 = vector.load %arg6[%583, %c0_252, %c32_253] : memref<8x2x64xf32, #tpu.memory_space<vmem>>, vector<1x2x32xf32>
    %585 = vector.shape_cast %584 : vector<1x2x32xf32> to vector<2x32xf32>
    %586 = vector.shape_cast %580 : vector<2x32xf32> to vector<1x2x32xf32>
    tpu.vector_store %arg6[%583, %c0_252, %c32_253], %586 {strides = array<i32>} : memref<8x2x64xf32, #tpu.memory_space<vmem>>, vector<1x2x32xf32>,
    %c7_i32_254 = arith.constant 7 : i32
    %c7_i32_255 = arith.constant 7 : i32
    %587 = arith.subi %c7_i32_255, %c7_i32_254 : i32
    %588 = arith.index_cast %c7_i32_254 : i32 to index
    %c0_256 = arith.constant 0 : index
    %c0_257 = arith.constant 0 : index
    %589 = vector.load %arg11[%588, %c0_256, %c0_257] : memref<8x2x256xf32, #tpu.memory_space<vmem>>, vector<1x2x256xf32>
    %590 = vector.shape_cast %589 : vector<1x2x256xf32> to vector<2x256xf32>
    %591 = vector.extract_strided_slice %590 {offsets = [0, 0], sizes = [2, 128], strides = [1, 1]} : vector<2x256xf32> to vector<2x128xf32>
    %c0_258 = arith.constant 0 : index
    %c0_259 = arith.constant 0 : index
    %592 = vector.load %arg7[%c0_258, %c0_259] : memref<2x32xf32, #tpu.memory_space<vmem>>, vector<2x32xf32>
    %593 = arith.truncf %592 : vector<2x32xf32> to vector<2x32xbf16>
    %cst_260 = arith.constant dense<0.000000e+00> : vector<2x128xf32>
    %594 = tpu.matmul %593, %18, %cst_260 {dimension_numbers = #tpu.dot_dimension_numbers<[1], [0], [0], [1], [0, 0, 1, 1], [], []>} : vector<2x32xbf16>, vector<32x128xbf16>, vector<2x128xf32> -> vector<2x128xf32>
    %595 = arith.addf %591, %594 : vector<2x128xf32>
    %596 = vector.extract_strided_slice %595 {offsets = [0, 0], sizes = [2, 32], strides = [1, 1]} : vector<2x128xf32> to vector<2x32xf32>
    %597 = arith.negf %596 : vector<2x32xf32>
    %598 = math.exp %597 : vector<2x32xf32>
    %cst_261 = arith.constant 1.000000e+00 : f32
    %599 = vector.broadcast %cst_261 : f32 to vector<2x32xf32>
    %600 = arith.addf %599, %598 : vector<2x32xf32>
    %601 = arith.divf %599, %600 : vector<2x32xf32>
    %602 = vector.extract_strided_slice %595 {offsets = [0, 32], sizes = [2, 32], strides = [1, 1]} : vector<2x128xf32> to vector<2x32xf32>
    %603 = arith.negf %602 : vector<2x32xf32>
    %604 = math.exp %603 : vector<2x32xf32>
    %cst_262 = arith.constant 1.000000e+00 : f32
    %605 = vector.broadcast %cst_262 : f32 to vector<2x32xf32>
    %606 = arith.addf %605, %604 : vector<2x32xf32>
    %607 = arith.divf %605, %606 : vector<2x32xf32>
    %608 = vector.extract_strided_slice %595 {offsets = [0, 64], sizes = [2, 32], strides = [1, 1]} : vector<2x128xf32> to vector<2x32xf32>
    %609 = math.tanh %608 : vector<2x32xf32>
    %610 = vector.extract_strided_slice %595 {offsets = [0, 96], sizes = [2, 32], strides = [1, 1]} : vector<2x128xf32> to vector<2x32xf32>
    %611 = arith.negf %610 : vector<2x32xf32>
    %612 = math.exp %611 : vector<2x32xf32>
    %cst_263 = arith.constant 1.000000e+00 : f32
    %613 = vector.broadcast %cst_263 : f32 to vector<2x32xf32>
    %614 = arith.addf %613, %612 : vector<2x32xf32>
    %615 = arith.divf %613, %614 : vector<2x32xf32>
    %c0_264 = arith.constant 0 : index
    %c0_265 = arith.constant 0 : index
    %616 = vector.load %arg8[%c0_264, %c0_265] : memref<2x32xf32, #tpu.memory_space<vmem>>, vector<2x32xf32>
    %617 = arith.mulf %607, %616 : vector<2x32xf32>
    %618 = arith.mulf %601, %609 : vector<2x32xf32>
    %619 = arith.addf %617, %618 : vector<2x32xf32>
    %620 = math.tanh %619 : vector<2x32xf32>
    %621 = arith.mulf %615, %620 : vector<2x32xf32>
    %c0_266 = arith.constant 0 : index
    %c0_267 = arith.constant 0 : index
    %622 = vector.load %arg8[%c0_266, %c0_267] : memref<2x32xf32, #tpu.memory_space<vmem>>, vector<2x32xf32>
    tpu.vector_store %arg8[%c0_266, %c0_267], %619 {strides = array<i32>} : memref<2x32xf32, #tpu.memory_space<vmem>>, vector<2x32xf32>,
    %c0_268 = arith.constant 0 : index
    %c0_269 = arith.constant 0 : index
    %623 = vector.load %arg7[%c0_268, %c0_269] : memref<2x32xf32, #tpu.memory_space<vmem>>, vector<2x32xf32>
    tpu.vector_store %arg7[%c0_268, %c0_269], %621 {strides = array<i32>} : memref<2x32xf32, #tpu.memory_space<vmem>>, vector<2x32xf32>,
    %624 = arith.index_cast %c7_i32_254 : i32 to index
    %c0_270 = arith.constant 0 : index
    %c0_271 = arith.constant 0 : index
    %625 = vector.load %arg6[%624, %c0_270, %c0_271] : memref<8x2x64xf32, #tpu.memory_space<vmem>>, vector<1x2x32xf32>
    %626 = vector.shape_cast %625 : vector<1x2x32xf32> to vector<2x32xf32>
    %627 = vector.shape_cast %621 : vector<2x32xf32> to vector<1x2x32xf32>
    tpu.vector_store %arg6[%624, %c0_270, %c0_271], %627 {strides = array<i32>} : memref<8x2x64xf32, #tpu.memory_space<vmem>>, vector<1x2x32xf32>,
    %628 = arith.index_cast %587 : i32 to index
    %c0_272 = arith.constant 0 : index
    %c0_273 = arith.constant 0 : index
    %629 = vector.load %arg11[%628, %c0_272, %c0_273] : memref<8x2x256xf32, #tpu.memory_space<vmem>>, vector<1x2x256xf32>
    %630 = vector.shape_cast %629 : vector<1x2x256xf32> to vector<2x256xf32>
    %631 = vector.extract_strided_slice %630 {offsets = [0, 128], sizes = [2, 128], strides = [1, 1]} : vector<2x256xf32> to vector<2x128xf32>
    %c0_274 = arith.constant 0 : index
    %c0_275 = arith.constant 0 : index
    %632 = vector.load %arg9[%c0_274, %c0_275] : memref<2x32xf32, #tpu.memory_space<vmem>>, vector<2x32xf32>
    %633 = arith.truncf %632 : vector<2x32xf32> to vector<2x32xbf16>
    %cst_276 = arith.constant dense<0.000000e+00> : vector<2x128xf32>
    %634 = tpu.matmul %633, %19, %cst_276 {dimension_numbers = #tpu.dot_dimension_numbers<[1], [0], [0], [1], [0, 0, 1, 1], [], []>} : vector<2x32xbf16>, vector<32x128xbf16>, vector<2x128xf32> -> vector<2x128xf32>
    %635 = arith.addf %631, %634 : vector<2x128xf32>
    %636 = vector.extract_strided_slice %635 {offsets = [0, 0], sizes = [2, 32], strides = [1, 1]} : vector<2x128xf32> to vector<2x32xf32>
    %637 = arith.negf %636 : vector<2x32xf32>
    %638 = math.exp %637 : vector<2x32xf32>
    %cst_277 = arith.constant 1.000000e+00 : f32
    %639 = vector.broadcast %cst_277 : f32 to vector<2x32xf32>
    %640 = arith.addf %639, %638 : vector<2x32xf32>
    %641 = arith.divf %639, %640 : vector<2x32xf32>
    %642 = vector.extract_strided_slice %635 {offsets = [0, 32], sizes = [2, 32], strides = [1, 1]} : vector<2x128xf32> to vector<2x32xf32>
    %643 = arith.negf %642 : vector<2x32xf32>
    %644 = math.exp %643 : vector<2x32xf32>
    %cst_278 = arith.constant 1.000000e+00 : f32
    %645 = vector.broadcast %cst_278 : f32 to vector<2x32xf32>
    %646 = arith.addf %645, %644 : vector<2x32xf32>
    %647 = arith.divf %645, %646 : vector<2x32xf32>
    %648 = vector.extract_strided_slice %635 {offsets = [0, 64], sizes = [2, 32], strides = [1, 1]} : vector<2x128xf32> to vector<2x32xf32>
    %649 = math.tanh %648 : vector<2x32xf32>
    %650 = vector.extract_strided_slice %635 {offsets = [0, 96], sizes = [2, 32], strides = [1, 1]} : vector<2x128xf32> to vector<2x32xf32>
    %651 = arith.negf %650 : vector<2x32xf32>
    %652 = math.exp %651 : vector<2x32xf32>
    %cst_279 = arith.constant 1.000000e+00 : f32
    %653 = vector.broadcast %cst_279 : f32 to vector<2x32xf32>
    %654 = arith.addf %653, %652 : vector<2x32xf32>
    %655 = arith.divf %653, %654 : vector<2x32xf32>
    %c0_280 = arith.constant 0 : index
    %c0_281 = arith.constant 0 : index
    %656 = vector.load %arg10[%c0_280, %c0_281] : memref<2x32xf32, #tpu.memory_space<vmem>>, vector<2x32xf32>
    %657 = arith.mulf %647, %656 : vector<2x32xf32>
    %658 = arith.mulf %641, %649 : vector<2x32xf32>
    %659 = arith.addf %657, %658 : vector<2x32xf32>
    %660 = math.tanh %659 : vector<2x32xf32>
    %661 = arith.mulf %655, %660 : vector<2x32xf32>
    %c0_282 = arith.constant 0 : index
    %c0_283 = arith.constant 0 : index
    %662 = vector.load %arg10[%c0_282, %c0_283] : memref<2x32xf32, #tpu.memory_space<vmem>>, vector<2x32xf32>
    tpu.vector_store %arg10[%c0_282, %c0_283], %659 {strides = array<i32>} : memref<2x32xf32, #tpu.memory_space<vmem>>, vector<2x32xf32>,
    %c0_284 = arith.constant 0 : index
    %c0_285 = arith.constant 0 : index
    %663 = vector.load %arg9[%c0_284, %c0_285] : memref<2x32xf32, #tpu.memory_space<vmem>>, vector<2x32xf32>
    tpu.vector_store %arg9[%c0_284, %c0_285], %661 {strides = array<i32>} : memref<2x32xf32, #tpu.memory_space<vmem>>, vector<2x32xf32>,
    %664 = arith.index_cast %587 : i32 to index
    %c0_286 = arith.constant 0 : index
    %c32_287 = arith.constant 32 : index
    %665 = vector.load %arg6[%664, %c0_286, %c32_287] : memref<8x2x64xf32, #tpu.memory_space<vmem>>, vector<1x2x32xf32>
    %666 = vector.shape_cast %665 : vector<1x2x32xf32> to vector<2x32xf32>
    %667 = vector.shape_cast %661 : vector<2x32xf32> to vector<1x2x32xf32>
    tpu.vector_store %arg6[%664, %c0_286, %c32_287], %667 {strides = array<i32>} : memref<8x2x64xf32, #tpu.memory_space<vmem>>, vector<1x2x32xf32>,
    %c8_i32 = arith.constant 8 : i32
    return
  }
  func.func @transform_0(%arg0: i32) -> (i32, i32, i32) {
    %c0_i32 = arith.constant 0 : i32
    %c0_i32_0 = arith.constant 0 : i32
    %c0_i32_1 = arith.constant 0 : i32
    return %c0_i32, %arg0, %c0_i32_0 : i32, i32, i32
  }
  func.func @transform_1(%arg0: i32) -> (i32, i32) {
    %c0_i32 = arith.constant 0 : i32
    %c0_i32_0 = arith.constant 0 : i32
    %c0_i32_1 = arith.constant 0 : i32
    return %c0_i32, %c0_i32_0 : i32, i32
  }
  func.func @transform_2(%arg0: i32) -> (i32, i32) {
    %c0_i32 = arith.constant 0 : i32
    %c0_i32_0 = arith.constant 0 : i32
    %c0_i32_1 = arith.constant 0 : i32
    return %c0_i32, %c0_i32_0 : i32, i32
  }
  func.func @transform_3(%arg0: i32) -> (i32, i32) {
    %c0_i32 = arith.constant 0 : i32
    %c0_i32_0 = arith.constant 0 : i32
    %c0_i32_1 = arith.constant 0 : i32
    return %c0_i32, %c0_i32_0 : i32, i32
  }
  func.func @transform_4(%arg0: i32) -> (i32, i32) {
    %c0_i32 = arith.constant 0 : i32
    %c0_i32_0 = arith.constant 0 : i32
    %c0_i32_1 = arith.constant 0 : i32
    return %c0_i32, %c0_i32_0 : i32, i32
  }
  func.func @transform_5(%arg0: i32) -> (i32, i32, i32) {
    %c0_i32 = arith.constant 0 : i32
    %c0_i32_0 = arith.constant 0 : i32
    %c0_i32_1 = arith.constant 0 : i32
    return %c0_i32, %arg0, %c0_i32_0 : i32, i32, i32
  }
}

module attributes {stable_mosaic.version = 11 : i64} {
  func.func @_combine_kernel(%arg0: i32, %arg1: i32, %arg2: memref<3xf32, #tpu.memory_space<smem>>, %arg3: memref<8x2x64xf32, #tpu.memory_space<vmem>>, %arg4: memref<8x2x64xf32, #tpu.memory_space<vmem>>, %arg5: memref<8x2x64xf32, #tpu.memory_space<vmem>>, %arg6: memref<64x128xbf16, #tpu.memory_space<vmem>>, %arg7: memref<1x128xf32, #tpu.memory_space<vmem>>, %arg8: memref<2x8x128xf32, #tpu.memory_space<vmem>>, %arg9: memref<2x8x64xf32, #tpu.memory_space<vmem>>) attributes {dimension_semantics = [#tpu.dimension_semantics<parallel>, #tpu.dimension_semantics<arbitrary>], iteration_bounds = array<i64: 1, 1>, scalar_prefetch = 0 : i64, scratch_operands = 0 : i64, tpu.core_type = #tpu.core_type<tc>, window_params = [{transform_indices = @transform_0, window_bounds = array<i64: 3>}, {transform_indices = @transform_1, window_bounds = array<i64: 8, 2, 64>}, {transform_indices = @transform_2, window_bounds = array<i64: 8, 2, 64>}, {transform_indices = @transform_3, window_bounds = array<i64: 8, 2, 64>}, {transform_indices = @transform_4, window_bounds = array<i64: 64, 128>}, {transform_indices = @transform_5, window_bounds = array<i64: 1, 128>}, {transform_indices = @transform_6, window_bounds = array<i64: 2, 8, 128>}, {transform_indices = @transform_7, window_bounds = array<i64: 2, 8, 64>}]} {
    %c0 = arith.constant 0 : index
    %0 = memref.load %arg2[%c0] : memref<3xf32, #tpu.memory_space<smem>>
    %c1 = arith.constant 1 : index
    %1 = memref.load %arg2[%c1] : memref<3xf32, #tpu.memory_space<smem>>
    %c2 = arith.constant 2 : index
    %2 = memref.load %arg2[%c2] : memref<3xf32, #tpu.memory_space<smem>>
    %c0_0 = arith.constant 0 : index
    %c0_1 = arith.constant 0 : index
    %c0_2 = arith.constant 0 : index
    %3 = vector.load %arg3[%c0_0, %c0_1, %c0_2] : memref<8x2x64xf32, #tpu.memory_space<vmem>>, vector<8x2x64xf32>
    %4 = vector.broadcast %0 : f32 to vector<8x2x64xf32>
    %5 = arith.mulf %4, %3 : vector<8x2x64xf32>
    %c0_3 = arith.constant 0 : index
    %c0_4 = arith.constant 0 : index
    %c0_5 = arith.constant 0 : index
    %6 = vector.load %arg4[%c0_3, %c0_4, %c0_5] : memref<8x2x64xf32, #tpu.memory_space<vmem>>, vector<8x2x64xf32>
    %7 = vector.broadcast %1 : f32 to vector<8x2x64xf32>
    %8 = arith.mulf %7, %6 : vector<8x2x64xf32>
    %9 = arith.addf %5, %8 : vector<8x2x64xf32>
    %c0_6 = arith.constant 0 : index
    %c0_7 = arith.constant 0 : index
    %c0_8 = arith.constant 0 : index
    %10 = vector.load %arg5[%c0_6, %c0_7, %c0_8] : memref<8x2x64xf32, #tpu.memory_space<vmem>>, vector<8x2x64xf32>
    %11 = vector.broadcast %2 : f32 to vector<8x2x64xf32>
    %12 = arith.mulf %11, %10 : vector<8x2x64xf32>
    %13 = arith.addf %9, %12 : vector<8x2x64xf32>
    %14 = tpu.transpose %13, [1, 0, 2] : vector<8x2x64xf32> -> vector<2x8x64xf32>
    %c0_9 = arith.constant 0 : index
    %c0_10 = arith.constant 0 : index
    %c0_11 = arith.constant 0 : index
    %15 = vector.load %arg9[%c0_9, %c0_10, %c0_11] : memref<2x8x64xf32, #tpu.memory_space<vmem>>, vector<2x8x64xf32>
    tpu.vector_store %arg9[%c0_9, %c0_10, %c0_11], %14 {strides = array<i32>} : memref<2x8x64xf32, #tpu.memory_space<vmem>>, vector<2x8x64xf32>,
    %16 = vector.shape_cast %13 : vector<8x2x64xf32> to vector<16x64xf32>
    %17 = arith.truncf %16 : vector<16x64xf32> to vector<16x64xbf16>
    %c0_12 = arith.constant 0 : index
    %c0_13 = arith.constant 0 : index
    %18 = vector.load %arg6[%c0_12, %c0_13] : memref<64x128xbf16, #tpu.memory_space<vmem>>, vector<64x128xbf16>
    %cst = arith.constant dense<0.000000e+00> : vector<16x128xf32>
    %19 = tpu.matmul %17, %18, %cst {dimension_numbers = #tpu.dot_dimension_numbers<[1], [0], [0], [1], [0, 0, 1, 1], [], []>} : vector<16x64xbf16>, vector<64x128xbf16>, vector<16x128xf32> -> vector<16x128xf32>
    %c0_14 = arith.constant 0 : index
    %c0_15 = arith.constant 0 : index
    %20 = vector.load %arg7[%c0_14, %c0_15] : memref<1x128xf32, #tpu.memory_space<vmem>>, vector<1x128xf32>
    %21 = vector.broadcast %20 : vector<1x128xf32> to vector<16x128xf32>
    %22 = arith.addf %19, %21 : vector<16x128xf32>
    %23 = vector.shape_cast %22 : vector<16x128xf32> to vector<8x2x128xf32>
    %cst_16 = arith.constant dense<0xFF800000> : vector<8x128xf32>
    %24 = vector.multi_reduction <maximumf>, %23, %cst_16 [1] : vector<8x2x128xf32> to vector<8x128xf32>
    %25 = vector.shape_cast %24 : vector<8x128xf32> to vector<8x1x128xf32>
    %26 = vector.broadcast %25 : vector<8x1x128xf32> to vector<8x2x128xf32>
    %27 = arith.subf %23, %26 : vector<8x2x128xf32>
    %28 = math.exp %27 : vector<8x2x128xf32>
    %cst_17 = arith.constant dense<0.000000e+00> : vector<8x128xf32>
    %29 = vector.multi_reduction <add>, %28, %cst_17 [1] : vector<8x2x128xf32> to vector<8x128xf32>
    %30 = vector.shape_cast %29 : vector<8x128xf32> to vector<8x1x128xf32>
    %31 = vector.broadcast %30 : vector<8x1x128xf32> to vector<8x2x128xf32>
    %32 = arith.divf %28, %31 : vector<8x2x128xf32>
    %33 = tpu.transpose %32, [1, 0, 2] : vector<8x2x128xf32> -> vector<2x8x128xf32>
    %c0_18 = arith.constant 0 : index
    %c0_19 = arith.constant 0 : index
    %c0_20 = arith.constant 0 : index
    %34 = vector.load %arg8[%c0_18, %c0_19, %c0_20] : memref<2x8x128xf32, #tpu.memory_space<vmem>>, vector<2x8x128xf32>
    tpu.vector_store %arg8[%c0_18, %c0_19, %c0_20], %33 {strides = array<i32>} : memref<2x8x128xf32, #tpu.memory_space<vmem>>, vector<2x8x128xf32>,
    return
  }
  func.func @transform_0(%arg0: i32, %arg1: i32) -> i32 {
    %c0_i32 = arith.constant 0 : i32
    %c0_i32_0 = arith.constant 0 : i32
    return %c0_i32 : i32
  }
  func.func @transform_1(%arg0: i32, %arg1: i32) -> (i32, i32, i32) {
    %c0_i32 = arith.constant 0 : i32
    %c0_i32_0 = arith.constant 0 : i32
    %c0_i32_1 = arith.constant 0 : i32
    return %arg0, %c0_i32, %c0_i32_0 : i32, i32, i32
  }
  func.func @transform_2(%arg0: i32, %arg1: i32) -> (i32, i32, i32) {
    %c0_i32 = arith.constant 0 : i32
    %c0_i32_0 = arith.constant 0 : i32
    %c0_i32_1 = arith.constant 0 : i32
    return %arg0, %c0_i32, %c0_i32_0 : i32, i32, i32
  }
  func.func @transform_3(%arg0: i32, %arg1: i32) -> (i32, i32, i32) {
    %c0_i32 = arith.constant 0 : i32
    %c0_i32_0 = arith.constant 0 : i32
    %c0_i32_1 = arith.constant 0 : i32
    return %arg0, %c0_i32, %c0_i32_0 : i32, i32, i32
  }
  func.func @transform_4(%arg0: i32, %arg1: i32) -> (i32, i32) {
    %c0_i32 = arith.constant 0 : i32
    %c0_i32_0 = arith.constant 0 : i32
    return %c0_i32, %arg1 : i32, i32
  }
  func.func @transform_5(%arg0: i32, %arg1: i32) -> (i32, i32) {
    %c0_i32 = arith.constant 0 : i32
    %c0_i32_0 = arith.constant 0 : i32
    return %c0_i32, %arg1 : i32, i32
  }
  func.func @transform_6(%arg0: i32, %arg1: i32) -> (i32, i32, i32) {
    %c0_i32 = arith.constant 0 : i32
    %c0_i32_0 = arith.constant 0 : i32
    return %c0_i32, %arg0, %arg1 : i32, i32, i32
  }
  func.func @transform_7(%arg0: i32, %arg1: i32) -> (i32, i32, i32) {
    %c0_i32 = arith.constant 0 : i32
    %c0_i32_0 = arith.constant 0 : i32
    %c0_i32_1 = arith.constant 0 : i32
    return %c0_i32, %arg0, %c0_i32_0 : i32, i32, i32
  }
}

</mosaic_0001>

<bundles_post_ra>
// kernel: elmo_forward.5
= control target key start
LH: loop header
LB: loop body
LE: loop exit
PB: predicated region body
PF: predicated region fallthrough
CT: control target
= control target key end

     0   :  { %13 = vsyncpa [#allocation4], 0  ;;  %s1058_s0 = inlined_call_operand.vmem [shape: f32[3], index: 0, kind: input, shape index: {}]   ;;  %s1059_s1 = inlined_call_operand.vmem [shape: f32[8,2,64], index: 1, kind: input, shape index: {}]   ;;  %s1060_s2 = inlined_call_operand.vmem [shape: f32[8,2,64], index: 2, kind: input, shape index: {}]   ;;  %s1061_s3 = inlined_call_operand.vmem [shape: f32[8,2,64], index: 3, kind: input, shape index: {}]   ;;  %s1062_s4 = inlined_call_operand.vmem [shape: bf16[64,128], index: 4, kind: input, shape index: {}]   ;;  %s1063_s5 = inlined_call_operand.vmem [shape: f32[1,128], index: 5, kind: input, shape index: {}]   ;;  %s1064_s6 = inlined_call_operand.hbm [shape: f32[2,8,128], index: 6, kind: output, shape index: {0}]   ;;  %s1065_s7 = inlined_call_operand.hbm [shape: f32[2,8,64], index: 7, kind: output, shape index: {1}]  }
   0x1   :  { %14 = vsyncpa [#allocation3], 0 }
   0x2   :  { %15 = vsyncpa [#allocation7], 0  ;;  %s21_s26 = sshll.u32 %s1058_s0, 4  ;;  %s734_s27 = smov [#allocation2]   ;;  %s22_s26 = int_to_ptr.vmem [resolvable:$true] %s21_s26 }
   0x3   :  { %24 = dma.vmem_to_smem %s22_s26, 16, %s734_s27, [#allocation4]  }
   0x4   :  { %728 = dma.done.wait [#allocation4], 16  }
   0x5   :  { %729 = vsyncadd [#allocation4], 4294967280 }
   0x6   :  { %39 = sfence }
   0x7   :  { %v627_v0 = vld [vmem:[%s1062_s4 + $0x18] sm:$0xff]  ;;  %s41_s30 = sld [smem:[#allocation2]]  ;;  %v626_v1 = vld [vmem:[%s1062_s4 + $0x10] sm:$0xff]  ;;  %v44_v2 = vld [vmem:[%s1059_s1] sm:$0x3]  ;;  %vm112_vm0 = vcmask 1047556  }
   0x8   :  { %s787_s8 = sld [smem:[#allocation2 + $0x1]]  ;;  %226 = vmatpush.bf16.msra.mxu0 %v627_v0  ;;  %v625_v3 = vld [vmem:[%s1062_s4 + $0x8] sm:$0xff]  ;;  %v45_v4 = vld [vmem:[%s1059_s1 + $0x2] sm:$0x3]  ;;  %v46_v5 = vld [vmem:[%s1059_s1 + $0x4] sm:$0x3] }
   0x9   :  { %s792_s11 = sld [smem:[#allocation2 + $0x2]]  ;;  %v47_v6 = vld [vmem:[%s1059_s1 + $0x6] sm:$0x3]  ;;  %v48_v7 = vld [vmem:[%s1059_s1 + $0x8] sm:$0x3]  ;;  %vm152_vm1 = vcmask 523264  }
   0xa   :  { %v49_v8 = vld [vmem:[%s1059_s1 + $0xa] sm:$0x3]  ;;  %v50_v9 = vld [vmem:[%s1059_s1 + $0xc] sm:$0x3]  ;;  %v51_v10 = vld [vmem:[%s1059_s1 + $0xe] sm:$0x3] }
   0xb   :  { %v61_v12 = vld [vmem:[%s1060_s2] sm:$0x3]  ;;  %v62_v13 = vld [vmem:[%s1060_s2 + $0x2] sm:$0x3]  ;;  %v63_v15 = vld [vmem:[%s1060_s2 + $0x4] sm:$0x3] }
   0xc   :  { %227 = vmatpush.bf16.msra.mxu0 %v626_v1  ;;  %v64_v16 = vld [vmem:[%s1060_s2 + $0x6] sm:$0x3]  ;;  %v65_v17 = vld [vmem:[%s1060_s2 + $0x8] sm:$0x3]  ;;  %v66_v22 = vld [vmem:[%s1060_s2 + $0xa] sm:$0x3] }
   0xd   :  { %v52_v11 = vstv %s41_s30  ;;  %v67_v23 = vld [vmem:[%s1060_s2 + $0xc] sm:$0x3]  ;;  %v68_v24 = vld [vmem:[%s1060_s2 + $0xe] sm:$0x3]  ;;  %v624_v29 = vld [vmem:[%s1062_s4] sm:$0xff]  ;;  %s587_s16 = sshll.u32 %s1065_s7, 4  ;;  %s588_s16 = int_to_ptr.hbm [resolvable:$true] %s587_s16 }
   0xe   :  { %v53_v14 = vmul.f32 %v52_v11, %v44_v2  ;;  %v54_v18 = vmul.f32 %v52_v11, %v45_v4  ;;  %v55_v19 = vmul.f32 %v52_v11, %v46_v5  ;;  %v56_v20 = vmul.f32 %v52_v11, %v47_v6  ;;  %v86_v38 = vld [vmem:[%s1061_s3] sm:$0x3]  ;;  %v87_v39 = vld [vmem:[%s1061_s3 + $0x2] sm:$0x3]  ;;  %v88_v42 = vld [vmem:[%s1061_s3 + $0x4] sm:$0x3] }
   0xf   :  { %v57_v21 = vmul.f32 %v52_v11, %v48_v7  ;;  %v58_v25 = vmul.f32 %v52_v11, %v49_v8  ;;  %v59_v26 = vmul.f32 %v52_v11, %v50_v9  ;;  %v60_v27 = vmul.f32 %v52_v11, %v51_v10  ;;  %v89_v43 = vld [vmem:[%s1061_s3 + $0x6] sm:$0x3]  ;;  %v90_v44 = vld [vmem:[%s1061_s3 + $0x8] sm:$0x3]  ;;  %v91_v49 = vld [vmem:[%s1061_s3 + $0xa] sm:$0x3] }
  0x10   :  { %v69_v28 = vstv %s787_s8  ;;  %228 = vmatpush.bf16.msra.mxu0 %v625_v3  ;;  %v92_v50 = vld [vmem:[%s1061_s3 + $0xc] sm:$0x3]  ;;  %v93_v51 = vld [vmem:[%s1061_s3 + $0xe] sm:$0x3]  ;;  %v94_v54 = vstv %s792_s11  ;;  %v735_v7 = vmov 1983009808  }
  0x11   :  { %v70_v30 = vmul.f32 %v69_v28, %v61_v12  ;;  %v71_v31 = vmul.f32 %v69_v28, %v62_v13  ;;  %v72_v32 = vmul.f32 %v69_v28, %v63_v15  ;;  %v73_v33 = vmul.f32 %v69_v28, %v64_v16  ;;  %s737_s3 = smov [#allocation6]   ;;  %s738_s17 = smov 128  }
  0x12   :  { %v74_v34 = vmul.f32 %v69_v28, %v65_v17  ;;  %v75_v35 = vmul.f32 %v69_v28, %v66_v22  ;;  %v76_v36 = vmul.f32 %v69_v28, %v67_v23  ;;  %v77_v37 = vmul.f32 %v69_v28, %v68_v24  ;;  %s585_s11 = sshll.u32 %s737_s3, 4  ;;  %s739_s18 = smov 8   ;;  %s586_s11 = int_to_ptr.vmem [resolvable:$true] %s585_s11 }
  0x13   :  { %v78_v40 = vadd.f32 %v70_v30, %v53_v14  ;;  %v79_v41 = vadd.f32 %v71_v31, %v54_v18  ;;  %v80_v45 = vadd.f32 %v72_v32, %v55_v19  ;;  %v81_v46 = vadd.f32 %v73_v33, %v56_v20  ;;  %s574_s23 = sshll.u32 %s1064_s6, 4  ;;  %s575_s23 = int_to_ptr.hbm [resolvable:$true] %s574_s23 }
  0x14   :  { %v82_v47 = vadd.f32 %v74_v34, %v57_v21  ;;  %v83_v48 = vadd.f32 %v75_v35, %v58_v25  ;;  %229 = vmatpush.bf16.msra.mxu0 %v624_v29  ;;  %v84_v52 = vadd.f32 %v76_v36, %v59_v26  ;;  %v85_v53 = vadd.f32 %v77_v37, %v60_v27 }
  0x15   :  { %v95_v55 = vmul.f32 %v94_v54, %v86_v38  ;;  %v96_v56 = vmul.f32 %v94_v54, %v87_v39  ;;  %v97_v57 = vmul.f32 %v94_v54, %v88_v42  ;;  %v98_v58 = vmul.f32 %v94_v54, %v89_v43  ;;  %v635_v38 = vld [vmem:[%s1063_s5] ss:$0 sm:$0xff]  ;;  %s740_s5 = smov [#allocation5]  }
  0x16   :  { %v99_v59 = vmul.f32 %v94_v54, %v90_v44  ;;  %v100_v60 = vmul.f32 %v94_v54, %v91_v49  ;;  %v101_v61 = vmul.f32 %v94_v54, %v92_v50  ;;  %v102_v62 = vmul.f32 %v94_v54, %v93_v51  ;;  %s572_s7 = sshll.u32 %s740_s5, 4  ;;  %s573_s7 = int_to_ptr.vmem [resolvable:$true] %s572_s7 }
  0x17   :  { %v103_v63 = vadd.f32 %v95_v55, %v78_v40  ;;  %v104_v0 = vadd.f32 %v96_v56, %v79_v41  ;;  %v105_v1 = vadd.f32 %v97_v57, %v80_v45  ;;  %v106_v2 = vadd.f32 %v98_v58, %v81_v46 }
  0x18   :  { %v109_v3 = vadd.f32 %v101_v61, %v84_v52  ;;  %v110_v4 = vadd.f32 %v102_v62, %v85_v53  ;;  %v107_v5 = vadd.f32 %v99_v59, %v82_v47  ;;  %v115_v8 = vunpack.c.l.s4 %v735_v7 }
  0x19   :  { %v111_v6 = vrot.slane %v105_v1, 4  ;;  %v118_v9 = vrot.slane %v106_v2, 4  ;;  %163 = vst [vmem:[#allocation1] ss:$4 sm:$0xff] %v103_v63  ;;  %v108_v10 = vadd.f32 %v100_v60, %v83_v48  ;;  %v736_v18 = vmov 1934713408  }
  0x1a   :  { %v124_v11 = vrot.slane %v109_v3, 4  ;;  %v130_v12 = vrot.slane %v110_v4, 4  ;;  %165 = vst [vmem:[#allocation1 + $0x1] ss:$4 sm:$0xff] %v104_v0  ;;  %v116_v14 = vunpack.c.0.s8 %v115_v8  ;;  %v139_v19 = vunpack.c.l.s4 %v736_v18 }
  0x1b   :  { %v113_v13 = vsel %vm112_vm0, %v111_v6, %v103_v63  ;;  %v119_v15 = vsel %vm112_vm0, %v118_v9, %v104_v0  ;;  %167 = vst [vmem:[#allocation1 + $0x2] ss:$4 sm:$0xff] %v105_v1  ;;  %vm250_vm2 = vcmask 1041408  }
  0x1c   :  { %v125_v16 = vsel %vm112_vm0, %v124_v11, %v107_v5  ;;  %v131_v17 = vsel %vm112_vm0, %v130_v12, %v108_v10  ;;  %169 = vst [vmem:[#allocation1 + $0x3] ss:$4 sm:$0xff] %v106_v2  ;;  %v117_v20 = vperm.slane %v113_v13, %v116_v14  ;;  %v123_v21 = vperm.slane %v119_v15, %v116_v14 }
  0x1d   :  { %v129_v22 = vperm.slane %v125_v16, %v116_v14  ;;  %v135_v23 = vperm.slane %v131_v17, %v116_v14  ;;  %171 = vst [vmem:[#allocation1 + $0x20] ss:$4 sm:$0xff] %v107_v5  ;;  %v878_v26 = vunpack.c.0.s8 %v139_v19 }
  0x1e   :  { %173 = vst [vmem:[#allocation1 + $0x21] ss:$4 sm:$0xff] %v108_v10  ;;  %v136_v24 = vrot.slane %v123_v21, 4 }
  0x1f   :  { %v142_v25 = vrot.slane %v135_v23, 4  ;;  %175 = vst [vmem:[#allocation1 + $0x22] ss:$4 sm:$0xff] %v109_v3 }
  0x20   :  { %177 = vst [vmem:[#allocation1 + $0x23] ss:$4 sm:$0xff] %v110_v4  ;;  %v137_v27 = vsel %vm112_vm0, %v136_v24, %v117_v20 }
  0x21   :  { %v143_v28 = vsel %vm112_vm0, %v142_v25, %v129_v22  ;;  %v141_v29 = vperm.slane %v137_v27, %v878_v26 }
  0x22   :  { %v147_v30 = vperm.slane %v143_v28, %v878_v26 }
  0x23   :  { %v150_v32 = vrot.slane %v141_v29, 4  ;;  %v178_v33 = vld.sshfl [vmem:[#allocation1] sm:$0xff pattern:$0x73625140] }
  0x24   :  { %v148_v31 = vrot.slane %v147_v30, 4 }
  0x25   :  { %v151_v35 = vsel %vm112_vm0, %v147_v30, %v150_v32 }
  0x26   :  { %v149_v34 = vsel %vm112_vm0, %v148_v31, %v141_v29  ;;  %154 = vst.msk [vmem:[#allocation6 + $0x8] sm:$0xff] %vm152_vm1, %v151_v35 }
  0x27   :  { %153 = vst.msk [vmem:[#allocation6] sm:$0xff] %vm152_vm1, %v149_v34  ;;  %v179_v36 = vld.sshfl [vmem:[#allocation1 + $0x20] sm:$0xff pattern:$0x73625140] }
  0x28   :  { %v182_v37 = vpack.c.bf16 %v179_v36, %v178_v33  ;;  %593 = dma.vmem_to_hbm [thread:$0]  %s586_s11, 256, %s588_s16, [#allocation7], %s738_s17, %s738_s17, %s739_s18  }
  0x2a   :  { %623 = vmatmul.msk.bf16.vlgmr.msra.gmra.mxu0 %vm152_vm1, %v182_v37 }
  0xa7   :  { %v231_v39 = vpop.f32.mrf.mxu0 }
  0xa8   :  { %v232_v40 = vadd.f32 %v635_v38, %v231_v39 }
  0xaa   :  { %v238_v41 = vrot.slane %v232_v40, 2  ;;  %v239_v42 = vrot.slane %v232_v40, 4  ;;  %v240_v43 = vrot.slane %v232_v40, 6  ;;  %v251_v44 = vsel %vm250_vm2, %v232_v40, -inf }
  0xab   :  { %v252_v45 = vrot.slane %v251_v44, 4 }
  0xac   :  { %v258_v46 = vsel %vm250_vm2, %v238_v41, -inf  ;;  %v265_v47 = vsel %vm250_vm2, %v239_v42, -inf  ;;  %v272_v48 = vsel %vm250_vm2, %v240_v43, -inf }
  0xad   :  { %v253_v49 = vmax.f32 %v251_v44, %v252_v45  ;;  %v259_v50 = vrot.slane %v258_v46, 4  ;;  %v266_v51 = vrot.slane %v265_v47, 4  ;;  %v273_v52 = vrot.slane %v272_v48, 4 }
  0xaf   :  { %v254_v53 = vrot.slane %v253_v49, 2  ;;  %v260_v54 = vmax.f32 %v258_v46, %v259_v50  ;;  %v267_v55 = vmax.f32 %v265_v47, %v266_v51  ;;  %v274_v56 = vmax.f32 %v272_v48, %v273_v52  ;;  %v233_v57 = vpop.f32.mrf.mxu0 }
  0xb0   :  { %v899_v58 = vadd.f32 %v635_v38, %v233_v57 }
  0xb1   :  { %v255_v59 = vmax.f32 %v253_v49, %v254_v53  ;;  %v261_v60 = vrot.slane %v260_v54, 2  ;;  %v268_v61 = vrot.slane %v267_v55, 2  ;;  %v275_v62 = vrot.slane %v274_v56, 2 }
  0xb2   :  { %v241_v63 = vrot.slane %v899_v58, 2  ;;  %v242_v0 = vrot.slane %v899_v58, 4  ;;  %v243_v1 = vrot.slane %v899_v58, 6  ;;  %v279_v2 = vsel %vm250_vm2, %v899_v58, -inf }
  0xb3   :  { %v256_v3 = vrot.slane %v255_v59, 1  ;;  %v262_v4 = vmax.f32 %v260_v54, %v261_v60  ;;  %v269_v5 = vmax.f32 %v267_v55, %v268_v61  ;;  %v276_v6 = vmax.f32 %v274_v56, %v275_v62 }
  0xb4   :  { %v280_v7 = vrot.slane %v279_v2, 4  ;;  %v286_v8 = vsel %vm250_vm2, %v241_v63, -inf  ;;  %v293_v9 = vsel %vm250_vm2, %v242_v0, -inf  ;;  %v300_v10 = vsel %vm250_vm2, %v243_v1, -inf }
  0xb5   :  { %v257_v11 = vmax.f32 %v255_v59, %v256_v3  ;;  %v263_v12 = vrot.slane %v262_v4, 1  ;;  %v270_v13 = vrot.slane %v269_v5, 1  ;;  %v277_v14 = vrot.slane %v276_v6, 1 }
  0xb6   :  { %v281_v15 = vmax.f32 %v279_v2, %v280_v7  ;;  %v287_v16 = vrot.slane %v286_v8, 4  ;;  %v294_v17 = vrot.slane %v293_v9, 4  ;;  %v301_v18 = vrot.slane %v300_v10, 4 }
  0xb7   :  { %v264_v19 = vmax.f32 %v262_v4, %v263_v12  ;;  %v271_v20 = vmax.f32 %v269_v5, %v270_v13  ;;  %v278_v21 = vmax.f32 %v276_v6, %v277_v14  ;;  %v307_v22 = vsub.f32 %v232_v40, %v257_v11 }
  0xb8   :  { %v282_v23 = vrot.slane %v281_v15, 2  ;;  %v288_v24 = vmax.f32 %v286_v8, %v287_v16  ;;  %v295_v25 = vmax.f32 %v293_v9, %v294_v17  ;;  %v302_v27 = vmax.f32 %v300_v10, %v301_v18 }
  0xb9   :  { %v308_v28 = vsub.f32 %v238_v41, %v264_v19  ;;  %v309_v29 = vsub.f32 %v239_v42, %v271_v20  ;;  %v310_v30 = vsub.f32 %v240_v43, %v278_v21  ;;  %v315_v31 = vmul.f32 1.442695, %v307_v22 }
  0xba   :  { %v283_v32 = vmax.f32 %v281_v15, %v282_v23  ;;  %v289_v33 = vrot.slane %v288_v24, 2  ;;  %v296_v34 = vrot.slane %v295_v25, 2  ;;  %v303_v35 = vrot.slane %v302_v27, 2 }
  0xbb   :  { %636 = vpow2.f32 %v315_v31  ;;  %v317_v36 = vmul.f32 1.442695, %v308_v28  ;;  %v319_v37 = vmul.f32 1.442695, %v309_v29  ;;  %v321_v38 = vmul.f32 1.442695, %v310_v30 }
  0xbc   :  { %v284_v39 = vrot.slane %v283_v32, 1  ;;  %v290_v44 = vmax.f32 %v288_v24, %v289_v33  ;;  %v297_v45 = vmax.f32 %v295_v25, %v296_v34  ;;  %v304_v40 = vmax.f32 %v302_v27, %v303_v35 }
  0xbd   :  { %638 = vpow2.f32 %v317_v36 }
  0xbe   :  { %640 = vpow2.f32 %v319_v37  ;;  %v285_v46 = vmax.f32 %v283_v32, %v284_v39  ;;  %v291_v47 = vrot.slane %v290_v44, 1  ;;  %v298_v41 = vrot.slane %v297_v45, 1 }
  0xbf   :  { %642 = vpow2.f32 %v321_v38  ;;  %v305_v42 = vrot.slane %v304_v40, 1 }
  0xc0   :  { %v292_v43 = vmax.f32 %v290_v44, %v291_v47  ;;  %v299_v48 = vmax.f32 %v297_v45, %v298_v41  ;;  %v311_v49 = vsub.f32 %v899_v58, %v285_v46 }
  0xc1   :  { %v912_v50 = vpop.eup %636  ;;  %v306_v51 = vmax.f32 %v304_v40, %v305_v42 }
  0xc2   :  { %v331_v52 = vsel %vm250_vm2, %v912_v50, 0.0  ;;  %v312_v53 = vsub.f32 %v241_v63, %v292_v43  ;;  %v313_v54 = vsub.f32 %v242_v0, %v299_v48  ;;  %v323_v55 = vmul.f32 1.442695, %v311_v49 }
  0xc3   :  { %v916_v56 = vpop.eup %638  ;;  %v332_v57 = vrot.slane %v331_v52, 4  ;;  %v314_v63 = vsub.f32 %v243_v1, %v306_v51 }
  0xc4   :  { %v918_v59 = vpop.eup %640  ;;  %v338_v60 = vsel %vm250_vm2, %v916_v56, 0.0  ;;  %644 = vpow2.f32 %v323_v55  ;;  %v325_v61 = vmul.f32 1.442695, %v312_v53  ;;  %v327_v6 = vmul.f32 1.442695, %v313_v54 }
  0xc5   :  { %v922_v62 = vpop.eup %642  ;;  %v333_v2 = vadd.f32 %v332_v57, %v331_v52  ;;  %v339_v3 = vrot.slane %v338_v60, 4  ;;  %v345_v4 = vsel %vm250_vm2, %v918_v59, 0.0  ;;  %v329_v16 = vmul.f32 1.442695, %v314_v63 }
  0xc6   :  { %v346_v0 = vrot.slane %v345_v4, 4  ;;  %v352_v5 = vsel %vm250_vm2, %v922_v62, 0.0  ;;  %646 = vpow2.f32 %v325_v61 }
  0xc7   :  { %v334_v7 = vrot.slane %v333_v2, 2  ;;  %v340_v8 = vadd.f32 %v339_v3, %v338_v60  ;;  %v353_v9 = vrot.slane %v352_v5, 4  ;;  %648 = vpow2.f32 %v327_v6 }
  0xc8   :  { %v347_v10 = vadd.f32 %v346_v0, %v345_v4  ;;  %650 = vpow2.f32 %v329_v16 }
  0xc9   :  { %v335_v11 = vadd.f32 %v334_v7, %v333_v2  ;;  %v341_v12 = vrot.slane %v340_v8, 2  ;;  %v354_v13 = vadd.f32 %v353_v9, %v352_v5 }
  0xca   :  { %v930_v14 = vpop.eup %644  ;;  %v348_v15 = vrot.slane %v347_v10, 2 }
  0xcb   :  { %v336_v58 = vrot.slane %v335_v11, 1  ;;  %v342_v1 = vadd.f32 %v341_v12, %v340_v8  ;;  %v355_v17 = vrot.slane %v354_v13, 2  ;;  %v359_v18 = vsel %vm250_vm2, %v930_v14, 0.0 }
  0xcc   :  { %v934_v19 = vpop.eup %646  ;;  %v349_v20 = vadd.f32 %v348_v15, %v347_v10  ;;  %v360_v21 = vrot.slane %v359_v18, 4 }
  0xcd   :  { %v936_v22 = vadd.f32 %v336_v58, %v335_v11  ;;  %v343_v23 = vrot.slane %v342_v1, 1  ;;  %v356_v24 = vadd.f32 %v355_v17, %v354_v13  ;;  %v366_v30 = vsel %vm250_vm2, %v934_v19, 0.0  ;;  %v943_v31 = vpop.eup %648 }
  0xce   :  { %v350_v25 = vrot.slane %v349_v20, 1  ;;  %v361_v27 = vadd.f32 %v360_v21, %v359_v18  ;;  %v367_v37 = vrot.slane %v366_v30, 4  ;;  %v373_v38 = vsel %vm250_vm2, %v943_v31, 0.0  ;;  %v955_v39 = vpop.eup %650 }
  0xcf   :  { %v938_v28 = vadd.f32 %v343_v23, %v342_v1  ;;  %v357_v29 = vrot.slane %v356_v24, 1  ;;  %652 = vrcp.f32 %v936_v22  ;;  %v398_v34 = vand.u32 2147483648, %v936_v22 }
  0xd0   :  { %v945_v32 = vadd.f32 %v350_v25, %v349_v20  ;;  %v362_v35 = vrot.slane %v361_v27, 2  ;;  %vm392_vm3 = vweird.f32 %v936_v22  ;;  %v396_v44 = vand.u32 2147483647, %v936_v22 }
  0xd1   :  { %v947_v33 = vadd.f32 %v357_v29, %v356_v24  ;;  %654 = vrcp.f32 %v938_v28  ;;  %v413_v36 = vand.u32 2147483648, %v938_v28  ;;  %v411_v45 = vand.u32 2147483647, %v938_v28 }
  0xd2   :  { %656 = vrcp.f32 %v945_v32  ;;  %v399_v46 = vor.u32 1.1754944e-38, %v398_v34  ;;  %v426_v47 = vand.u32 2147483647, %v945_v32  ;;  %v428_v41 = vand.u32 2147483648, %v945_v32 }
  0xd3   :  { %658 = vrcp.f32 %v947_v33  ;;  %v363_v42 = vadd.f32 %v362_v35, %v361_v27  ;;  %vm407_vm4 = vweird.f32 %v938_v28  ;;  %v414_v48 = vor.u32 1.1754944e-38, %v413_v36 }
  0xd4   :  { %v441_v49 = vand.u32 2147483647, %v947_v33  ;;  %v368_v51 = vadd.f32 %v367_v37, %v366_v30  ;;  %vm422_vm5 = vweird.f32 %v945_v32  ;;  %v443_v53 = vand.u32 2147483648, %v947_v33 }
  0xd5   :  { %v653_v40 = vpop.eup %652  ;;  %v364_v54 = vrot.slane %v363_v42, 1  ;;  %v374_v55 = vrot.slane %v373_v38, 4  ;;  %v380_v57 = vsel %vm250_vm2, %v955_v39, 0.0  ;;  %vm970_vm7 = vcmp.eq.f32.partialorder %v396_v44, 8.507059e+37 }
  0xd6   :  { %v388_v43 = vmul.f32 %v653_v40, %v936_v22  ;;  %vm393_vm6 = vweird.f32 %v653_v40  ;;  %vm975_vm8 = vcmp.eq.f32.partialorder %v411_v45, 8.507059e+37  ;;  %v369_v63 = vrot.slane %v368_v51, 2 }
  0xd7   :  { %v655_v52 = vpop.eup %654  ;;  %vm437_vm10 = vweird.f32 %v947_v33  ;;  %v981_v5 = vadd.f32 %v364_v54, %v363_v42  ;;  %v375_v6 = vadd.f32 %v374_v55, %v373_v38  ;;  %v381_v11 = vrot.slane %v380_v57, 4  ;;  %vm987_vm12 = vmor %vm392_vm3, %vm393_vm6 }
  0xd8   :  { %v657_v60 = vpop.eup %656  ;;  %v389_v61 = vsub.f32 1.0, %v388_v43  ;;  %v403_v3 = vmul.f32 %v655_v52, %v938_v28  ;;  %vm408_vm9 = vweird.f32 %v655_v52  ;;  %v370_v10 = vadd.f32 %v369_v63, %v368_v51 }
  0xd9   :  { %v418_v0 = vmul.f32 %v657_v60, %v945_v32  ;;  %v659_v7 = vpop.eup %658  ;;  %vm423_vm11 = vweird.f32 %v657_v60  ;;  %v376_v15 = vrot.slane %v375_v6, 2  ;;  %v382_v17 = vadd.f32 %v381_v11, %v380_v57  ;;  %vm409_vm14 = vmor %vm407_vm4, %vm408_vm9 }
  0xda   :  { %v390_v8 = vmul.f32 %v653_v40, %v389_v61  ;;  %v404_v9 = vsub.f32 1.0, %v403_v3  ;;  %v433_v13 = vmul.f32 %v659_v7, %v947_v33  ;;  %v371_v1 = vrot.slane %v370_v10, 1  ;;  %vm424_vm15 = vmor %vm422_vm5, %vm423_vm11 }
  0xdb   :  { %v419_v12 = vsub.f32 1.0, %v418_v0  ;;  %v377_v23 = vadd.f32 %v376_v15, %v375_v6  ;;  %660 = vrcp.f32 %v981_v5  ;;  %vm438_vm13 = vweird.f32 %v659_v7 }
  0xdc   :  { %v391_v16 = vadd.f32 %v653_v40, %v390_v8  ;;  %v405_v58 = vmul.f32 %v655_v52, %v404_v9  ;;  %v434_v21 = vsub.f32 1.0, %v433_v13  ;;  %v383_v27 = vrot.slane %v382_v17, 2  ;;  %vm439_vm2 = vmor %vm437_vm10, %vm438_vm13 }
  0xdd   :  { %v420_v20 = vmul.f32 %v657_v60, %v419_v12  ;;  %v997_v30 = vadd.f32 %v371_v1, %v370_v10  ;;  %v378_v34 = vrot.slane %v377_v23, 1  ;;  %vm427_vm1 = vcmp.eq.f32.partialorder %v426_v47, 8.507059e+37 }
  0xde   :  { %v395_v24 = vsel %vm987_vm12, %v653_v40, %v391_v16  ;;  %v406_v25 = vadd.f32 %v655_v52, %v405_v58  ;;  %v435_v29 = vmul.f32 %v659_v7, %v434_v21  ;;  %v429_v36 = vor.u32 1.1754944e-38, %v428_v41 }
  0xdf   :  { %v421_v22 = vadd.f32 %v657_v60, %v420_v20  ;;  %v384_v37 = vadd.f32 %v383_v27, %v382_v17  ;;  %v400_v38 = vsel %vm970_vm7, %v399_v46, %v395_v24  ;;  %vm442_vm3 = vcmp.eq.f32.partialorder %v441_v49, 8.507059e+37 }
  0xe0   :  { %v410_v35 = vsel %vm409_vm14, %v655_v52, %v406_v25  ;;  %v436_v45 = vadd.f32 %v659_v7, %v435_v29  ;;  %v444_v32 = vor.u32 1.1754944e-38, %v443_v53  ;;  %v1010_v42 = vadd.f32 %v378_v34, %v377_v23 }
  0xe1   :  { %v415_v28 = vsel %vm975_vm8, %v414_v48, %v410_v35  ;;  %v425_v44 = vsel %vm424_vm15, %v657_v60, %v421_v22  ;;  %v661_v47 = vpop.eup %660  ;;  %v385_v51 = vrot.slane %v384_v37, 1  ;;  %662 = vrcp.f32 %v997_v30 }
  0xe2   :  { %v416_v40 = vmul.f32 %v916_v56, %v415_v28  ;;  %v430_v41 = vsel %vm427_vm1, %v429_v36, %v425_v44  ;;  %v440_v43 = vsel %vm439_vm2, %v659_v7, %v436_v45  ;;  %v401_v46 = vmul.f32 %v912_v50, %v400_v38 }
  0xe3   :  { %v445_v48 = vsel %vm442_vm3, %v444_v32, %v440_v43  ;;  %v448_v56 = vmul.f32 %v661_v47, %v981_v5  ;;  %v431_v33 = vmul.f32 %v918_v59, %v430_v41  ;;  %v1019_v60 = vadd.f32 %v385_v51, %v384_v37 }
  0xe4   :  { %v507_v52 = vrot.slane %v416_v40, 4  ;;  %v446_v54 = vmul.f32 %v922_v62, %v445_v48  ;;  %664 = vrcp.f32 %v1010_v42  ;;  %v456_v63 = vand.u32 2147483647, %v981_v5 }
  0xe5   :  { %v449_v53 = vsub.f32 1.0, %v448_v56  ;;  %666 = vrcp.f32 %v1019_v60  ;;  %vm453_vm4 = vweird.f32 %v661_v47  ;;  %vm452_vm5 = vweird.f32 %v981_v5 }
  0xe6   :  { %v508_v49 = vsel %vm112_vm0, %v507_v52, %v401_v46  ;;  %v515_v57 = vrot.slane %v446_v54, 4  ;;  %v458_v9 = vand.u32 2147483648, %v981_v5  ;;  %v471_v10 = vand.u32 2147483647, %v997_v30  ;;  %vm454_vm7 = vmor %vm452_vm5, %vm453_vm4 }
  0xe7   :  { %v512_v55 = vperm.slane %v508_v49, %v878_v26  ;;  %v450_v61 = vmul.f32 %v661_v47, %v449_v53  ;;  %v663_v50 = vpop.eup %662  ;;  %v473_v11 = vand.u32 2147483648, %v997_v30  ;;  %vm467_vm8 = vweird.f32 %v997_v30 }
  0xe8   :  { %v516_v3 = vsel %vm112_vm0, %v515_v57, %v431_v33  ;;  %v463_v59 = vmul.f32 %v663_v50, %v997_v30  ;;  %vm468_vm6 = vweird.f32 %v663_v50  ;;  %vm457_vm9 = vcmp.eq.f32.partialorder %v456_v63, 8.507059e+37 }
  0xe9   :  { %v513_v2 = vrot.slane %v512_v55, 4  ;;  %547 = vst [vmem:[#allocation1] ss:$4 sm:$0xff] %v512_v55  ;;  %v520_v62 = vperm.slane %v516_v3, %v878_v26  ;;  %v451_v6 = vadd.f32 %v661_v47, %v450_v61  ;;  %v459_v5 = vor.u32 1.1754944e-38, %v458_v9  ;;  %vm469_vm10 = vmor %vm467_vm8, %vm468_vm6 }
  0xea   :  { %v464_v7 = vsub.f32 1.0, %v463_v59  ;;  %v665_v8 = vpop.eup %664  ;;  %v474_v18 = vor.u32 1.1754944e-38, %v473_v11  ;;  %vm472_vm11 = vcmp.eq.f32.partialorder %v471_v10, 8.507059e+37  ;;  %vm482_vm12 = vweird.f32 %v1010_v42 }
  0xeb   :  { %v514_v4 = vsel %vm112_vm0, 0.0, %v513_v2  ;;  %v521_v0 = vrot.slane %v520_v62, 4  ;;  %549 = vst [vmem:[#allocation1 + $0x1] ss:$4 sm:$0xff] %v520_v62  ;;  %v478_v15 = vmul.f32 %v665_v8, %v1010_v42  ;;  %v455_v16 = vsel %vm454_vm7, %v661_v47, %v451_v6  ;;  %v667_v17 = vpop.eup %666 }
  0xec   :  { %556 = vst [vmem:[#allocation1 + $0x20] ss:$4 sm:$0xff] %v514_v4  ;;  %v465_v13 = vmul.f32 %v663_v50, %v464_v7  ;;  %v493_v23 = vmul.f32 %v667_v17, %v1019_v60  ;;  %v460_v24 = vsel %vm457_vm9, %v459_v5, %v455_v16  ;;  %vm483_vm13 = vweird.f32 %v665_v8 }
  0xed   :  { %v522_v12 = vsel %vm112_vm0, 0.0, %v521_v0  ;;  %v479_v1 = vsub.f32 1.0, %v478_v15  ;;  %v486_v30 = vand.u32 2147483647, %v1010_v42  ;;  %v488_v34 = vand.u32 2147483648, %v1010_v42  ;;  %vm484_vm15 = vmor %vm482_vm12, %vm483_vm13 }
  0xee   :  { %558 = vst [vmem:[#allocation1 + $0x21] ss:$4 sm:$0xff] %v522_v12  ;;  %v466_v58 = vadd.f32 %v663_v50, %v465_v13  ;;  %v494_v29 = vsub.f32 1.0, %v493_v23  ;;  %v501_v35 = vand.u32 2147483647, %v1019_v60  ;;  %v503_v36 = vand.u32 2147483648, %v1019_v60 }
  0xef   :  { %v480_v21 = vmul.f32 %v665_v8, %v479_v1  ;;  %v461_v37 = vmul.f32 %v930_v14, %v460_v24  ;;  %vm498_vm14 = vweird.f32 %v667_v17  ;;  %vm497_vm1 = vweird.f32 %v1019_v60 }
  0xf0   :  { %v470_v20 = vsel %vm469_vm10, %v663_v50, %v466_v58  ;;  %v495_v38 = vmul.f32 %v667_v17, %v494_v29  ;;  %v489_v40 = vor.u32 1.1754944e-38, %v488_v34  ;;  %vm499_vm2 = vmor %vm497_vm1, %vm498_vm14  ;;  %v504_v32 = vor.u32 1.1754944e-38, %v503_v36 }
  0xf1   :  { %v475_v25 = vsel %vm472_vm11, %v474_v18, %v470_v20  ;;  %v481_v22 = vadd.f32 %v665_v8, %v480_v21  ;;  %vm487_vm3 = vcmp.eq.f32.partialorder %v486_v30, 8.507059e+37  ;;  %vm502_vm4 = vcmp.eq.f32.partialorder %v501_v35, 8.507059e+37 }
  0xf2   :  { %v476_v27 = vmul.f32 %v934_v19, %v475_v25  ;;  %v496_v45 = vadd.f32 %v667_v17, %v495_v38 }
  0xf3   :  { %v485_v44 = vsel %vm484_vm15, %v665_v8, %v481_v22 }
  0xf4   :  { %v523_v28 = vrot.slane %v476_v27, 4  ;;  %v500_v47 = vsel %vm499_vm2, %v667_v17, %v496_v45  ;;  %v490_v41 = vsel %vm487_vm3, %v489_v40, %v485_v44 }
  0xf5   :  { %v505_v14 = vsel %vm502_vm4, %v504_v32, %v500_v47  ;;  %v491_v48 = vmul.f32 %v943_v31, %v490_v41 }
  0xf6   :  { %v524_v19 = vsel %vm112_vm0, %v523_v28, %v461_v37  ;;  %v506_v51 = vmul.f32 %v955_v39, %v505_v14 }
  0xf7   :  { %v528_v42 = vperm.slane %v524_v19, %v878_v26 }
  0xf8   :  { %v531_v52 = vrot.slane %v506_v51, 4 }
  0xf9   :  { %v529_v43 = vrot.slane %v528_v42, 4  ;;  %551 = vst [vmem:[#allocation1 + $0x2] ss:$4 sm:$0xff] %v528_v42 }
  0xfa   :  { %v532_v56 = vsel %vm112_vm0, %v531_v52, %v491_v48 }
  0xfb   :  { %v530_v46 = vsel %vm112_vm0, 0.0, %v529_v43  ;;  %v536_v54 = vperm.slane %v532_v56, %v878_v26 }
  0xfc   :  { %560 = vst [vmem:[#allocation1 + $0x22] ss:$4 sm:$0xff] %v530_v46 }
  0xfd   :  { %v537_v33 = vrot.slane %v536_v54, 4  ;;  %553 = vst [vmem:[#allocation1 + $0x3] ss:$4 sm:$0xff] %v536_v54 }
  0xff   :  { %v538_v49 = vsel %vm112_vm0, 0.0, %v537_v33 }
 0x100   :  { %562 = vst [vmem:[#allocation1 + $0x23] ss:$4 sm:$0xff] %v538_v49 }
 0x104   :  { %v554_v39 = vld.sshfl [vmem:[#allocation1] sm:$0xff pattern:$0x73625140] }
 0x105   :  { %566 = vst [vmem:[#allocation5] sm:$0xff] %v554_v39 }
 0x107   :  { %v563_v31 = vld.sshfl [vmem:[#allocation1 + $0x20] sm:$0xff pattern:$0x73625140] }
 0x108   :  { %567 = vst [vmem:[#allocation5 + $0x8] sm:$0xff] %v563_v31 }
 0x109   :  { %580 = dma.vmem_to_hbm [thread:$0]  %s573_s7, 256, %s575_s23, [#allocation3], %s738_s17, %s738_s17, %s739_s18  }
 0x10a   :  { %730 = dma.done.wait [#allocation3], 256  }
 0x10b   :  { %731 = vsyncadd [#allocation3], 4294967040 }
 0x10c   :  { %732 = dma.done.wait [#allocation7], 256  }
 0x10d   :  { %733 = vsyncadd [#allocation7], 4294967040 }
 0x10e   :  { %602 = vsyncpa [#allocation3], 1 }
 0x10f   :  { %603 = vsyncpa [#allocation7], 1 }
 0x110   :  { %604 = vsyncpa [#allocation4], 1 }

// kernel: elmo_forward.3
= control target key start
LH: loop header
LB: loop body
LE: loop exit
PB: predicated region body
PF: predicated region fallthrough
CT: control target
= control target key end

     0   :  { %vm183_vm0 = vcmask 254976   ;;  %v1816_v19 = vmov 0.0   ;;  %vm211_vm1 = vcmask 261120   ;;  %s1817_s22 = smov 32   ;;  %vm111_vm2 = vcmask 523264   ;;  %s1819_s23 = smov 96   ;;  %s2252_s1 = inlined_call_operand.vmem [shape: bf16[64,256], index: 1, kind: input, shape index: {}]   ;;  %s2253_s2 = inlined_call_operand.vmem [shape: bf16[32,128], index: 2, kind: input, shape index: {}]   ;;  %s2254_s0 = inlined_call_operand.vmem [shape: f32[8,2,64], index: 0, kind: input, shape index: {}]   ;;  %s2255_s3 = inlined_call_operand.vmem [shape: bf16[32,128], index: 3, kind: input, shape index: {}]   ;;  %s2256_s4 = inlined_call_operand.vmem [shape: f32[1,256], index: 4, kind: input, shape index: {}]   ;;  %s2257_s5 = inlined_call_operand.vmem [shape: f32[8,2,64], index: 5, kind: output, shape index: {}]  }
   0x1   :  { %v1602_v0 = vld [vmem:[%s2252_s1 + $0x30] sm:$0xf]  ;;  %v1679_v1 = vld [vmem:[%s2252_s1 + $0x34] sm:$0xf0]  ;;  %v1678_v2 = vld [vmem:[%s2252_s1 + $0x34] sm:$0xf] }
   0x2   :  { %v1603_v3 = vor.u32 %v1679_v1, %v1602_v0  ;;  %v1604_v4 = vld [vmem:[%s2252_s1 + $0x38] sm:$0xf0]  ;;  %v1594_v5 = vld [vmem:[%s2252_s1 + $0x20] sm:$0xf]  ;;  %v1677_v6 = vld [vmem:[%s2252_s1 + $0x24] sm:$0xf0] }
   0x3   :  { %v1607_v7 = vor.u32 %v1678_v2, %v1604_v4  ;;  %v1676_v8 = vld [vmem:[%s2252_s1 + $0x24] sm:$0xf]  ;;  %v1596_v9 = vld [vmem:[%s2252_s1 + $0x28] sm:$0xf0]  ;;  %v1595_v11 = vor.u32 %v1677_v6, %v1594_v5  ;;  %v1586_v13 = vld [vmem:[%s2252_s1 + $0x10] sm:$0xf] }
   0x4   :  { %v1877_v10 = vld [vmem:[%s2253_s2 + $0x8] sm:$0xff]  ;;  %119 = vmatpush.bf16.msra.mxu0 %v1603_v3  ;;  %v1599_v12 = vor.u32 %v1676_v8, %v1596_v9  ;;  %v1675_v14 = vld [vmem:[%s2252_s1 + $0x14] sm:$0xf0]  ;;  %v1889_v15 = vld [vmem:[%s2253_s2] sm:$0xff]  ;;  %184 = vst.msk [vmem:[#allocation2] sm:$0x3] %vm183_vm0, %v1816_v19 }
   0x5   :  { %133 = vmatpush.bf16.msra.mxu1 %v1607_v7  ;;  %221 = vmatpush.bf16.msra.mxu2 %v1877_v10  ;;  %v1674_v16 = vld [vmem:[%s2252_s1 + $0x14] sm:$0xf]  ;;  %v1588_v17 = vld [vmem:[%s2252_s1 + $0x18] sm:$0xf0]  ;;  %v1578_v18 = vld [vmem:[%s2252_s1] sm:$0xf]  ;;  %v1587_v20 = vor.u32 %v1675_v14, %v1586_v13 }
   0x6   :  { %v1673_v21 = vld [vmem:[%s2252_s1 + $0x4] sm:$0xf0]  ;;  %185 = vst.msk [vmem:[#allocation3] sm:$0x3] %vm183_vm0, %v1816_v19  ;;  %v21_v22 = vld [vmem:[%s2254_s0] sm:$0x3]  ;;  %v1591_v23 = vor.u32 %v1674_v16, %v1588_v17 }
   0x7   :  { %v1672_v24 = vld [vmem:[%s2252_s1 + $0x4] sm:$0xf]  ;;  %186 = vst.msk [vmem:[#allocation4] sm:$0x3] %vm183_vm0, %v1816_v19  ;;  %v22_v25 = vld [vmem:[%s2254_s0 + $0x2] sm:$0x3]  ;;  %v1579_v30 = vor.u32 %v1673_v21, %v1578_v18 }
   0x8   :  { %120 = vmatpush.bf16.msra.mxu0 %v1595_v11  ;;  %v1580_v26 = vld [vmem:[%s2252_s1 + $0x8] sm:$0xf0]  ;;  %187 = vst.msk [vmem:[#allocation5] sm:$0x3] %vm183_vm0, %v1816_v19  ;;  %v23_v27 = vld [vmem:[%s2254_s0 + $0x4] sm:$0x3] }
   0x9   :  { %134 = vmatpush.bf16.msra.mxu1 %v1599_v12  ;;  %222 = vmatpush.bf16.msra.mxu2 %v1889_v15  ;;  %v24_v28 = vld [vmem:[%s2254_s0 + $0x6] sm:$0x3]  ;;  %37 = vst [vmem:[#allocation1] ss:$4 sm:$0xff] %v21_v22  ;;  %v1930_v29 = vld [vmem:[%s2255_s3 + $0x8] sm:$0xff]  ;;  %v1583_v32 = vor.u32 %v1672_v24, %v1580_v26  ;;  %vm149_vm3 = vcmask 1041408  }
   0xa   :  { %v25_v31 = vld [vmem:[%s2254_s0 + $0x8] sm:$0x3]  ;;  %39 = vst [vmem:[#allocation1 + $0x1] ss:$4 sm:$0xff] %v22_v25  ;;  %v26_v33 = vld [vmem:[%s2254_s0 + $0xa] sm:$0x3]  ;;  %316 = vmatpush.bf16.msra.mxu3 %v1930_v29 }
   0xb   :  { %v27_v34 = vld [vmem:[%s2254_s0 + $0xc] sm:$0x3]  ;;  %41 = vst [vmem:[#allocation1 + $0x2] ss:$4 sm:$0xff] %v23_v27  ;;  %v197_v35 = vld [vmem:[#allocation2] sm:$0x3] }
   0xc   :  { %121 = vmatpush.bf16.msra.mxu0 %v1587_v20  ;;  %43 = vst [vmem:[#allocation1 + $0x3] ss:$4 sm:$0xff] %v24_v28  ;;  %v1945_v36 = vld [vmem:[%s2255_s3] sm:$0xff]  ;;  %v198_v37 = vpack.c.bf16 %v197_v35, %v197_v35  ;;  %v28_v38 = vld [vmem:[%s2254_s0 + $0xe] sm:$0x3]  ;;  %vm151_vm4 = vcmask 1043458  }
   0xd   :  { %404 = vmatpush.bf16.msrb.mxu2 %v1877_v10  ;;  %135 = vmatpush.bf16.msra.mxu1 %v1591_v23  ;;  %45 = vst [vmem:[#allocation1 + $0x20] ss:$4 sm:$0xff] %v25_v31  ;;  %v249_v39 = vld [vmem:[#allocation3] sm:$0x3]  ;;  %v65_v46 = vld [vmem:[%s2256_s4] sm:$0x3] }
   0xe   :  { %47 = vst [vmem:[#allocation1 + $0x21] ss:$4 sm:$0xff] %v26_v33  ;;  %v293_v40 = vld [vmem:[#allocation4] sm:$0x3]  ;;  %251 = vrot.lane.b32.xlu1 %v249_v39, %s1817_s22  ;;  %1618 = vmatmul.msk.bf16.vlgmr.msra.gmra.mxu2 %vm211_vm1, %v198_v37  ;;  %v67_v48 = vperm.slane %v65_v46, 0  ;;  %v68_v49 = vperm.slane %v65_v46, 1 }
   0xf   :  { %49 = vst [vmem:[#allocation1 + $0x22] ss:$4 sm:$0xff] %v27_v34  ;;  %v294_v41 = vpack.c.bf16 %v293_v40, %v293_v40  ;;  %v347_v42 = vld [vmem:[#allocation5] sm:$0x3]  ;;  %317 = vmatpush.bf16.msra.mxu3 %v1945_v36  ;;  %vm154_vm5 = vcmask 1045508   ;;  %vm157_vm6 = vcmask 1045504  }
  0x10   :  { %122 = vmatpush.bf16.msra.mxu0 %v1579_v30  ;;  %51 = vst [vmem:[#allocation1 + $0x23] ss:$4 sm:$0xff] %v28_v38  ;;  %349 = vrot.lane.b32.xlu2 %v347_v42, %s1817_s22  ;;  %s1818_s4 = smov 64  }
  0x11   :  { %405 = vmatpush.bf16.msrb.mxu2 %v1889_v15  ;;  %136 = vmatpush.bf16.msra.mxu1 %v1583_v32 }
  0x12   :  { %1628 = vmatmul.msk.bf16.vlgmr.msra.gmra.mxu3 %vm211_vm1, %v294_v41 }
  0x13   :  { %488 = vmatpush.bf16.msrb.mxu3 %v1930_v29  ;;  %v52_v43 = vld.sshfl [vmem:[#allocation1] sm:$0xff pattern:$0x73625140] }
  0x14   :  { %575 = vmatpush.bf16.msrb.mxu0 %v1877_v10 }
  0x15   :  { %659 = vmatpush.bf16.msrb.mxu1 %v1930_v29  ;;  %746 = vmatpush.bf16.msra.mxu2 %v1877_v10 }
  0x17   :  { %489 = vmatpush.bf16.msrb.mxu3 %v1945_v36  ;;  %v53_v44 = vld.sshfl [vmem:[#allocation1 + $0x20] sm:$0xff pattern:$0x73625140] }
  0x18   :  { %576 = vmatpush.bf16.msrb.mxu0 %v1889_v15  ;;  %v56_v45 = vpack.c.bf16 %v53_v44, %v52_v43 }
  0x19   :  { %660 = vmatpush.bf16.msrb.mxu1 %v1945_v36  ;;  %747 = vmatpush.bf16.msra.mxu2 %v1889_v15 }
  0x1a   :  { %1608 = vmatmul.msk.bf16.vlgmr.msra.gmra.mxu0 %vm111_vm2, %v56_v45  ;;  %1609 = vmatmul.msk.bf16.vlgmr.msra.gmra.mxu1 %vm111_vm2, %v56_v45 }
  0x1b   :  { %830 = vmatpush.bf16.msra.mxu3 %v1930_v29 }
  0x1c   :  { %916 = vmatpush.bf16.msra.mxu0 %v1877_v10 }
  0x1d   :  { %998 = vmatpush.bf16.msra.mxu1 %v1930_v29 }
  0x1f   :  { %831 = vmatpush.bf16.msra.mxu3 %v1945_v36 }
  0x20   :  { %917 = vmatpush.bf16.msra.mxu0 %v1889_v15 }
  0x21   :  { %999 = vmatpush.bf16.msra.mxu1 %v1945_v36 }
  0x91   :  { %v224_v47 = vpop.f32.mrf.mxu2 }
  0x95   :  { %v319_v50 = vpop.f32.mrf.mxu3 }
  0x97   :  { %v124_v51 = vpop.f32.mrf.mxu0  ;;  %v138_v52 = vpop.f32.mrf.mxu1 }
  0x98   :  { %v125_v53 = vadd.f32 %v124_v51, %v67_v48  ;;  %v139_v54 = vadd.f32 %v138_v52, %v68_v49 }
  0x99   :  { %v226_v56 = vpop.f32.mrf.mxu2 }
  0x9a   :  { %v147_v55 = vrot.slane %v139_v54, 6  ;;  %v350_v54 = vpop.permute.xlu2 %349 }
  0x9c   :  { %v150_v57 = vsel %vm149_vm3, %v125_v53, %v147_v55  ;;  %v152_v58 = vsel %vm151_vm4, %v125_v53, %v147_v55  ;;  %v155_v59 = vsel %vm154_vm5, %v125_v53, %v147_v55  ;;  %v158_v60 = vsel %vm157_vm6, %v147_v55, %v125_v53 }
  0x9d   :  { %v153_v61 = vrot.slane %v152_v58, 2  ;;  %v156_v62 = vrot.slane %v155_v59, 4  ;;  %v159_v63 = vrot.slane %v158_v60, 6  ;;  %175 = vst [vmem:[#allocation6] sm:$0xf] %v150_v57  ;;  %v321_v0 = vpop.f32.mrf.mxu3  ;;  %v252_v58 = vpop.permute.xlu1 %251 }
  0x9f   :  { %176 = vst [vmem:[#allocation6 + $0x4] sm:$0xf] %v153_v61  ;;  %v126_v1 = vpop.f32.mrf.mxu0  ;;  %v140_v2 = vpop.f32.mrf.mxu1 }
  0xa0   :  { %177 = vst [vmem:[#allocation6 + $0x8] sm:$0xf] %v156_v62  ;;  %v141_v3 = vadd.f32 %v140_v2, %v68_v49  ;;  %v127_v4 = vadd.f32 %v126_v1, %v67_v48 }
  0xa1   :  { %178 = vst [vmem:[#allocation6 + $0xc] sm:$0xf] %v159_v63 }
  0xa2   :  { %v148_v5 = vrot.slane %v141_v3, 6 }
  0xa4   :  { %v196_v6 = vld [vmem:[#allocation6] sm:$0xf]  ;;  %v160_v7 = vsel %vm149_vm3, %v127_v4, %v148_v5  ;;  %v161_v8 = vsel %vm151_vm4, %v127_v4, %v148_v5  ;;  %v163_v9 = vsel %vm154_vm5, %v127_v4, %v148_v5  ;;  %v165_v11 = vsel %vm157_vm6, %v148_v5, %v127_v4 }
  0xa5   :  { %v228_v12 = vadd.f32 %v224_v47, %v196_v6  ;;  %v162_v13 = vrot.slane %v161_v8, 2  ;;  %v164_v14 = vrot.slane %v163_v9, 4  ;;  %v166_v16 = vrot.slane %v165_v11, 6  ;;  %179 = vst [vmem:[#allocation6 + $0x10] sm:$0xf] %v160_v7 }
  0xa7   :  { %1688 = vtanh.f32 %v228_v12  ;;  %180 = vst [vmem:[#allocation6 + $0x14] sm:$0xf] %v162_v13  ;;  %v1619_v22 = vmul.f32 -1.442695, %v228_v12 }
  0xa8   :  { %181 = vst [vmem:[#allocation6 + $0x18] sm:$0xf] %v164_v14 }
  0xa9   :  { %182 = vst [vmem:[#allocation6 + $0x1c] sm:$0xf] %v166_v16 }
  0xad   :  { %v1689_v17 = vpop.eup %1688 }
  0xae   :  { %256 = vrot.lane.b32.xlu0 %v1689_v17, %s1818_s4 }
  0xb0   :  { %v292_v18 = vld [vmem:[#allocation6 + $0x1c] sm:$0xf] }
  0xb1   :  { %v324_v19 = vrot.slane %v292_v18, 2 }
  0xb3   :  { %v326_v20 = vadd.f32 %v324_v19, %v319_v50  ;;  %v392_v19 = vld [vmem:[#allocation6 + $0x4] sm:$0xf] }
  0xb5   :  { %1690 = vtanh.f32 %v326_v20  ;;  %v1629_v25 = vmul.f32 -1.442695, %v326_v20 }
  0xb6   :  { %1692 = vpow2.f32 %v1619_v22 }
  0xbb   :  { %v1691_v21 = vpop.eup %1690 }
  0xbc   :  { %354 = vrot.lane.b32.xlu0 %v1691_v21, %s1818_s4  ;;  %v1693_v23 = vpop.eup %1692 }
  0xbd   :  { %v232_v24 = vadd.f32 1.0, %v1693_v23 }
  0xbf   :  { %1694 = vrcp.f32 %v232_v24  ;;  %v244_v35 = vand.u32 2147483648, %v232_v24  ;;  %vm238_vm8 = vweird.f32 %v232_v24  ;;  %v242_v37 = vand.u32 2147483647, %v232_v24 }
  0xc0   :  { %1696 = vpow2.f32 %v1629_v25  ;;  %v476_v25 = vld [vmem:[#allocation6 + $0x18] sm:$0xf] }
  0xc1   :  { %v245_v40 = vor.u32 1.1754944e-38, %v244_v35  ;;  %vm243_vm10 = vcmp.eq.f32.partialorder %v242_v37, 8.507059e+37 }
  0xc5   :  { %v1695_v26 = vpop.eup %1694 }
  0xc6   :  { %v1697_v27 = vpop.eup %1696  ;;  %v234_v28 = vmul.f32 %v1695_v26, %v232_v24  ;;  %vm239_vm7 = vweird.f32 %v1695_v26 }
  0xc7   :  { %v330_v30 = vadd.f32 1.0, %v1697_v27  ;;  %vm240_vm9 = vmor %vm238_vm8, %vm239_vm7 }
  0xc8   :  { %v235_v31 = vsub.f32 1.0, %v234_v28 }
  0xc9   :  { %1698 = vrcp.f32 %v330_v30  ;;  %v342_v47 = vand.u32 2147483648, %v330_v30  ;;  %vm336_vm12 = vweird.f32 %v330_v30  ;;  %v340_v48 = vand.u32 2147483647, %v330_v30 }
  0xca   :  { %v236_v32 = vmul.f32 %v1695_v26, %v235_v31 }
  0xcb   :  { %v343_v50 = vor.u32 1.1754944e-38, %v342_v47  ;;  %vm341_vm14 = vcmp.eq.f32.partialorder %v340_v48, 8.507059e+37 }
  0xcc   :  { %v237_v34 = vadd.f32 %v1695_v26, %v236_v32 }
  0xce   :  { %v241_v39 = vsel %vm240_vm9, %v1695_v26, %v237_v34  ;;  %v496_v26 = vrot.slane %v476_v25, 2 }
  0xcf   :  { %v1699_v33 = vpop.eup %1698  ;;  %v246_v42 = vsel %vm243_vm10, %v245_v40, %v241_v39 }
  0xd0   :  { %v332_v38 = vmul.f32 %v1699_v33, %v330_v30  ;;  %vm337_vm11 = vweird.f32 %v1699_v33  ;;  %v254_v60 = vmul.f32 %v252_v58, %v246_v42 }
  0xd1   :  { %vm338_vm13 = vmor %vm336_vm12, %vm337_vm11 }
  0xd2   :  { %v333_v41 = vsub.f32 1.0, %v332_v38 }
  0xd4   :  { %v334_v45 = vmul.f32 %v1699_v33, %v333_v41 }
  0xd6   :  { %v335_v46 = vadd.f32 %v1699_v33, %v334_v45 }
  0xd8   :  { %v339_v49 = vsel %vm338_vm13, %v1699_v33, %v335_v46 }
  0xd9   :  { %v344_v51 = vsel %vm341_vm14, %v343_v50, %v339_v49 }
  0xda   :  { %v352_v55 = vmul.f32 %v350_v54, %v344_v51 }
 0x120   :  { %v257_v43 = vpop.permute.xlu0 %256 }
 0x121   :  { %v259_v44 = vmul.f32 %v257_v43, %v246_v42 }
 0x123   :  { %261 = vrot.lane.b32.xlu1 %v259_v44, %s1817_s22 }
 0x12e   :  { %v355_v52 = vpop.permute.xlu0 %354 }
 0x12f   :  { %v357_v53 = vmul.f32 %v355_v52, %v344_v51 }
 0x131   :  { %359 = vrot.lane.b32.xlu2 %v357_v53, %s1817_s22 }
 0x18b   :  { %v360_v56 = vpop.permute.xlu2 %359 }
 0x18c   :  { %v362_v57 = vadd.f32 %v360_v56, %v352_v55 }
 0x18e   :  { %1700 = vtanh.f32 %v362_v57 }
 0x194   :  { %v1701_v59 = vpop.eup %1700 }
 0x195   :  { %365 = vrot.lane.b32.xlu1 %v1701_v59, %s1818_s4  ;;  %v262_v61 = vpop.permute.xlu1 %261 }
 0x196   :  { %v264_v62 = vadd.f32 %v262_v61, %v254_v60 }
 0x198   :  { %1702 = vtanh.f32 %v264_v62  ;;  %272 = vst [vmem:[#allocation1] ss:$4 sm:$0xff] %v264_v62 }
 0x19e   :  { %v1703_v63 = vpop.eup %1702 }
 0x19f   :  { %v273_v0 = vld.sshfl [vmem:[#allocation1] sm:$0xff pattern:$0x73625140]  ;;  %267 = vrot.lane.b32.xlu0 %v1703_v63, %s1818_s4 }
 0x1a0   :  { %274 = vrot.lane.b32.xlu1 %v273_v0, %s1819_s23 }
 0x207   :  { %v366_v1 = vpop.permute.xlu1 %365 }
 0x208   :  { %v368_v7 = vmul.f32 %v366_v1, %v344_v51 }
 0x211   :  { %v268_v2 = vpop.permute.xlu0 %267 }
 0x212   :  { %v270_v3 = vmul.f32 %v268_v2, %v246_v42  ;;  %v275_v4 = vpop.permute.xlu1 %274 }
 0x213   :  { %277 = vst.msk [vmem:[#allocation3] sm:$0x3] %vm183_vm0, %v275_v4 }
 0x214   :  { %279 = vst [vmem:[#allocation1] ss:$4 sm:$0xff] %v270_v3 }
 0x21a   :  { %v432_v24 = vld [vmem:[#allocation3] sm:$0x3] }
 0x21b   :  { %v280_v5 = vld.sshfl [vmem:[#allocation1] sm:$0xff pattern:$0x73625140] }
 0x21c   :  { %285 = vst [vmem:[#allocation1] ss:$4 sm:$0xff] %v270_v3  ;;  %281 = vrot.lane.b32.xlu2 %v280_v5, %s1817_s22 }
 0x223   :  { %v1990_v6 = vld.sshfl [vmem:[#allocation1] sm:$0xff pattern:$0x73625140] }
 0x224   :  { %370 = vst [vmem:[#allocation1] ss:$4 sm:$0xff] %v362_v57 }
 0x22b   :  { %v371_v8 = vld.sshfl [vmem:[#allocation1] sm:$0xff pattern:$0x73625140] }
 0x22c   :  { %377 = vst [vmem:[#allocation1] ss:$4 sm:$0xff] %v368_v7 }
 0x233   :  { %v378_v9 = vld.sshfl [vmem:[#allocation1] sm:$0xff pattern:$0x73625140] }
 0x234   :  { %383 = vst [vmem:[#allocation1] ss:$4 sm:$0xff] %v368_v7  ;;  %379 = vrot.lane.b32.xlu0 %v378_v9, %s1817_s22 }
 0x23b   :  { %v2009_v4 = vld.sshfl [vmem:[#allocation1] sm:$0xff pattern:$0x73625140] }
 0x23c   :  { %372 = vrot.lane.b32.xlu0 %v371_v8, %s1819_s23 }
 0x276   :  { %v282_v11 = vpop.permute.xlu2 %281 }
 0x277   :  { %284 = vst.msk [vmem:[#allocation2] sm:$0x3] %vm183_vm0, %v282_v11 }
 0x27e   :  { %v393_v12 = vld [vmem:[#allocation2] sm:$0x3] }
 0x27f   :  { %v394_v13 = vpack.c.bf16 %v393_v12, %v393_v12 }
 0x281   :  { %1631 = vmatmul.msk.bf16.vlgmr.msrb.gmra.mxu2 %vm211_vm1, %v394_v13 }
 0x282   :  { %1083 = vmatpush.bf16.msrb.mxu2 %v1877_v10 }
 0x286   :  { %1084 = vmatpush.bf16.msrb.mxu2 %v1889_v15 }
 0x2a6   :  { %v380_v14 = vpop.permute.xlu0 %379 }
 0x2a7   :  { %382 = vst.msk [vmem:[#allocation4] sm:$0x3] %vm183_vm0, %v380_v14 }
 0x2ae   :  { %v373_v16 = vpop.permute.xlu0 %372  ;;  %v477_v17 = vld [vmem:[#allocation4] sm:$0x3] }
 0x2af   :  { %375 = vst.msk [vmem:[#allocation5] sm:$0x3] %vm183_vm0, %v373_v16  ;;  %v478_v18 = vpack.c.bf16 %v477_v17, %v477_v17 }
 0x2b1   :  { %1634 = vmatmul.msk.bf16.vlgmr.msrb.gmra.mxu3 %vm211_vm1, %v478_v18 }
 0x2b2   :  { %1165 = vmatpush.bf16.msrb.mxu3 %v1930_v29 }
 0x2b6   :  { %1166 = vmatpush.bf16.msrb.mxu3 %v1945_v36  ;;  %v519_v34 = vld [vmem:[#allocation5] sm:$0x3] }
 0x304   :  { %v407_v20 = vpop.f32.mrf.mxu2 }
 0x305   :  { %v411_v21 = vadd.f32 %v407_v20, %v392_v19 }
 0x307   :  { %1704 = vtanh.f32 %v411_v21  ;;  %v1632_v30 = vmul.f32 -1.442695, %v411_v21 }
 0x30c   :  { %v409_v22 = vpop.f32.mrf.mxu2 }
 0x30d   :  { %v1705_v23 = vpop.eup %1704 }
 0x30e   :  { %439 = vrot.lane.b32.xlu2 %v1705_v23, %s1818_s4 }
 0x316   :  { %434 = vrot.lane.b32.xlu2 %v432_v24, %s1817_s22 }
 0x334   :  { %v491_v27 = vpop.f32.mrf.mxu3 }
 0x335   :  { %v498_v28 = vadd.f32 %v496_v26, %v491_v27 }
 0x337   :  { %1706 = vtanh.f32 %v498_v28  ;;  %v1635_v49 = vmul.f32 -1.442695, %v498_v28 }
 0x338   :  { %1708 = vpow2.f32 %v1632_v30 }
 0x33c   :  { %v493_v31 = vpop.f32.mrf.mxu3 }
 0x33d   :  { %v1707_v32 = vpop.eup %1706 }
 0x33e   :  { %526 = vrot.lane.b32.xlu1 %v1707_v32, %s1818_s4  ;;  %v1709_v33 = vpop.eup %1708  ;;  %v563_v32 = vld [vmem:[#allocation6 + $0x8] sm:$0xf] }
 0x33f   :  { %v415_v35 = vadd.f32 1.0, %v1709_v33 }
 0x341   :  { %1710 = vrcp.f32 %v415_v35  ;;  %v427_v42 = vand.u32 2147483648, %v415_v35  ;;  %vm421_vm2 = vweird.f32 %v415_v35  ;;  %v425_v43 = vand.u32 2147483647, %v415_v35 }
 0x342   :  { %1712 = vpow2.f32 %v1635_v49 }
 0x343   :  { %v428_v45 = vor.u32 1.1754944e-38, %v427_v42  ;;  %vm426_vm4 = vcmp.eq.f32.partialorder %v425_v43, 8.507059e+37  ;;  %v647_v42 = vld [vmem:[#allocation6 + $0x14] sm:$0xf] }
 0x344   :  { %v667_v43 = vrot.slane %v647_v42, 2 }
 0x346   :  { %521 = vrot.lane.b32.xlu1 %v519_v34, %s1817_s22 }
 0x347   :  { %v1711_v37 = vpop.eup %1710 }
 0x348   :  { %v417_v38 = vmul.f32 %v1711_v37, %v415_v35  ;;  %vm422_vm15 = vweird.f32 %v1711_v37  ;;  %v1713_v50 = vpop.eup %1712 }
 0x349   :  { %vm423_vm3 = vmor %vm421_vm2, %vm422_vm15  ;;  %v502_v51 = vadd.f32 1.0, %v1713_v50 }
 0x34a   :  { %v418_v39 = vsub.f32 1.0, %v417_v38 }
 0x34b   :  { %1714 = vrcp.f32 %v502_v51  ;;  %v514_v57 = vand.u32 2147483648, %v502_v51  ;;  %vm508_vm6 = vweird.f32 %v502_v51  ;;  %v512_v58 = vand.u32 2147483647, %v502_v51 }
 0x34c   :  { %v419_v40 = vmul.f32 %v1711_v37, %v418_v39 }
 0x34d   :  { %v515_v60 = vor.u32 1.1754944e-38, %v514_v57  ;;  %vm513_vm8 = vcmp.eq.f32.partialorder %v512_v58, 8.507059e+37 }
 0x34e   :  { %v420_v41 = vadd.f32 %v1711_v37, %v419_v40 }
 0x350   :  { %v424_v44 = vsel %vm423_vm3, %v1711_v37, %v420_v41 }
 0x351   :  { %v429_v47 = vsel %vm426_vm4, %v428_v45, %v424_v44  ;;  %v1715_v52 = vpop.eup %1714 }
 0x352   :  { %v504_v53 = vmul.f32 %v1715_v52, %v502_v51  ;;  %vm509_vm5 = vweird.f32 %v1715_v52 }
 0x353   :  { %vm510_vm7 = vmor %vm508_vm6, %vm509_vm5 }
 0x354   :  { %v505_v54 = vsub.f32 1.0, %v504_v53 }
 0x356   :  { %v506_v55 = vmul.f32 %v1715_v52, %v505_v54 }
 0x358   :  { %v507_v56 = vadd.f32 %v1715_v52, %v506_v55 }
 0x35a   :  { %v511_v59 = vsel %vm510_vm7, %v1715_v52, %v507_v56 }
 0x35b   :  { %v516_v62 = vsel %vm513_vm8, %v515_v60, %v511_v59 }
 0x368   :  { %v440_v46 = vpop.permute.xlu2 %439 }
 0x369   :  { %v442_v48 = vmul.f32 %v440_v46, %v429_v47 }
 0x36b   :  { %444 = vrot.lane.b32.xlu0 %v442_v48, %s1817_s22 }
 0x370   :  { %v435_v0 = vpop.permute.xlu2 %434 }
 0x371   :  { %v437_v1 = vmul.f32 %v435_v0, %v429_v47 }
 0x3b0   :  { %v527_v61 = vpop.permute.xlu1 %526 }
 0x3b1   :  { %v529_v63 = vmul.f32 %v527_v61, %v516_v62 }
 0x3b3   :  { %531 = vrot.lane.b32.xlu2 %v529_v63, %s1817_s22 }
 0x3b8   :  { %v522_v7 = vpop.permute.xlu1 %521 }
 0x3b9   :  { %v524_v8 = vmul.f32 %v522_v7, %v516_v62 }
 0x3dd   :  { %v445_v2 = vpop.permute.xlu0 %444 }
 0x3de   :  { %v447_v3 = vadd.f32 %v445_v2, %v437_v1 }
 0x3e0   :  { %1716 = vtanh.f32 %v447_v3  ;;  %455 = vst [vmem:[#allocation1] ss:$4 sm:$0xff] %v447_v3 }
 0x3e6   :  { %v1717_v5 = vpop.eup %1716 }
 0x3e7   :  { %450 = vrot.lane.b32.xlu0 %v1717_v5, %s1818_s4  ;;  %v456_v13 = vld.sshfl [vmem:[#allocation1] sm:$0xff pattern:$0x73625140] }
 0x40d   :  { %v532_v9 = vpop.permute.xlu2 %531 }
 0x40e   :  { %v534_v11 = vadd.f32 %v532_v9, %v524_v8 }
 0x410   :  { %1718 = vtanh.f32 %v534_v11 }
 0x416   :  { %v1719_v12 = vpop.eup %1718 }
 0x417   :  { %537 = vrot.lane.b32.xlu1 %v1719_v12, %s1818_s4 }
 0x41f   :  { %457 = vrot.lane.b32.xlu1 %v456_v13, %s1819_s23 }
 0x459   :  { %v451_v14 = vpop.permute.xlu0 %450 }
 0x45a   :  { %v453_v16 = vmul.f32 %v451_v14, %v429_v47 }
 0x45c   :  { %462 = vst [vmem:[#allocation1] ss:$4 sm:$0xff] %v453_v16 }
 0x463   :  { %v463_v17 = vld.sshfl [vmem:[#allocation1] sm:$0xff pattern:$0x73625140] }
 0x464   :  { %468 = vst [vmem:[#allocation1] ss:$4 sm:$0xff] %v453_v16  ;;  %464 = vrot.lane.b32.xlu2 %v463_v17, %s1817_s22 }
 0x46b   :  { %v2015_v18 = vld.sshfl [vmem:[#allocation1] sm:$0xff pattern:$0x73625140] }
 0x46c   :  { %542 = vst [vmem:[#allocation1] ss:$4 sm:$0xff] %v534_v11 }
 0x473   :  { %v543_v21 = vld.sshfl [vmem:[#allocation1] sm:$0xff pattern:$0x73625140] }
 0x489   :  { %v538_v19 = vpop.permute.xlu1 %537 }
 0x48a   :  { %v540_v20 = vmul.f32 %v538_v19, %v516_v62 }
 0x48c   :  { %549 = vst [vmem:[#allocation1] ss:$4 sm:$0xff] %v540_v20 }
 0x491   :  { %v458_v22 = vpop.permute.xlu1 %457 }
 0x492   :  { %460 = vst.msk [vmem:[#allocation3] sm:$0x3] %vm183_vm0, %v458_v22 }
 0x493   :  { %v550_v23 = vld.sshfl [vmem:[#allocation1] sm:$0xff pattern:$0x73625140] }
 0x494   :  { %555 = vst [vmem:[#allocation1] ss:$4 sm:$0xff] %v540_v20  ;;  %551 = vrot.lane.b32.xlu0 %v550_v23, %s1817_s22 }
 0x499   :  { %v603_v38 = vld [vmem:[#allocation3] sm:$0x3] }
 0x49c   :  { %544 = vrot.lane.b32.xlu0 %v543_v21, %s1819_s23  ;;  %v2035_v21 = vld.sshfl [vmem:[#allocation1] sm:$0xff pattern:$0x73625140] }
 0x4be   :  { %v465_v24 = vpop.permute.xlu2 %464 }
 0x4bf   :  { %467 = vst.msk [vmem:[#allocation2] sm:$0x3] %vm183_vm0, %v465_v24 }
 0x4c6   :  { %v564_v25 = vld [vmem:[#allocation2] sm:$0x3] }
 0x4c7   :  { %v565_v26 = vpack.c.bf16 %v564_v25, %v564_v25 }
 0x4c9   :  { %1637 = vmatmul.msk.bf16.vlgmr.msrb.gmra.mxu0 %vm211_vm1, %v565_v26 }
 0x4ca   :  { %1250 = vmatpush.bf16.msrb.mxu0 %v1877_v10 }
 0x4ce   :  { %1251 = vmatpush.bf16.msrb.mxu0 %v1889_v15 }
 0x506   :  { %v552_v27 = vpop.permute.xlu0 %551 }
 0x507   :  { %554 = vst.msk [vmem:[#allocation4] sm:$0x3] %vm183_vm0, %v552_v27 }
 0x50e   :  { %v545_v28 = vpop.permute.xlu0 %544  ;;  %v648_v30 = vld [vmem:[#allocation4] sm:$0x3] }
 0x50f   :  { %547 = vst.msk [vmem:[#allocation5] sm:$0x3] %vm183_vm0, %v545_v28  ;;  %v649_v31 = vpack.c.bf16 %v648_v30, %v648_v30 }
 0x511   :  { %1640 = vmatmul.msk.bf16.vlgmr.msrb.gmra.mxu1 %vm211_vm1, %v649_v31 }
 0x512   :  { %1332 = vmatpush.bf16.msrb.mxu1 %v1930_v29 }
 0x516   :  { %1333 = vmatpush.bf16.msrb.mxu1 %v1945_v36  ;;  %v690_v51 = vld [vmem:[#allocation5] sm:$0x3] }
 0x546   :  { %v578_v33 = vpop.f32.mrf.mxu0 }
 0x547   :  { %v582_v34 = vadd.f32 %v578_v33, %v563_v32 }
 0x549   :  { %1720 = vtanh.f32 %v582_v34  ;;  %v1638_v39 = vmul.f32 -1.442695, %v582_v34 }
 0x54b   :  { %1722 = vpow2.f32 %v1638_v39 }
 0x54e   :  { %v580_v35 = vpop.f32.mrf.mxu0 }
 0x54f   :  { %v1721_v37 = vpop.eup %1720 }
 0x550   :  { %610 = vrot.lane.b32.xlu2 %v1721_v37, %s1818_s4 }
 0x551   :  { %v1723_v40 = vpop.eup %1722 }
 0x552   :  { %v586_v41 = vadd.f32 1.0, %v1723_v40 }
 0x554   :  { %1724 = vrcp.f32 %v586_v41  ;;  %v598_v54 = vand.u32 2147483648, %v586_v41  ;;  %vm592_vm10 = vweird.f32 %v586_v41  ;;  %v596_v55 = vand.u32 2147483647, %v586_v41 }
 0x556   :  { %v599_v57 = vor.u32 1.1754944e-38, %v598_v54  ;;  %vm597_vm12 = vcmp.eq.f32.partialorder %v596_v55, 8.507059e+37 }
 0x558   :  { %605 = vrot.lane.b32.xlu2 %v603_v38, %s1817_s22 }
 0x55a   :  { %v1725_v46 = vpop.eup %1724 }
 0x55b   :  { %v588_v49 = vmul.f32 %v1725_v46, %v586_v41  ;;  %vm593_vm9 = vweird.f32 %v1725_v46 }
 0x55c   :  { %vm594_vm11 = vmor %vm592_vm10, %vm593_vm9 }
 0x55d   :  { %v589_v50 = vsub.f32 1.0, %v588_v49 }
 0x55f   :  { %v590_v52 = vmul.f32 %v1725_v46, %v589_v50 }
 0x561   :  { %v591_v53 = vadd.f32 %v1725_v46, %v590_v52 }
 0x563   :  { %v595_v56 = vsel %vm594_vm11, %v1725_v46, %v591_v53 }
 0x564   :  { %v600_v59 = vsel %vm597_vm12, %v599_v57, %v595_v56  ;;  %v818_v56 = vld [vmem:[#allocation6 + $0x10] sm:$0xf] }
 0x58e   :  { %v662_v44 = vpop.f32.mrf.mxu1 }
 0x58f   :  { %v669_v45 = vadd.f32 %v667_v43, %v662_v44 }
 0x591   :  { %1726 = vtanh.f32 %v669_v45  ;;  %v1641_v61 = vmul.f32 -1.442695, %v669_v45 }
 0x593   :  { %1728 = vpow2.f32 %v1641_v61 }
 0x596   :  { %v664_v47 = vpop.f32.mrf.mxu1 }
 0x597   :  { %v1727_v48 = vpop.eup %1726  ;;  %v734_v47 = vld [vmem:[#allocation6 + $0xc] sm:$0xf] }
 0x598   :  { %697 = vrot.lane.b32.xlu1 %v1727_v48, %s1818_s4 }
 0x599   :  { %v1729_v62 = vpop.eup %1728 }
 0x59a   :  { %v673_v63 = vadd.f32 1.0, %v1729_v62 }
 0x59c   :  { %1730 = vrcp.f32 %v673_v63  ;;  %v685_v7 = vand.u32 2147483648, %v673_v63  ;;  %vm679_vm14 = vweird.f32 %v673_v63  ;;  %v683_v8 = vand.u32 2147483647, %v673_v63 }
 0x59e   :  { %v686_v11 = vor.u32 1.1754944e-38, %v685_v7  ;;  %vm684_vm2 = vcmp.eq.f32.partialorder %v683_v8, 8.507059e+37 }
 0x5a0   :  { %692 = vrot.lane.b32.xlu1 %v690_v51, %s1817_s22 }
 0x5a2   :  { %v1731_v0 = vpop.eup %1730 }
 0x5a3   :  { %v675_v1 = vmul.f32 %v1731_v0, %v673_v63  ;;  %vm680_vm13 = vweird.f32 %v1731_v0 }
 0x5a4   :  { %vm681_vm15 = vmor %vm679_vm14, %vm680_vm13 }
 0x5a5   :  { %v676_v2 = vsub.f32 1.0, %v675_v1 }
 0x5a7   :  { %v677_v3 = vmul.f32 %v1731_v0, %v676_v2 }
 0x5a9   :  { %v678_v5 = vadd.f32 %v1731_v0, %v677_v3 }
 0x5aa   :  { %v611_v58 = vpop.permute.xlu2 %610 }
 0x5ab   :  { %v613_v60 = vmul.f32 %v611_v58, %v600_v59  ;;  %v682_v9 = vsel %vm681_vm15, %v1731_v0, %v678_v5 }
 0x5ac   :  { %v687_v13 = vsel %vm684_vm2, %v686_v11, %v682_v9 }
 0x5ad   :  { %615 = vrot.lane.b32.xlu0 %v613_v60, %s1817_s22 }
 0x5b2   :  { %v606_v16 = vpop.permute.xlu2 %605 }
 0x5b3   :  { %v608_v17 = vmul.f32 %v606_v16, %v600_v59 }
 0x60a   :  { %v698_v12 = vpop.permute.xlu1 %697 }
 0x60b   :  { %v700_v14 = vmul.f32 %v698_v12, %v687_v13 }
 0x60d   :  { %702 = vrot.lane.b32.xlu2 %v700_v14, %s1817_s22 }
 0x612   :  { %v693_v23 = vpop.permute.xlu1 %692 }
 0x613   :  { %v695_v24 = vmul.f32 %v693_v23, %v687_v13 }
 0x61f   :  { %v616_v19 = vpop.permute.xlu0 %615 }
 0x620   :  { %v618_v20 = vadd.f32 %v616_v19, %v608_v17 }
 0x622   :  { %1732 = vtanh.f32 %v618_v20  ;;  %626 = vst [vmem:[#allocation1] ss:$4 sm:$0xff] %v618_v20 }
 0x628   :  { %v1733_v22 = vpop.eup %1732 }
 0x629   :  { %621 = vrot.lane.b32.xlu0 %v1733_v22, %s1818_s4  ;;  %v627_v28 = vld.sshfl [vmem:[#allocation1] sm:$0xff pattern:$0x73625140] }
 0x667   :  { %v703_v25 = vpop.permute.xlu2 %702 }
 0x668   :  { %v705_v26 = vadd.f32 %v703_v25, %v695_v24 }
 0x66a   :  { %1734 = vtanh.f32 %v705_v26 }
 0x670   :  { %v1735_v27 = vpop.eup %1734 }
 0x671   :  { %708 = vrot.lane.b32.xlu1 %v1735_v27, %s1818_s4 }
 0x679   :  { %628 = vrot.lane.b32.xlu1 %v627_v28, %s1819_s23 }
 0x69b   :  { %v622_v30 = vpop.permute.xlu0 %621 }
 0x69c   :  { %v624_v31 = vmul.f32 %v622_v30, %v600_v59  ;;  %v838_v59 = vrot.slane %v818_v56, 2 }
 0x69e   :  { %633 = vst [vmem:[#allocation1] ss:$4 sm:$0xff] %v624_v31 }
 0x6a5   :  { %v634_v32 = vld.sshfl [vmem:[#allocation1] sm:$0xff pattern:$0x73625140] }
 0x6a6   :  { %639 = vst [vmem:[#allocation1] ss:$4 sm:$0xff] %v624_v31  ;;  %635 = vrot.lane.b32.xlu2 %v634_v32, %s1817_s22 }
 0x6ad   :  { %v2041_v33 = vld.sshfl [vmem:[#allocation1] sm:$0xff pattern:$0x73625140] }
 0x6ae   :  { %713 = vst [vmem:[#allocation1] ss:$4 sm:$0xff] %v705_v26 }
 0x6b5   :  { %v714_v37 = vld.sshfl [vmem:[#allocation1] sm:$0xff pattern:$0x73625140] }
 0x6e3   :  { %v709_v34 = vpop.permute.xlu1 %708 }
 0x6e4   :  { %v711_v35 = vmul.f32 %v709_v34, %v687_v13 }
 0x6e6   :  { %720 = vst [vmem:[#allocation1] ss:$4 sm:$0xff] %v711_v35 }
 0x6eb   :  { %v629_v38 = vpop.permute.xlu1 %628 }
 0x6ec   :  { %631 = vst.msk [vmem:[#allocation3] sm:$0x3] %vm183_vm0, %v629_v38 }
 0x6ed   :  { %v721_v39 = vld.sshfl [vmem:[#allocation1] sm:$0xff pattern:$0x73625140] }
 0x6ee   :  { %726 = vst [vmem:[#allocation1] ss:$4 sm:$0xff] %v711_v35  ;;  %722 = vrot.lane.b32.xlu0 %v721_v39, %s1817_s22 }
 0x6f3   :  { %v774_v50 = vld [vmem:[#allocation3] sm:$0x3] }
 0x6f5   :  { %v2060_v30 = vld.sshfl [vmem:[#allocation1] sm:$0xff pattern:$0x73625140] }
 0x6f6   :  { %715 = vrot.lane.b32.xlu0 %v714_v37, %s1819_s23 }
 0x700   :  { %v636_v40 = vpop.permute.xlu2 %635 }
 0x701   :  { %638 = vst.msk [vmem:[#allocation2] sm:$0x3] %vm183_vm0, %v636_v40 }
 0x708   :  { %v735_v41 = vld [vmem:[#allocation2] sm:$0x3] }
 0x709   :  { %v736_v42 = vpack.c.bf16 %v735_v41, %v735_v41 }
 0x70b   :  { %1643 = vmatmul.msk.bf16.vlgmr.msra.gmra.mxu2 %vm211_vm1, %v736_v42 }
 0x70c   :  { %1417 = vmatpush.bf16.msra.mxu2 %v1877_v10 }
 0x710   :  { %1418 = vmatpush.bf16.msra.mxu2 %v1889_v15 }
 0x760   :  { %v723_v43 = vpop.permute.xlu0 %722 }
 0x761   :  { %725 = vst.msk [vmem:[#allocation4] sm:$0x3] %vm183_vm0, %v723_v43 }
 0x768   :  { %v716_v44 = vpop.permute.xlu0 %715  ;;  %v819_v45 = vld [vmem:[#allocation4] sm:$0x3] }
 0x769   :  { %718 = vst.msk [vmem:[#allocation5] sm:$0x3] %vm183_vm0, %v716_v44  ;;  %v820_v46 = vpack.c.bf16 %v819_v45, %v819_v45 }
 0x76b   :  { %1646 = vmatmul.msk.bf16.vlgmr.msra.gmra.mxu3 %vm211_vm1, %v820_v46 }
 0x76c   :  { %1499 = vmatpush.bf16.msra.mxu3 %v1930_v29 }
 0x770   :  { %1500 = vmatpush.bf16.msra.mxu3 %v1945_v36  ;;  %v861_v8 = vld [vmem:[#allocation5] sm:$0x3] }
 0x78e   :  { %v749_v48 = vpop.f32.mrf.mxu2 }
 0x78f   :  { %v753_v49 = vadd.f32 %v749_v48, %v734_v47 }
 0x791   :  { %1736 = vtanh.f32 %v753_v49  ;;  %v1644_v51 = vmul.f32 -1.442695, %v753_v49 }
 0x793   :  { %1738 = vpow2.f32 %v1644_v51 }
 0x796   :  { %v751_v10 = vpop.f32.mrf.mxu2 }
 0x797   :  { %v1737_v15 = vpop.eup %1736 }
 0x798   :  { %781 = vrot.lane.b32.xlu2 %v1737_v15, %s1818_s4 }
 0x799   :  { %v1739_v52 = vpop.eup %1738 }
 0x79a   :  { %v757_v53 = vadd.f32 1.0, %v1739_v52 }
 0x79c   :  { %1740 = vrcp.f32 %v757_v53  ;;  %v769_v58 = vand.u32 2147483648, %v757_v53  ;;  %vm763_vm4 = vweird.f32 %v757_v53  ;;  %v767_v60 = vand.u32 2147483647, %v757_v53 }
 0x79e   :  { %v770_v0 = vor.u32 1.1754944e-38, %v769_v58  ;;  %vm768_vm6 = vcmp.eq.f32.partialorder %v767_v60, 8.507059e+37 }
 0x7a0   :  { %776 = vrot.lane.b32.xlu2 %v774_v50, %s1817_s22 }
 0x7a2   :  { %v1741_v54 = vpop.eup %1740 }
 0x7a3   :  { %v759_v29 = vmul.f32 %v1741_v54, %v757_v53  ;;  %vm764_vm3 = vweird.f32 %v1741_v54 }
 0x7a4   :  { %vm765_vm5 = vmor %vm763_vm4, %vm764_vm3 }
 0x7a5   :  { %v760_v55 = vsub.f32 1.0, %v759_v29 }
 0x7a7   :  { %v761_v36 = vmul.f32 %v1741_v54, %v760_v55 }
 0x7a9   :  { %v762_v57 = vadd.f32 %v1741_v54, %v761_v36  ;;  %v904_v36 = vld [vmem:[#allocation6 + $0x10] sm:$0xf] }
 0x7ab   :  { %v766_v63 = vsel %vm765_vm5, %v1741_v54, %v762_v57 }
 0x7ac   :  { %v771_v2 = vsel %vm768_vm6, %v770_v0, %v766_v63 }
 0x7ee   :  { %v833_v61 = vpop.f32.mrf.mxu3 }
 0x7ef   :  { %v840_v62 = vadd.f32 %v838_v59, %v833_v61 }
 0x7f1   :  { %1742 = vtanh.f32 %v840_v62  ;;  %v1647_v9 = vmul.f32 -1.442695, %v840_v62 }
 0x7f2   :  { %v782_v1 = vpop.permute.xlu2 %781 }
 0x7f3   :  { %v784_v3 = vmul.f32 %v782_v1, %v771_v2  ;;  %1744 = vpow2.f32 %v1647_v9 }
 0x7f5   :  { %786 = vrot.lane.b32.xlu0 %v784_v3, %s1817_s22 }
 0x7f6   :  { %v835_v5 = vpop.f32.mrf.mxu3 }
 0x7f7   :  { %v1743_v7 = vpop.eup %1742 }
 0x7f8   :  { %868 = vrot.lane.b32.xlu1 %v1743_v7, %s1818_s4 }
 0x7f9   :  { %v1745_v11 = vpop.eup %1744 }
 0x7fa   :  { %v844_v12 = vadd.f32 1.0, %v1745_v11  ;;  %v777_v19 = vpop.permute.xlu2 %776 }
 0x7fb   :  { %v779_v24 = vmul.f32 %v777_v19, %v771_v2 }
 0x7fc   :  { %1746 = vrcp.f32 %v844_v12  ;;  %v856_v22 = vand.u32 2147483648, %v844_v12  ;;  %vm850_vm8 = vweird.f32 %v844_v12  ;;  %v854_v23 = vand.u32 2147483647, %v844_v12 }
 0x7fe   :  { %v857_v28 = vor.u32 1.1754944e-38, %v856_v22  ;;  %vm855_vm10 = vcmp.eq.f32.partialorder %v854_v23, 8.507059e+37 }
 0x800   :  { %863 = vrot.lane.b32.xlu1 %v861_v8, %s1817_s22 }
 0x802   :  { %v1747_v13 = vpop.eup %1746 }
 0x803   :  { %v846_v14 = vmul.f32 %v1747_v13, %v844_v12  ;;  %vm851_vm7 = vweird.f32 %v1747_v13 }
 0x804   :  { %vm852_vm9 = vmor %vm850_vm8, %vm851_vm7 }
 0x805   :  { %v847_v16 = vsub.f32 1.0, %v846_v14 }
 0x807   :  { %v848_v17 = vmul.f32 %v1747_v13, %v847_v16  ;;  %v986_v16 = vld [vmem:[#allocation6 + $0xc] sm:$0xf] }
 0x809   :  { %v849_v20 = vadd.f32 %v1747_v13, %v848_v17  ;;  %v1006_v17 = vrot.slane %v986_v16, 2 }
 0x80b   :  { %v853_v26 = vsel %vm852_vm9, %v1747_v13, %v849_v20 }
 0x80c   :  { %v858_v32 = vsel %vm855_vm10, %v857_v28, %v853_v26 }
 0x867   :  { %v787_v25 = vpop.permute.xlu0 %786 }
 0x868   :  { %v789_v27 = vadd.f32 %v787_v25, %v779_v24 }
 0x86a   :  { %1748 = vtanh.f32 %v789_v27  ;;  %797 = vst [vmem:[#allocation1] ss:$4 sm:$0xff] %v789_v27  ;;  %v869_v31 = vpop.permute.xlu1 %868 }
 0x86b   :  { %v871_v34 = vmul.f32 %v869_v31, %v858_v32 }
 0x86d   :  { %873 = vrot.lane.b32.xlu2 %v871_v34, %s1817_s22 }
 0x870   :  { %v1749_v35 = vpop.eup %1748 }
 0x871   :  { %792 = vrot.lane.b32.xlu0 %v1749_v35, %s1818_s4  ;;  %v798_v42 = vld.sshfl [vmem:[#allocation1] sm:$0xff pattern:$0x73625140] }
 0x872   :  { %v864_v37 = vpop.permute.xlu1 %863 }
 0x873   :  { %v866_v38 = vmul.f32 %v864_v37, %v858_v32 }
 0x8c7   :  { %v874_v39 = vpop.permute.xlu2 %873 }
 0x8c8   :  { %v876_v40 = vadd.f32 %v874_v39, %v866_v38 }
 0x8ca   :  { %1750 = vtanh.f32 %v876_v40 }
 0x8d0   :  { %v1751_v41 = vpop.eup %1750 }
 0x8d1   :  { %879 = vrot.lane.b32.xlu1 %v1751_v41, %s1818_s4 }
 0x8d9   :  { %799 = vrot.lane.b32.xlu1 %v798_v42, %s1819_s23 }
 0x8e3   :  { %v793_v43 = vpop.permute.xlu0 %792 }
 0x8e4   :  { %v795_v44 = vmul.f32 %v793_v43, %v771_v2 }
 0x8e6   :  { %804 = vst [vmem:[#allocation1] ss:$4 sm:$0xff] %v795_v44 }
 0x8ed   :  { %v805_v45 = vld.sshfl [vmem:[#allocation1] sm:$0xff pattern:$0x73625140] }
 0x8ee   :  { %806 = vrot.lane.b32.xlu2 %v805_v45, %s1817_s22  ;;  %810 = vst [vmem:[#allocation1] ss:$4 sm:$0xff] %v795_v44 }
 0x8f5   :  { %v2067_v46 = vld.sshfl [vmem:[#allocation1] sm:$0xff pattern:$0x73625140] }
 0x8f6   :  { %884 = vst [vmem:[#allocation1] ss:$4 sm:$0xff] %v876_v40 }
 0x8fd   :  { %v885_v49 = vld.sshfl [vmem:[#allocation1] sm:$0xff pattern:$0x73625140] }
 0x943   :  { %v880_v47 = vpop.permute.xlu1 %879 }
 0x944   :  { %v882_v48 = vmul.f32 %v880_v47, %v858_v32 }
 0x946   :  { %891 = vst [vmem:[#allocation1] ss:$4 sm:$0xff] %v882_v48 }
 0x948   :  { %v807_v10 = vpop.permute.xlu2 %806 }
 0x949   :  { %809 = vst.msk [vmem:[#allocation2] sm:$0x3] %vm183_vm0, %v807_v10 }
 0x94b   :  { %v800_v15 = vpop.permute.xlu1 %799 }
 0x94c   :  { %802 = vst.msk [vmem:[#allocation3] sm:$0x3] %vm183_vm0, %v800_v15 }
 0x94d   :  { %v892_v50 = vld.sshfl [vmem:[#allocation1] sm:$0xff pattern:$0x73625140] }
 0x94e   :  { %893 = vrot.lane.b32.xlu0 %v892_v50, %s1817_s22  ;;  %897 = vst [vmem:[#allocation1] ss:$4 sm:$0xff] %v882_v48 }
 0x950   :  { %v905_v51 = vld [vmem:[#allocation2] sm:$0x3] }
 0x951   :  { %v906_v52 = vpack.c.bf16 %v905_v51, %v905_v51 }
 0x953   :  { %1649 = vmatmul.msk.bf16.vlgmr.msra.gmra.mxu0 %vm211_vm1, %v906_v52  ;;  %v944_v60 = vld [vmem:[#allocation3] sm:$0x3] }
 0x955   :  { %v2082_v35 = vld.sshfl [vmem:[#allocation1] sm:$0xff pattern:$0x73625140] }
 0x956   :  { %886 = vrot.lane.b32.xlu0 %v885_v49, %s1819_s23 }
 0x9c0   :  { %v894_v53 = vpop.permute.xlu0 %893 }
 0x9c1   :  { %896 = vst.msk [vmem:[#allocation4] sm:$0x3] %vm183_vm0, %v894_v53 }
 0x9c8   :  { %v887_v54 = vpop.permute.xlu0 %886  ;;  %v987_v29 = vld [vmem:[#allocation4] sm:$0x3] }
 0x9c9   :  { %889 = vst.msk [vmem:[#allocation5] sm:$0x3] %vm183_vm0, %v887_v54  ;;  %v988_v55 = vpack.c.bf16 %v987_v29, %v987_v29 }
 0x9cb   :  { %1652 = vmatmul.msk.bf16.vlgmr.msra.gmra.mxu1 %vm211_vm1, %v988_v55 }
 0x9d0   :  { %v919_v56 = vpop.f32.mrf.mxu0  ;;  %v1029_v24 = vld [vmem:[#allocation5] sm:$0x3] }
 0x9d1   :  { %v923_v57 = vadd.f32 %v919_v56, %v904_v36 }
 0x9d3   :  { %1752 = vtanh.f32 %v923_v57  ;;  %v1650_v61 = vmul.f32 -1.442695, %v923_v57 }
 0x9d5   :  { %1754 = vpow2.f32 %v1650_v61 }
 0x9d8   :  { %v921_v58 = vpop.f32.mrf.mxu0 }
 0x9d9   :  { %v1753_v59 = vpop.eup %1752 }
 0x9da   :  { %951 = vrot.lane.b32.xlu2 %v1753_v59, %s1818_s4 }
 0x9db   :  { %v1755_v62 = vpop.eup %1754 }
 0x9dc   :  { %v927_v63 = vadd.f32 1.0, %v1755_v62 }
 0x9de   :  { %1756 = vrcp.f32 %v927_v63  ;;  %v939_v7 = vand.u32 2147483648, %v927_v63  ;;  %vm933_vm12 = vweird.f32 %v927_v63  ;;  %v937_v8 = vand.u32 2147483647, %v927_v63 }
 0x9e0   :  { %v940_v11 = vor.u32 1.1754944e-38, %v939_v7  ;;  %vm938_vm14 = vcmp.eq.f32.partialorder %v937_v8, 8.507059e+37 }
 0x9e2   :  { %946 = vrot.lane.b32.xlu2 %v944_v60, %s1817_s22 }
 0x9e4   :  { %v1757_v0 = vpop.eup %1756 }
 0x9e5   :  { %v929_v1 = vmul.f32 %v1757_v0, %v927_v63  ;;  %vm934_vm11 = vweird.f32 %v1757_v0 }
 0x9e6   :  { %vm935_vm13 = vmor %vm933_vm12, %vm934_vm11 }
 0x9e7   :  { %v930_v2 = vsub.f32 1.0, %v929_v1  ;;  %v1071_v1 = vld [vmem:[#allocation6 + $0x14] sm:$0xf] }
 0x9e9   :  { %v931_v3 = vmul.f32 %v1757_v0, %v930_v2 }
 0x9eb   :  { %v932_v5 = vadd.f32 %v1757_v0, %v931_v3 }
 0x9ed   :  { %v936_v9 = vsel %vm935_vm13, %v1757_v0, %v932_v5 }
 0x9ee   :  { %v941_v13 = vsel %vm938_vm14, %v940_v11, %v936_v9 }
 0xa34   :  { %v952_v12 = vpop.permute.xlu2 %951 }
 0xa35   :  { %v954_v14 = vmul.f32 %v952_v12, %v941_v13 }
 0xa37   :  { %956 = vrot.lane.b32.xlu0 %v954_v14, %s1817_s22 }
 0xa3c   :  { %v947_v28 = vpop.permute.xlu2 %946 }
 0xa3d   :  { %v949_v31 = vmul.f32 %v947_v28, %v941_v13 }
 0xa48   :  { %v1001_v19 = vpop.f32.mrf.mxu1 }
 0xa49   :  { %v1008_v20 = vadd.f32 %v1006_v17, %v1001_v19 }
 0xa4b   :  { %1758 = vtanh.f32 %v1008_v20  ;;  %v1653_v25 = vmul.f32 -1.442695, %v1008_v20 }
 0xa4d   :  { %1760 = vpow2.f32 %v1653_v25 }
 0xa50   :  { %v1003_v22 = vpop.f32.mrf.mxu1 }
 0xa51   :  { %v1759_v23 = vpop.eup %1758 }
 0xa52   :  { %1036 = vrot.lane.b32.xlu1 %v1759_v23, %s1818_s4 }
 0xa53   :  { %v1761_v26 = vpop.eup %1760 }
 0xa54   :  { %v1012_v27 = vadd.f32 1.0, %v1761_v26 }
 0xa56   :  { %1762 = vrcp.f32 %v1012_v27  ;;  %v1024_v43 = vand.u32 2147483648, %v1012_v27  ;;  %vm1018_vm2 = vweird.f32 %v1012_v27  ;;  %v1022_v44 = vand.u32 2147483647, %v1012_v27 }
 0xa58   :  { %v1025_v47 = vor.u32 1.1754944e-38, %v1024_v43  ;;  %vm1023_vm4 = vcmp.eq.f32.partialorder %v1022_v44, 8.507059e+37 }
 0xa5a   :  { %1031 = vrot.lane.b32.xlu1 %v1029_v24, %s1817_s22 }
 0xa5c   :  { %v1763_v37 = vpop.eup %1762 }
 0xa5d   :  { %v1014_v38 = vmul.f32 %v1763_v37, %v1012_v27  ;;  %vm1019_vm15 = vweird.f32 %v1763_v37 }
 0xa5e   :  { %vm1020_vm3 = vmor %vm1018_vm2, %vm1019_vm15 }
 0xa5f   :  { %v1015_v40 = vsub.f32 1.0, %v1014_v38 }
 0xa61   :  { %v1016_v41 = vmul.f32 %v1763_v37, %v1015_v40 }
 0xa63   :  { %v1017_v42 = vadd.f32 %v1763_v37, %v1016_v41 }
 0xa65   :  { %v1021_v45 = vsel %vm1020_vm3, %v1763_v37, %v1017_v42  ;;  %v1153_v37 = vld [vmem:[#allocation6 + $0x8] sm:$0xf] }
 0xa66   :  { %v1026_v49 = vsel %vm1023_vm4, %v1025_v47, %v1021_v45  ;;  %v1173_v38 = vrot.slane %v1153_v37, 2 }
 0xaa9   :  { %v957_v32 = vpop.permute.xlu0 %956 }
 0xaaa   :  { %v959_v34 = vadd.f32 %v957_v32, %v949_v31 }
 0xaac   :  { %1764 = vtanh.f32 %v959_v34  ;;  %967 = vst [vmem:[#allocation1] ss:$4 sm:$0xff] %v959_v34 }
 0xab2   :  { %v1765_v39 = vpop.eup %1764 }
 0xab3   :  { %962 = vrot.lane.b32.xlu0 %v1765_v39, %s1818_s4  ;;  %v968_v29 = vld.sshfl [vmem:[#allocation1] sm:$0xff pattern:$0x73625140] }
 0xac4   :  { %v1037_v48 = vpop.permute.xlu1 %1036 }
 0xac5   :  { %v1039_v10 = vmul.f32 %v1037_v48, %v1026_v49 }
 0xac7   :  { %1041 = vrot.lane.b32.xlu2 %v1039_v10, %s1817_s22 }
 0xacc   :  { %v1032_v15 = vpop.permute.xlu1 %1031 }
 0xacd   :  { %v1034_v50 = vmul.f32 %v1032_v15, %v1026_v49 }
 0xb21   :  { %v1042_v51 = vpop.permute.xlu2 %1041 }
 0xb22   :  { %v1044_v52 = vadd.f32 %v1042_v51, %v1034_v50 }
 0xb24   :  { %1766 = vtanh.f32 %v1044_v52 }
 0xb25   :  { %v963_v53 = vpop.permute.xlu0 %962 }
 0xb26   :  { %v965_v54 = vmul.f32 %v963_v53, %v941_v13 }
 0xb28   :  { %974 = vst [vmem:[#allocation1] ss:$4 sm:$0xff] %v965_v54 }
 0xb2a   :  { %v1767_v55 = vpop.eup %1766 }
 0xb2b   :  { %1047 = vrot.lane.b32.xlu1 %v1767_v55, %s1818_s4 }
 0xb2f   :  { %v975_v36 = vld.sshfl [vmem:[#allocation1] sm:$0xff pattern:$0x73625140] }
 0xb30   :  { %976 = vrot.lane.b32.xlu2 %v975_v36, %s1817_s22  ;;  %980 = vst [vmem:[#allocation1] ss:$4 sm:$0xff] %v965_v54 }
 0xb33   :  { %969 = vrot.lane.b32.xlu1 %v968_v29, %s1819_s23 }
 0xb37   :  { %v2089_v56 = vld.sshfl [vmem:[#allocation1] sm:$0xff pattern:$0x73625140] }
 0xb38   :  { %1052 = vst [vmem:[#allocation1] ss:$4 sm:$0xff] %v1044_v52 }
 0xb3f   :  { %v1053_v62 = vld.sshfl [vmem:[#allocation1] sm:$0xff pattern:$0x73625140] }
 0xb8a   :  { %v977_v57 = vpop.permute.xlu2 %976 }
 0xb8b   :  { %979 = vst.msk [vmem:[#allocation2] sm:$0x3] %vm183_vm0, %v977_v57 }
 0xb92   :  { %v1072_v58 = vld [vmem:[#allocation2] sm:$0x3] }
 0xb93   :  { %v1073_v59 = vpack.c.bf16 %v1072_v58, %v1072_v58 }
 0xb95   :  { %1655 = vmatmul.msk.bf16.vlgmr.msrb.gmra.mxu2 %vm211_vm1, %v1073_v59 }
 0xb9d   :  { %v1048_v60 = vpop.permute.xlu1 %1047 }
 0xb9e   :  { %v1050_v61 = vmul.f32 %v1048_v60, %v1026_v49 }
 0xba0   :  { %1059 = vst [vmem:[#allocation1] ss:$4 sm:$0xff] %v1050_v61 }
 0xba5   :  { %v970_v63 = vpop.permute.xlu1 %969 }
 0xba6   :  { %972 = vst.msk [vmem:[#allocation3] sm:$0x3] %vm183_vm0, %v970_v63 }
 0xba7   :  { %v1060_v0 = vld.sshfl [vmem:[#allocation1] sm:$0xff pattern:$0x73625140] }
 0xba8   :  { %1061 = vrot.lane.b32.xlu0 %v1060_v0, %s1817_s22  ;;  %1065 = vst [vmem:[#allocation1] ss:$4 sm:$0xff] %v1050_v61 }
 0xbad   :  { %v1111_v13 = vld [vmem:[#allocation3] sm:$0x3] }
 0xbaf   :  { %v2104_v49 = vld.sshfl [vmem:[#allocation1] sm:$0xff pattern:$0x73625140] }
 0xbb0   :  { %1054 = vrot.lane.b32.xlu0 %v1053_v62, %s1819_s23 }
 0xc18   :  { %v1086_v2 = vpop.f32.mrf.mxu2 }
 0xc19   :  { %v1090_v3 = vadd.f32 %v1086_v2, %v1071_v1 }
 0xc1a   :  { %v1062_v5 = vpop.permute.xlu0 %1061 }
 0xc1b   :  { %1768 = vtanh.f32 %v1090_v3  ;;  %1064 = vst.msk [vmem:[#allocation4] sm:$0x3] %vm183_vm0, %v1062_v5  ;;  %v1656_v14 = vmul.f32 -1.442695, %v1090_v3 }
 0xc1d   :  { %1770 = vpow2.f32 %v1656_v14 }
 0xc20   :  { %v1088_v7 = vpop.f32.mrf.mxu2 }
 0xc21   :  { %v1769_v8 = vpop.eup %1768 }
 0xc22   :  { %1118 = vrot.lane.b32.xlu2 %v1769_v8, %s1818_s4  ;;  %v1055_v9 = vpop.permute.xlu0 %1054  ;;  %v1154_v11 = vld [vmem:[#allocation4] sm:$0x3] }
 0xc23   :  { %1057 = vst.msk [vmem:[#allocation5] sm:$0x3] %vm183_vm0, %v1055_v9  ;;  %v1155_v12 = vpack.c.bf16 %v1154_v11, %v1154_v11  ;;  %v1771_v16 = vpop.eup %1770 }
 0xc24   :  { %v1094_v17 = vadd.f32 1.0, %v1771_v16 }
 0xc25   :  { %1658 = vmatmul.msk.bf16.vlgmr.msrb.gmra.mxu3 %vm211_vm1, %v1155_v12 }
 0xc26   :  { %1772 = vrcp.f32 %v1094_v17  ;;  %v1106_v25 = vand.u32 2147483648, %v1094_v17  ;;  %vm1100_vm6 = vweird.f32 %v1094_v17  ;;  %v1104_v26 = vand.u32 2147483647, %v1094_v17 }
 0xc28   :  { %v1107_v28 = vor.u32 1.1754944e-38, %v1106_v25  ;;  %vm1105_vm8 = vcmp.eq.f32.partialorder %v1104_v26, 8.507059e+37 }
 0xc2a   :  { %1113 = vrot.lane.b32.xlu2 %v1111_v13, %s1817_s22  ;;  %v1196_v43 = vld [vmem:[#allocation5] sm:$0x3] }
 0xc2c   :  { %v1773_v19 = vpop.eup %1772 }
 0xc2d   :  { %v1096_v20 = vmul.f32 %v1773_v19, %v1094_v17  ;;  %vm1101_vm5 = vweird.f32 %v1773_v19 }
 0xc2e   :  { %vm1102_vm7 = vmor %vm1100_vm6, %vm1101_vm5 }
 0xc2f   :  { %v1097_v22 = vsub.f32 1.0, %v1096_v20 }
 0xc31   :  { %v1098_v23 = vmul.f32 %v1773_v19, %v1097_v22 }
 0xc33   :  { %v1099_v24 = vadd.f32 %v1773_v19, %v1098_v23  ;;  %v1238_v23 = vld [vmem:[#allocation6 + $0x18] sm:$0xf] }
 0xc35   :  { %v1103_v27 = vsel %vm1102_vm7, %v1773_v19, %v1099_v24 }
 0xc36   :  { %v1108_v32 = vsel %vm1105_vm8, %v1107_v28, %v1103_v27 }
 0xc7c   :  { %v1119_v31 = vpop.permute.xlu2 %1118 }
 0xc7d   :  { %v1121_v34 = vmul.f32 %v1119_v31, %v1108_v32 }
 0xc7f   :  { %1123 = vrot.lane.b32.xlu0 %v1121_v34, %s1817_s22 }
 0xc84   :  { %v1114_v44 = vpop.permute.xlu2 %1113 }
 0xc85   :  { %v1116_v45 = vmul.f32 %v1114_v44, %v1108_v32 }
 0xca8   :  { %v1168_v39 = vpop.f32.mrf.mxu3 }
 0xca9   :  { %v1175_v40 = vadd.f32 %v1173_v38, %v1168_v39 }
 0xcab   :  { %1774 = vtanh.f32 %v1175_v40  ;;  %v1659_v10 = vmul.f32 -1.442695, %v1175_v40 }
 0xcb0   :  { %v1170_v41 = vpop.f32.mrf.mxu3 }
 0xcb1   :  { %v1775_v42 = vpop.eup %1774 }
 0xcb2   :  { %1203 = vrot.lane.b32.xlu1 %v1775_v42, %s1818_s4 }
 0xcba   :  { %1198 = vrot.lane.b32.xlu1 %v1196_v43, %s1817_s22 }
 0xcf1   :  { %v1124_v47 = vpop.permute.xlu0 %1123 }
 0xcf2   :  { %v1126_v48 = vadd.f32 %v1124_v47, %v1116_v45 }
 0xcf4   :  { %1776 = vtanh.f32 %v1126_v48  ;;  %1134 = vst [vmem:[#allocation1] ss:$4 sm:$0xff] %v1126_v48 }
 0xcf5   :  { %1778 = vpow2.f32 %v1659_v10 }
 0xcfa   :  { %v1777_v15 = vpop.eup %1776 }
 0xcfb   :  { %1129 = vrot.lane.b32.xlu0 %v1777_v15, %s1818_s4  ;;  %v1779_v50 = vpop.eup %1778  ;;  %v1135_v1 = vld.sshfl [vmem:[#allocation1] sm:$0xff pattern:$0x73625140] }
 0xcfc   :  { %v1179_v51 = vadd.f32 1.0, %v1779_v50 }
 0xcfe   :  { %1780 = vrcp.f32 %v1179_v51  ;;  %v1191_v36 = vand.u32 2147483648, %v1179_v51  ;;  %vm1185_vm10 = vweird.f32 %v1179_v51  ;;  %v1189_v57 = vand.u32 2147483647, %v1179_v51 }
 0xd00   :  { %v1192_v59 = vor.u32 1.1754944e-38, %v1191_v36  ;;  %vm1190_vm12 = vcmp.eq.f32.partialorder %v1189_v57, 8.507059e+37 }
 0xd04   :  { %v1781_v52 = vpop.eup %1780 }
 0xd05   :  { %v1181_v53 = vmul.f32 %v1781_v52, %v1179_v51  ;;  %vm1186_vm9 = vweird.f32 %v1781_v52 }
 0xd06   :  { %vm1187_vm11 = vmor %vm1185_vm10, %vm1186_vm9 }
 0xd07   :  { %v1182_v54 = vsub.f32 1.0, %v1181_v53  ;;  %v1320_v53 = vld [vmem:[#allocation6 + $0x4] sm:$0xf] }
 0xd09   :  { %v1183_v29 = vmul.f32 %v1781_v52, %v1182_v54  ;;  %v1340_v54 = vrot.slane %v1320_v53, 2 }
 0xd0b   :  { %v1184_v55 = vadd.f32 %v1781_v52, %v1183_v29 }
 0xd0d   :  { %v1188_v58 = vsel %vm1187_vm11, %v1781_v52, %v1184_v55 }
 0xd0e   :  { %v1193_v61 = vsel %vm1190_vm12, %v1192_v59, %v1188_v58 }
 0xd24   :  { %v1204_v60 = vpop.permute.xlu1 %1203 }
 0xd25   :  { %v1206_v62 = vmul.f32 %v1204_v60, %v1193_v61 }
 0xd27   :  { %1208 = vrot.lane.b32.xlu2 %v1206_v62, %s1817_s22 }
 0xd2c   :  { %v1199_v3 = vpop.permute.xlu1 %1198 }
 0xd2d   :  { %v1201_v5 = vmul.f32 %v1199_v3, %v1193_v61 }
 0xd6d   :  { %v1130_v63 = vpop.permute.xlu0 %1129 }
 0xd6e   :  { %v1132_v0 = vmul.f32 %v1130_v63, %v1108_v32 }
 0xd70   :  { %1141 = vst [vmem:[#allocation1] ss:$4 sm:$0xff] %v1132_v0 }
 0xd77   :  { %v1142_v2 = vld.sshfl [vmem:[#allocation1] sm:$0xff pattern:$0x73625140] }
 0xd78   :  { %1143 = vrot.lane.b32.xlu2 %v1142_v2, %s1817_s22  ;;  %1147 = vst [vmem:[#allocation1] ss:$4 sm:$0xff] %v1132_v0 }
 0xd7f   :  { %v2109_v9 = vld.sshfl [vmem:[#allocation1] sm:$0xff pattern:$0x73625140] }
 0xd81   :  { %v1209_v7 = vpop.permute.xlu2 %1208 }
 0xd82   :  { %v1211_v8 = vadd.f32 %v1209_v7, %v1201_v5 }
 0xd84   :  { %1782 = vtanh.f32 %v1211_v8  ;;  %1219 = vst [vmem:[#allocation1] ss:$4 sm:$0xff] %v1211_v8 }
 0xd8a   :  { %v1783_v11 = vpop.eup %1782 }
 0xd8b   :  { %1214 = vrot.lane.b32.xlu1 %v1783_v11, %s1818_s4  ;;  %v1220_v19 = vld.sshfl [vmem:[#allocation1] sm:$0xff pattern:$0x73625140] }
 0xd93   :  { %1136 = vrot.lane.b32.xlu1 %v1135_v1, %s1819_s23 }
 0xdd2   :  { %v1144_v12 = vpop.permute.xlu2 %1143 }
 0xdd3   :  { %1146 = vst.msk [vmem:[#allocation2] sm:$0x3] %vm183_vm0, %v1144_v12 }
 0xdda   :  { %v1239_v13 = vld [vmem:[#allocation2] sm:$0x3] }
 0xddb   :  { %v1240_v14 = vpack.c.bf16 %v1239_v13, %v1239_v13 }
 0xddd   :  { %1661 = vmatmul.msk.bf16.vlgmr.msrb.gmra.mxu0 %vm211_vm1, %v1240_v14 }
 0xdfd   :  { %v1215_v16 = vpop.permute.xlu1 %1214 }
 0xdfe   :  { %v1217_v17 = vmul.f32 %v1215_v16, %v1193_v61 }
 0xe00   :  { %1226 = vst [vmem:[#allocation1] ss:$4 sm:$0xff] %v1217_v17 }
 0xe05   :  { %v1137_v20 = vpop.permute.xlu1 %1136 }
 0xe06   :  { %1139 = vst.msk [vmem:[#allocation3] sm:$0x3] %vm183_vm0, %v1137_v20 }
 0xe07   :  { %v1227_v22 = vld.sshfl [vmem:[#allocation1] sm:$0xff pattern:$0x73625140] }
 0xe08   :  { %1228 = vrot.lane.b32.xlu0 %v1227_v22, %s1817_s22  ;;  %1232 = vst [vmem:[#allocation1] ss:$4 sm:$0xff] %v1217_v17 }
 0xe0d   :  { %v1278_v28 = vld [vmem:[#allocation3] sm:$0x3] }
 0xe0f   :  { %v2126_v63 = vld.sshfl [vmem:[#allocation1] sm:$0xff pattern:$0x73625140] }
 0xe10   :  { %1221 = vrot.lane.b32.xlu0 %v1220_v19, %s1819_s23 }
 0xe5a   :  { %v1253_v24 = vpop.f32.mrf.mxu0 }
 0xe5b   :  { %v1257_v25 = vadd.f32 %v1253_v24, %v1238_v23 }
 0xe5d   :  { %1784 = vtanh.f32 %v1257_v25  ;;  %v1662_v38 = vmul.f32 -1.442695, %v1257_v25 }
 0xe5f   :  { %1786 = vpow2.f32 %v1662_v38 }
 0xe62   :  { %v1255_v26 = vpop.f32.mrf.mxu0 }
 0xe63   :  { %v1785_v27 = vpop.eup %1784 }
 0xe64   :  { %1285 = vrot.lane.b32.xlu2 %v1785_v27, %s1818_s4 }
 0xe65   :  { %v1787_v39 = vpop.eup %1786 }
 0xe66   :  { %v1261_v40 = vadd.f32 1.0, %v1787_v39 }
 0xe68   :  { %1788 = vrcp.f32 %v1261_v40  ;;  %v1273_v47 = vand.u32 2147483648, %v1261_v40  ;;  %vm1267_vm14 = vweird.f32 %v1261_v40  ;;  %v1271_v48 = vand.u32 2147483647, %v1261_v40 }
 0xe6a   :  { %v1274_v15 = vor.u32 1.1754944e-38, %v1273_v47  ;;  %vm1272_vm2 = vcmp.eq.f32.partialorder %v1271_v48, 8.507059e+37  ;;  %v1405_v47 = vld [vmem:[#allocation6 + $0x1c] sm:$0xf] }
 0xe6c   :  { %1280 = vrot.lane.b32.xlu2 %v1278_v28, %s1817_s22 }
 0xe6e   :  { %v1789_v41 = vpop.eup %1788 }
 0xe6f   :  { %v1263_v42 = vmul.f32 %v1789_v41, %v1261_v40  ;;  %vm1268_vm13 = vweird.f32 %v1789_v41 }
 0xe70   :  { %vm1269_vm15 = vmor %vm1267_vm14, %vm1268_vm13  ;;  %vm389_vm14 = vcmask 517376  }
 0xe71   :  { %v1264_v43 = vsub.f32 1.0, %v1263_v42 }
 0xe73   :  { %v1265_v44 = vmul.f32 %v1789_v41, %v1264_v43 }
 0xe75   :  { %v1266_v45 = vadd.f32 %v1789_v41, %v1265_v44 }
 0xe77   :  { %v1270_v10 = vsel %vm1269_vm15, %v1789_v41, %v1266_v45 }
 0xe78   :  { %v1275_v51 = vsel %vm1272_vm2, %v1274_v15, %v1270_v10 }
 0xe7a   :  { %v1229_v31 = vpop.permute.xlu0 %1228 }
 0xe7b   :  { %1231 = vst.msk [vmem:[#allocation4] sm:$0x3] %vm183_vm0, %v1229_v31 }
 0xe82   :  { %v1222_v32 = vpop.permute.xlu0 %1221  ;;  %v1321_v34 = vld [vmem:[#allocation4] sm:$0x3] }
 0xe83   :  { %1224 = vst.msk [vmem:[#allocation5] sm:$0x3] %vm183_vm0, %v1222_v32  ;;  %v1322_v37 = vpack.c.bf16 %v1321_v34, %v1321_v34 }
 0xe85   :  { %1664 = vmatmul.msk.bf16.vlgmr.msrb.gmra.mxu1 %vm211_vm1, %v1322_v37 }
 0xe8a   :  { %v1363_v58 = vld [vmem:[#allocation5] sm:$0x3] }
 0xebe   :  { %v1286_v50 = vpop.permute.xlu2 %1285 }
 0xebf   :  { %v1288_v52 = vmul.f32 %v1286_v50, %v1275_v51 }
 0xec1   :  { %1290 = vrot.lane.b32.xlu0 %v1288_v52, %s1817_s22 }
 0xec6   :  { %v1281_v59 = vpop.permute.xlu2 %1280 }
 0xec7   :  { %v1283_v60 = vmul.f32 %v1281_v59, %v1275_v51 }
 0xf02   :  { %v1335_v29 = vpop.f32.mrf.mxu1 }
 0xf03   :  { %v1342_v55 = vadd.f32 %v1340_v54, %v1335_v29 }
 0xf05   :  { %1790 = vtanh.f32 %v1342_v55  ;;  %v1665_v1 = vmul.f32 -1.442695, %v1342_v55 }
 0xf0a   :  { %v1337_v36 = vpop.f32.mrf.mxu1 }
 0xf0b   :  { %v1791_v57 = vpop.eup %1790 }
 0xf0c   :  { %1370 = vrot.lane.b32.xlu1 %v1791_v57, %s1818_s4 }
 0xf14   :  { %1365 = vrot.lane.b32.xlu1 %v1363_v58, %s1817_s22 }
 0xf33   :  { %v1291_v61 = vpop.permute.xlu0 %1290 }
 0xf34   :  { %v1293_v62 = vadd.f32 %v1291_v61, %v1283_v60 }
 0xf36   :  { %1792 = vtanh.f32 %v1293_v62  ;;  %1301 = vst [vmem:[#allocation1] ss:$4 sm:$0xff] %v1293_v62 }
 0xf37   :  { %1794 = vpow2.f32 %v1665_v1 }
 0xf3c   :  { %v1793_v0 = vpop.eup %1792 }
 0xf3d   :  { %1296 = vrot.lane.b32.xlu0 %v1793_v0, %s1818_s4  ;;  %v1795_v2 = vpop.eup %1794  ;;  %v1302_v25 = vld.sshfl [vmem:[#allocation1] sm:$0xff pattern:$0x73625140] }
 0xf3e   :  { %v1346_v3 = vadd.f32 1.0, %v1795_v2 }
 0xf40   :  { %1796 = vrcp.f32 %v1346_v3  ;;  %v1358_v13 = vand.u32 2147483648, %v1346_v3  ;;  %vm1352_vm4 = vweird.f32 %v1346_v3  ;;  %v1356_v14 = vand.u32 2147483647, %v1346_v3 }
 0xf42   :  { %v1359_v17 = vor.u32 1.1754944e-38, %v1358_v13  ;;  %vm1357_vm6 = vcmp.eq.f32.partialorder %v1356_v14, 8.507059e+37 }
 0xf46   :  { %v1797_v5 = vpop.eup %1796 }
 0xf47   :  { %v1348_v7 = vmul.f32 %v1797_v5, %v1346_v3  ;;  %vm1353_vm3 = vweird.f32 %v1797_v5 }
 0xf48   :  { %vm1354_vm5 = vmor %vm1352_vm4, %vm1353_vm3 }
 0xf49   :  { %v1349_v8 = vsub.f32 1.0, %v1348_v7 }
 0xf4b   :  { %v1350_v11 = vmul.f32 %v1797_v5, %v1349_v8 }
 0xf4d   :  { %v1351_v12 = vadd.f32 %v1797_v5, %v1350_v11  ;;  %v1487_v11 = vld [vmem:[#allocation6] sm:$0xf] }
 0xf4f   :  { %v1355_v16 = vsel %vm1354_vm5, %v1797_v5, %v1351_v12  ;;  %v1507_v12 = vrot.slane %v1487_v11, 2 }
 0xf50   :  { %v1360_v20 = vsel %vm1357_vm6, %v1359_v17, %v1355_v16 }
 0xf7e   :  { %v1371_v19 = vpop.permute.xlu1 %1370 }
 0xf7f   :  { %v1373_v22 = vmul.f32 %v1371_v19, %v1360_v20 }
 0xf81   :  { %1375 = vrot.lane.b32.xlu2 %v1373_v22, %s1817_s22 }
 0xf86   :  { %v1366_v27 = vpop.permute.xlu1 %1365 }
 0xf87   :  { %v1368_v28 = vmul.f32 %v1366_v27, %v1360_v20 }
 0xfaf   :  { %v1297_v23 = vpop.permute.xlu0 %1296 }
 0xfb0   :  { %v1299_v24 = vmul.f32 %v1297_v23, %v1275_v51 }
 0xfb2   :  { %1308 = vst [vmem:[#allocation1] ss:$4 sm:$0xff] %v1299_v24 }
 0xfb9   :  { %v1309_v26 = vld.sshfl [vmem:[#allocation1] sm:$0xff pattern:$0x73625140] }
 0xfba   :  { %1310 = vrot.lane.b32.xlu2 %v1309_v26, %s1817_s22  ;;  %1314 = vst [vmem:[#allocation1] ss:$4 sm:$0xff] %v1299_v24 }
 0xfc1   :  { %v2131_v34 = vld.sshfl [vmem:[#allocation1] sm:$0xff pattern:$0x73625140] }
 0xfdb   :  { %v1376_v31 = vpop.permute.xlu2 %1375 }
 0xfdc   :  { %v1378_v32 = vadd.f32 %v1376_v31, %v1368_v28 }
 0xfde   :  { %1798 = vtanh.f32 %v1378_v32  ;;  %1386 = vst [vmem:[#allocation1] ss:$4 sm:$0xff] %v1378_v32 }
 0xfe4   :  { %v1799_v37 = vpop.eup %1798 }
 0xfe5   :  { %1381 = vrot.lane.b32.xlu1 %v1799_v37, %s1818_s4  ;;  %v1387_v43 = vld.sshfl [vmem:[#allocation1] sm:$0xff pattern:$0x73625140] }
 0xfed   :  { %1303 = vrot.lane.b32.xlu1 %v1302_v25, %s1819_s23 }
0x1014   :  { %v1311_v38 = vpop.permute.xlu2 %1310 }
0x1015   :  { %1313 = vst.msk [vmem:[#allocation2] sm:$0x3] %vm183_vm0, %v1311_v38 }
0x101c   :  { %v1406_v39 = vld [vmem:[#allocation2] sm:$0x3] }
0x101d   :  { %v1407_v40 = vpack.c.bf16 %v1406_v39, %v1406_v39 }
0x101f   :  { %1667 = vmatmul.msk.bf16.vlgmr.msra.gmra.mxu2 %vm211_vm1, %v1407_v40 }
0x1057   :  { %v1382_v41 = vpop.permute.xlu1 %1381 }
0x1058   :  { %v1384_v42 = vmul.f32 %v1382_v41, %v1360_v20 }
0x105a   :  { %1393 = vst [vmem:[#allocation1] ss:$4 sm:$0xff] %v1384_v42 }
0x105f   :  { %v1304_v44 = vpop.permute.xlu1 %1303 }
0x1060   :  { %1306 = vst.msk [vmem:[#allocation3] sm:$0x3] %vm183_vm0, %v1304_v44 }
0x1061   :  { %v1394_v45 = vld.sshfl [vmem:[#allocation1] sm:$0xff pattern:$0x73625140] }
0x1062   :  { %1395 = vrot.lane.b32.xlu0 %v1394_v45, %s1817_s22  ;;  %1399 = vst [vmem:[#allocation1] ss:$4 sm:$0xff] %v1384_v42 }
0x1067   :  { %v1445_v51 = vld [vmem:[#allocation3] sm:$0x3] }
0x1069   :  { %v1400_v25 = vld.sshfl [vmem:[#allocation1] sm:$0xff pattern:$0x73625140] }
0x106a   :  { %1388 = vrot.lane.b32.xlu0 %v1387_v43, %s1819_s23 }
0x10a2   :  { %v1420_v48 = vpop.f32.mrf.mxu2 }
0x10a3   :  { %v1424_v10 = vadd.f32 %v1420_v48, %v1405_v47 }
0x10a5   :  { %1800 = vtanh.f32 %v1424_v10  ;;  %v1668_v53 = vmul.f32 -1.442695, %v1424_v10 }
0x10a7   :  { %1802 = vpow2.f32 %v1668_v53 }
0x10aa   :  { %v1422_v15 = vpop.f32.mrf.mxu2 }
0x10ab   :  { %v1801_v50 = vpop.eup %1800 }
0x10ac   :  { %1452 = vrot.lane.b32.xlu2 %v1801_v50, %s1818_s4 }
0x10ad   :  { %v1803_v36 = vpop.eup %1802 }
0x10ae   :  { %v1428_v57 = vadd.f32 1.0, %v1803_v36 }
0x10b0   :  { %1804 = vrcp.f32 %v1428_v57  ;;  %v1440_v0 = vand.u32 2147483648, %v1428_v57  ;;  %vm1434_vm8 = vweird.f32 %v1428_v57  ;;  %v1438_v1 = vand.u32 2147483647, %v1428_v57 }
0x10b2   :  { %v1441_v3 = vor.u32 1.1754944e-38, %v1440_v0  ;;  %vm1439_vm10 = vcmp.eq.f32.partialorder %v1438_v1, 8.507059e+37 }
0x10b4   :  { %1447 = vrot.lane.b32.xlu2 %v1445_v51, %s1817_s22 }
0x10b6   :  { %v1805_v58 = vpop.eup %1804 }
0x10b7   :  { %v1430_v59 = vmul.f32 %v1805_v58, %v1428_v57  ;;  %vm1435_vm7 = vweird.f32 %v1805_v58 }
0x10b8   :  { %vm1436_vm9 = vmor %vm1434_vm8, %vm1435_vm7 }
0x10b9   :  { %v1431_v60 = vsub.f32 1.0, %v1430_v59 }
0x10bb   :  { %v1432_v61 = vmul.f32 %v1805_v58, %v1431_v60 }
0x10bd   :  { %v1433_v62 = vadd.f32 %v1805_v58, %v1432_v61 }
0x10bf   :  { %v1437_v2 = vsel %vm1436_vm9, %v1805_v58, %v1433_v62 }
0x10c0   :  { %v1442_v7 = vsel %vm1439_vm10, %v1441_v3, %v1437_v2 }
0x10d4   :  { %v1396_v52 = vpop.permute.xlu0 %1395 }
0x10d5   :  { %1398 = vst.msk [vmem:[#allocation4] sm:$0x3] %vm183_vm0, %v1396_v52 }
0x10dc   :  { %v1389_v54 = vpop.permute.xlu0 %1388  ;;  %v1488_v29 = vld [vmem:[#allocation4] sm:$0x3] }
0x10dd   :  { %1391 = vst.msk [vmem:[#allocation5] sm:$0x3] %vm183_vm0, %v1389_v54  ;;  %v1489_v55 = vpack.c.bf16 %v1488_v29, %v1488_v29 }
0x10df   :  { %1670 = vmatmul.msk.bf16.vlgmr.msra.gmra.mxu3 %vm211_vm1, %v1489_v55 }
0x10e4   :  { %v1530_v19 = vld [vmem:[#allocation5] sm:$0x3] }
0x1106   :  { %v1453_v5 = vpop.permute.xlu2 %1452 }
0x1107   :  { %v1455_v8 = vmul.f32 %v1453_v5, %v1442_v7 }
0x1109   :  { %1457 = vrot.lane.b32.xlu0 %v1455_v8, %s1817_s22 }
0x110e   :  { %v1448_v20 = vpop.permute.xlu2 %1447 }
0x110f   :  { %v1450_v22 = vmul.f32 %v1448_v20, %v1442_v7 }
0x1162   :  { %v1502_v13 = vpop.f32.mrf.mxu3 }
0x1163   :  { %v1509_v14 = vadd.f32 %v1507_v12, %v1502_v13 }
0x1165   :  { %1806 = vtanh.f32 %v1509_v14  ;;  %v1671_v27 = vmul.f32 -1.442695, %v1509_v14 }
0x116a   :  { %v1504_v16 = vpop.f32.mrf.mxu3 }
0x116b   :  { %v1807_v17 = vpop.eup %1806 }
0x116c   :  { %1537 = vrot.lane.b32.xlu1 %v1807_v17, %s1818_s4 }
0x1174   :  { %1532 = vrot.lane.b32.xlu1 %v1530_v19, %s1817_s22 }
0x117b   :  { %v1458_v23 = vpop.permute.xlu0 %1457 }
0x117c   :  { %v1460_v24 = vadd.f32 %v1458_v23, %v1450_v22 }
0x117e   :  { %1808 = vtanh.f32 %v1460_v24  ;;  %1468 = vst [vmem:[#allocation1] ss:$4 sm:$0xff] %v1460_v24 }
0x117f   :  { %1810 = vpow2.f32 %v1671_v27 }
0x1184   :  { %v1809_v26 = vpop.eup %1808 }
0x1185   :  { %1463 = vrot.lane.b32.xlu0 %v1809_v26, %s1818_s4  ;;  %v1811_v28 = vpop.eup %1810  ;;  %v1469_v47 = vld.sshfl [vmem:[#allocation1] sm:$0xff pattern:$0x73625140] }
0x1186   :  { %v1513_v31 = vadd.f32 1.0, %v1811_v28 }
0x1188   :  { %1812 = vrcp.f32 %v1513_v31  ;;  %vm1519_vm11 = vweird.f32 %v1513_v31  ;;  %v1523_v40 = vand.u32 2147483647, %v1513_v31 }
0x118a   :  { %vm1524_vm13 = vcmp.eq.f32.partialorder %v1523_v40, 8.507059e+37 }
0x118d   :  { %385 = vrot.lane.b32.xlu0 %v2009_v4, %s1818_s4 }
0x118e   :  { %v1813_v32 = vpop.eup %1812 }
0x118f   :  { %v1515_v37 = vmul.f32 %v1813_v32, %v1513_v31  ;;  %vm1520_vm1 = vweird.f32 %v1813_v32 }
0x1190   :  { %vm1521_vm12 = vmor %vm1519_vm11, %vm1520_vm1 }
0x1191   :  { %v1516_v38 = vsub.f32 1.0, %v1515_v37 }
0x1193   :  { %v1517_v4 = vmul.f32 %v1813_v32, %v1516_v38 }
0x1195   :  { %641 = vrot.lane.b32.xlu0 %v2041_v33, %s1817_s22  ;;  %v1518_v39 = vadd.f32 %v1813_v32, %v1517_v4  ;;  %v1525_v33 = vand.u32 2147483648, %v1513_v31 }
0x1197   :  { %v1526_v41 = vor.u32 1.1754944e-38, %v1525_v33 }
0x119d   :  { %899 = vrot.lane.b32.xlu0 %v2082_v35, %s1818_s4  ;;  %v1522_v35 = vsel %vm1521_vm12, %v1813_v32, %v1518_v39 }
0x119e   :  { %v1527_v42 = vsel %vm1524_vm13, %v1526_v41, %v1522_v35 }
0x11a5   :  { %1149 = vrot.lane.b32.xlu0 %v2109_v9, %s1817_s22 }
0x11ad   :  { %1401 = vrot.lane.b32.xlu0 %v1400_v25, %s1818_s4 }
0x11de   :  { %v1538_v9 = vpop.permute.xlu1 %1537 }
0x11df   :  { %v1540_v43 = vmul.f32 %v1538_v9, %v1527_v42 }
0x11e1   :  { %1542 = vrot.lane.b32.xlu2 %v1540_v43, %s1817_s22 }
0x11e9   :  { %287 = vrot.lane.b32.xlu2 %v1990_v6, %s1817_s22 }
0x11f1   :  { %557 = vrot.lane.b32.xlu2 %v2035_v21, %s1818_s4 }
0x11f7   :  { %v1464_v44 = vpop.permute.xlu0 %1463 }
0x11f8   :  { %v1466_v45 = vmul.f32 %v1464_v44, %v1442_v7 }
0x11f9   :  { %812 = vrot.lane.b32.xlu2 %v2067_v46, %s1817_s22 }
0x11fa   :  { %1475 = vst [vmem:[#allocation1] ss:$4 sm:$0xff] %v1466_v45 }
0x11ff   :  { %v386_v48 = vpop.permute.xlu0 %385 }
0x1200   :  { %1630 = vst.msk [vmem:[%s2257_s5 + $0xe] sm:$0x3] %vm389_vm14, %v386_v48 }
0x1201   :  { %1067 = vrot.lane.b32.xlu2 %v2104_v49, %s1818_s4  ;;  %v1476_v6 = vld.sshfl [vmem:[#allocation1] sm:$0xff pattern:$0x73625140]  ;;  %v1533_v49 = vpop.permute.xlu1 %1532 }
0x1202   :  { %1481 = vst [vmem:[#allocation1] ss:$4 sm:$0xff] %v1466_v45  ;;  %v1535_v15 = vmul.f32 %v1533_v49, %v1527_v42 }
0x1207   :  { %v642_v21 = vpop.permute.xlu0 %641 }
0x1208   :  { %1639 = vst.msk [vmem:[%s2257_s5 + $0x4] sm:$0x3] %vm183_vm0, %v642_v21 }
0x1209   :  { %1316 = vrot.lane.b32.xlu2 %v2131_v34, %s1817_s22  ;;  %v1482_v46 = vld.sshfl [vmem:[#allocation1] sm:$0xff pattern:$0x73625140] }
0x120a   :  { %1483 = vrot.lane.b32.xlu0 %v1482_v46, %s1817_s22 }
0x120f   :  { %v900_v10 = vpop.permute.xlu0 %899 }
0x1210   :  { %1648 = vst.msk [vmem:[%s2257_s5 + $0x8] sm:$0x3] %vm389_vm14, %v900_v10 }
0x1211   :  { %1477 = vrot.lane.b32.xlu2 %v1476_v6, %s1817_s22 }
0x123b   :  { %v1543_v50 = vpop.permute.xlu2 %1542 }
0x123c   :  { %v1545_v51 = vadd.f32 %v1543_v50, %v1535_v15 }
0x123e   :  { %1814 = vtanh.f32 %v1545_v51  ;;  %1553 = vst [vmem:[#allocation1] ss:$4 sm:$0xff] %v1545_v51 }
0x1243   :  { %v288_v52 = vpop.permute.xlu2 %287 }
0x1244   :  { %v1815_v53 = vpop.eup %1814  ;;  %290 = vst.msk [vmem:[%s2257_s5] sm:$0x3] %vm183_vm0, %v288_v52 }
0x1245   :  { %1548 = vrot.lane.b32.xlu1 %v1815_v53, %s1818_s4  ;;  %v1554_v57 = vld.sshfl [vmem:[#allocation1] sm:$0xff pattern:$0x73625140] }
0x124b   :  { %v558_v34 = vpop.permute.xlu2 %557 }
0x124c   :  { %1636 = vst.msk [vmem:[%s2257_s5 + $0xc] sm:$0x3] %vm389_vm14, %v558_v34 }
0x124d   :  { %470 = vrot.lane.b32.xlu1 %v2015_v18, %s1817_s22  ;;  %v1150_v18 = vpop.permute.xlu0 %1149 }
0x1253   :  { %v813_v54 = vpop.permute.xlu2 %812 }
0x1254   :  { %1645 = vst.msk [vmem:[%s2257_s5 + $0x6] sm:$0x3] %vm183_vm0, %v813_v54 }
0x1255   :  { %728 = vrot.lane.b32.xlu1 %v2060_v30, %s1818_s4  ;;  %v1402_v36 = vpop.permute.xlu0 %1401 }
0x125b   :  { %v1068_v29 = vpop.permute.xlu2 %1067 }
0x125c   :  { %1654 = vst.msk [vmem:[%s2257_s5 + $0x6] sm:$0x3] %vm389_vm14, %v1068_v29 }
0x125d   :  { %982 = vrot.lane.b32.xlu1 %v2089_v56, %s1817_s22 }
0x1263   :  { %v1317_v55 = vpop.permute.xlu2 %1316 }
0x1264   :  { %1663 = vst.msk [vmem:[%s2257_s5 + $0xc] sm:$0x3] %vm183_vm0, %v1317_v55 }
0x1265   :  { %1234 = vrot.lane.b32.xlu1 %v2126_v63, %s1818_s4 }
0x126b   :  { %v1478_v30 = vpop.permute.xlu2 %1477 }
0x126c   :  { %1480 = vst.msk [vmem:[#allocation2] sm:$0x3] %vm183_vm0, %v1478_v30 }
0x126d   :  { %1470 = vrot.lane.b32.xlu1 %v1469_v47, %s1819_s23 }
0x1275   :  { %1555 = vrot.lane.b32.xlu1 %v1554_v57, %s1819_s23 }
0x127c   :  { %v1484_v56 = vpop.permute.xlu0 %1483 }
0x127d   :  { %1669 = vst.msk [vmem:[%s2257_s5 + $0xe] sm:$0x3] %vm183_vm0, %v1484_v56 }
0x12b7   :  { %v1549_v58 = vpop.permute.xlu1 %1548 }
0x12b8   :  { %v1551_v59 = vmul.f32 %v1549_v58, %v1527_v42 }
0x12ba   :  { %1560 = vst [vmem:[#allocation1] ss:$4 sm:$0xff] %v1551_v59 }
0x12bf   :  { %v471_v63 = vpop.permute.xlu1 %470 }
0x12c0   :  { %1633 = vst.msk [vmem:[%s2257_s5 + $0x2] sm:$0x3] %vm183_vm0, %v471_v63 }
0x12c1   :  { %1666 = vst.msk [vmem:[%s2257_s5 + $0x2] sm:$0x3] %vm389_vm14, %v1402_v36  ;;  %v1561_v60 = vld.sshfl [vmem:[#allocation1] sm:$0xff pattern:$0x73625140] }
0x12c2   :  { %1562 = vrot.lane.b32.xlu2 %v1561_v60, %s1817_s22  ;;  %1566 = vst [vmem:[#allocation1] ss:$4 sm:$0xff] %v1551_v59 }
0x12c7   :  { %v729_v61 = vpop.permute.xlu1 %728 }
0x12c8   :  { %1642 = vst.msk [vmem:[%s2257_s5 + $0xa] sm:$0x3] %vm389_vm14, %v729_v61 }
0x12c9   :  { %1657 = vst.msk [vmem:[%s2257_s5 + $0xa] sm:$0x3] %vm183_vm0, %v1150_v18  ;;  %v1567_v62 = vld.sshfl [vmem:[#allocation1] sm:$0xff pattern:$0x73625140] }
0x12ca   :  { %1568 = vrot.lane.b32.xlu0 %v1567_v62, %s1818_s4 }
0x12cf   :  { %v983_v0 = vpop.permute.xlu1 %982 }
0x12d0   :  { %1651 = vst.msk [vmem:[%s2257_s5 + $0x8] sm:$0x3] %vm183_vm0, %v983_v0 }
0x12d7   :  { %v1235_v1 = vpop.permute.xlu1 %1234 }
0x12d8   :  { %1660 = vst.msk [vmem:[%s2257_s5 + $0x4] sm:$0x3] %vm389_vm14, %v1235_v1 }
0x12df   :  { %v1471_v2 = vpop.permute.xlu1 %1470 }
0x12e0   :  { %1473 = vst.msk [vmem:[#allocation3] sm:$0x3] %vm183_vm0, %v1471_v2 }
0x12e7   :  { %v1556_v3 = vpop.permute.xlu1 %1555 }
0x12e8   :  { %1558 = vst.msk [vmem:[#allocation5] sm:$0x3] %vm183_vm0, %v1556_v3 }
0x131c   :  { %v1563_v5 = vpop.permute.xlu2 %1562 }
0x131d   :  { %1565 = vst.msk [vmem:[#allocation4] sm:$0x3] %vm183_vm0, %v1563_v5 }
0x133c   :  { %v1569_v7 = vpop.permute.xlu0 %1568 }
0x133d   :  { %1571 = vst.msk [vmem:[%s2257_s5] sm:$0x3] %vm389_vm14, %v1569_v7 }

</bundles_post_ra>
